<compile_context>
chip_gen: v5e
topology: v5e:2x2
jax: 0.10.0
libtpu: 0.0.40
codegen_flags: <defaults>
</compile_context>

<pallas_src>
import jax
import jax.numpy as jnp
from jax import lax
from jax.experimental import pallas as pl
from jax.experimental.pallas import tpu as pltpu


# --------------------------------------------------------------------------
# One-time parameter preparation (hoisted out of the forward hot path)
# --------------------------------------------------------------------------
def make_relative_position_index(window_size):
    Wh, Ww = window_size
    coords = jnp.stack(jnp.meshgrid(jnp.arange(Wh), jnp.arange(Ww), indexing="ij"))
    coords_flatten = coords.reshape(2, -1)                         # (2, S)
    rel = coords_flatten[:, :, None] - coords_flatten[:, None, :]  # (2, S, S)
    rel = rel.transpose(1, 2, 0)                                   # (S, S, 2)
    rel = rel.at[:, :, 0].add(Wh - 1)
    rel = rel.at[:, :, 1].add(Ww - 1)
    rel = rel.at[:, :, 0].multiply(2 * Ww - 1)
    return rel.sum(-1)                                             # (S, S)


def prepare_attention_params(params, window_size, num_heads):
    """Fused QKV weight (bf16, scale folded into Q), fused bias (f32, K bias
    dropped -- softmax-invariant), relative-position bias (H, S, S) f32."""
    S = window_size[0] * window_size[1]
    C = params["wq"].shape[0]                    # all_head_size (torch Linear: (out,in))
    Dh = C // num_heads
    scale = Dh ** (-0.5)

    wq = params["wq"].T * scale                  # fold softmax scale into Q weights
    bq = params["bq"] * scale                    # ... and Q bias
    wk = params["wk"].T
    wv = params["wv"].T
    # K bias shifts every score in a row by the same constant (q_i . b_k) which
    # softmax cancels exactly -> drop it (keep the column slot for a single
    # fused broadcast bias add).
    bk = jnp.zeros_like(params["bk"])

    w_fused = jnp.concatenate([wq, wk, wv], axis=1).astype(jnp.bfloat16)   # (C, C+2*Ckv)
    b_fused = jnp.concatenate([bq, bk, params["bv"]])[None, :].astype(jnp.float32)

    rpi = make_relative_position_index(window_size)                # (S, S)
    bias = params["rel_pos_table"][rpi.reshape(-1)]                # (S*S, H)
    bias = bias.reshape(S, S, num_heads).transpose(2, 0, 1)        # (H, S, S)
    return {"w_fused": w_fused, "b_fused": b_fused,
            "rel_bias": bias.astype(jnp.float32)}


# --------------------------------------------------------------------------
# VMEM-budget helpers / window-block choice
# --------------------------------------------------------------------------
def _vmem_budget_bytes():
    cap = 64 * 1024 * 1024
    try:
        info = pltpu.get_tpu_info()
        cap = int(getattr(info, "vmem_capacity_bytes", cap))
    except Exception:
        pass
    # ~55% of physical VMEM, capped: ~70 MiB on v5e/v6e (128 MiB), ~35 MiB on v7x (64 MiB).
    return max(16 << 20, min(int(cap * 0.55), 100 << 20))


def _choose_window_block(B, S, C, H, n_fused, has_mask, budget_bytes, target_rows=512):
    """Largest divisor-of-B windows-per-step whose per-step footprint fits the
    budget; keep >=2 grid steps (pipelining + v7x 2-TC sharding) when possible
    and stop once the QKV matmul M dim reaches target_rows with an even grid."""
    def step_bytes(wb):
        rows = wb * S
        # streamed blocks are double-buffered: hs bf16 in, f32 out, bf16 mask
        stream = 2 * rows * (C * 2 + C * 4 + (S * 2 if has_mask else 0))
        # rough upper bound for compiler-managed intermediates (qkv, q/k/v, scores, merge)
        interm = rows * n_fused * 4 + 8 * rows * C * 4 + 4 * wb * H * S * S * 4
        return stream + interm

    divisors = [d for d in range(1, B + 1)
                if B % d == 0 and ((d * S) % 8 == 0 or d == B)]
    best = divisors[0]
    for wb in divisors:
        grid = B // wb
        if step_bytes(wb) > budget_bytes:
            break
        if grid < 2 and wb != divisors[0]:
            break                              # never collapse the grid to 1 if avoidable
        best = wb
        if wb * S >= target_rows and grid % 2 == 0:
            break
    return best


# --------------------------------------------------------------------------
# Fused kernel: QKV projection + batched per-head attention + head merge
# --------------------------------------------------------------------------
def _make_fused_kernel(*, S, C, Ckv, Dh, H, Hkv, WB, has_mask):
    rep = H // Hkv

    def kernel(*refs):
        if has_mask:
            hs_ref, w_ref, b_ref, bias_ref, mask_ref, o_ref = refs
        else:
            hs_ref, w_ref, b_ref, bias_ref, o_ref = refs
            mask_ref = None

        # ---- fused QKV projection: one wide bf16 MXU matmul, f32 accumulation
        x = hs_ref[...]                                            # (WB*S, C) bf16
        qkv = jnp.dot(x, w_ref[...], preferred_element_type=jnp.float32)
        qkv = qkv + b_ref[...]                                     # (WB*S, C+2*Ckv) f32

        # ---- head split once per step (heads become a dot_general batch dim)
        q = qkv[:, :C].reshape(WB, S, H, Dh).transpose(0, 2, 1, 3)          # (WB, H, S, Dh)
        k = qkv[:, C:C + Ckv].reshape(WB, S, Hkv, Dh).transpose(0, 2, 1, 3)  # (WB, Hkv, S, Dh)
        v = qkv[:, C + Ckv:].reshape(WB, S, Hkv, Dh).transpose(0, 2, 1, 3)
        if rep > 1:
            # GQA: query head h uses kv head h % Hkv (torch .repeat ordering).
            k = jnp.tile(k, (1, rep, 1, 1))
            v = jnp.tile(v, (1, rep, 1, 1))
        qb = q.reshape(WB * H, S, Dh).astype(jnp.bfloat16)
        kb = k.reshape(WB * H, S, Dh).astype(jnp.bfloat16)
        vb = v.reshape(WB * H, S, Dh).astype(jnp.bfloat16)

        # ---- scores: ONE batched matmul over (window, head); scale pre-folded into Wq
        s = lax.dot_general(qb, kb, (((2,), (2,)), ((0,), (0,))),
                            preferred_element_type=jnp.float32)    # (WB*H, S, S)
        s = s.reshape(WB, H, S, S)
        s = s + bias_ref[...][None]                                # rel-pos bias, bcast over WB
        if has_mask:
            s = s + mask_ref[...].astype(jnp.float32)[:, None]     # window mask, bcast over H

        # ---- softmax (exact normalization applied AFTER the PV matmul)
        s = s - jnp.max(s, axis=-1, keepdims=True)
        p = jnp.exp(s)
        denom = jnp.sum(p, axis=-1, keepdims=True)                 # (WB, H, S, 1)

        pv = lax.dot_general(p.reshape(WB * H, S, S).astype(jnp.bfloat16), vb,
                             (((2,), (1,)), ((0,), (0,))),
                             preferred_element_type=jnp.float32)   # (WB*H, S, Dh)
        o = pv.reshape(WB, H, S, Dh) * pl.reciprocal(denom, approx=False)

        # ---- merge heads and do ONE lane-dense (WB*S, C) store
        out = o.transpose(0, 2, 1, 3).reshape(WB * S, C)
        o_ref[...] = out.astype(o_ref.dtype)

    return kernel


# --------------------------------------------------------------------------
# Forward wrapper (mirrors DonutSwinSelfAttention.forward)
# --------------------------------------------------------------------------
def donut_swin_self_attention(hidden_states, prepared, *, num_heads, num_kv_heads,
                              attention_mask=None, window_block=None):
    """hidden_states: (batch_windows, seq, channels); prepared from prepare_attention_params."""
    B, S, C = hidden_states.shape
    Dh = C // num_heads
    Ckv = num_kv_heads * Dh
    Nf = C + 2 * Ckv
    has_mask = attention_mask is not None

    budget = _vmem_budget_bytes()
    resident = 2 * (C * Nf * 2 + Nf * 4 + num_heads * S * S * 4)
    if (window_block is not None and B % window_block == 0
            and ((window_block * S) % 8 == 0 or window_block == B)):
        WB = window_block
    else:
        WB = _choose_window_block(B, S, C, num_heads, Nf, has_mask,
                                  max(budget - resident, 4 << 20))
    grid = (B // WB,)

    # bf16 streaming of the only per-step streamed tensors (hidden states, mask).
    hs2 = hidden_states.reshape(B * S, C).astype(jnp.bfloat16)

    in_specs = [
        pl.BlockSpec((WB * S, C), lambda i: (i, 0)),               # hidden rows (streamed)
        pl.BlockSpec((C, Nf), lambda i: (0, 0)),                   # fused QKV weight (resident)
        pl.BlockSpec((1, Nf), lambda i: (0, 0)),                   # fused bias (resident)
        pl.BlockSpec((num_heads, S, S), lambda i: (0, 0, 0)),      # rel-pos bias (resident)
    ]
    inputs = [hs2, prepared["w_fused"], prepared["b_fused"], prepared["rel_bias"]]
    if has_mask:
        Mb = attention_mask.shape[0]
        assert B % Mb == 0, "mask batch must divide window batch (torch repeat semantics)"
        mask_full = jnp.tile(attention_mask, (B // Mb, 1, 1)).astype(jnp.bfloat16)  # (B, S, S)
        in_specs.append(pl.BlockSpec((WB, S, S), lambda i: (i, 0, 0)))
        inputs.append(mask_full)

    kernel = _make_fused_kernel(S=S, C=C, Ckv=Ckv, Dh=Dh, H=num_heads,
                                Hkv=num_kv_heads, WB=WB, has_mask=has_mask)

    out = pl.pallas_call(
        kernel,
        out_shape=jax.ShapeDtypeStruct((B * S, C), jnp.float32),
        grid_spec=pltpu.PrefetchScalarGridSpec(
            num_scalar_prefetch=0,
            grid=grid,
            in_specs=in_specs,
            out_specs=pl.BlockSpec((WB * S, C), lambda i: (i, 0)),
        ),
        compiler_params=pltpu.CompilerParams(
            dimension_semantics=("parallel",),        # shard window blocks across TCs (v7x)
            vmem_limit_bytes=budget,                  # generation-sized scoped VMEM limit
        ),
    )(*inputs)
    return out.reshape(B, S, C)


# --------------------------------------------------------------------------
# Pure-JAX f32 reference (module semantics)
# --------------------------------------------------------------------------
def reference(hidden_states, params, *, num_heads, num_kv_heads, window_size,
              attention_mask=None):
    B, S, C = hidden_states.shape
    head_dim = C // num_heads
    kv_repeats = num_heads // num_kv_heads
    scale = head_dim ** (-0.5)
    q = hidden_states @ params["wq"].T + params["bq"]
    k = hidden_states @ params["wk"].T + params["bk"]
    v = hidden_states @ params["wv"].T + params["bv"]
    q = q.reshape(B, S, num_heads, head_dim).transpose(0, 2, 1, 3)
    k = jnp.tile(k.reshape(B, S, num_kv_heads, head_dim), (1, 1, kv_repeats, 1)).transpose(0, 2, 1, 3)
    v = jnp.tile(v.reshape(B, S, num_kv_heads, head_dim), (1, 1, kv_repeats, 1)).transpose(0, 2, 1, 3)
    rpi = make_relative_position_index(window_size)
    bias = params["rel_pos_table"][rpi.reshape(-1)].reshape(S, S, num_heads).transpose(2, 0, 1)
    mask = jnp.broadcast_to(bias[None], (B, num_heads, S, S))
    if attention_mask is not None:
        rep = B // attention_mask.shape[0]
        mask = mask + jnp.tile(attention_mask, (rep, 1, 1))[:, None, :, :]
    s = jnp.einsum("bhqd,bhkd->bhqk", q, k) * scale + mask
    p = jax.nn.softmax(s, axis=-1)
    o = jnp.einsum("bhqk,bhkd->bhqd", p, v)
    return o.transpose(0, 2, 1, 3).reshape(B, S, C)


# --------------------------------------------------------------------------
if __name__ == "__main__":
    B = 8                                          # window batches
    window_size = (4, 4)
    S = window_size[0] * window_size[1]            # 16
    num_heads = 4
    num_kv_heads = 2
    C = 32                                         # all_head_size
    head_dim = C // num_heads
    kv_size = num_kv_heads * head_dim

    key = jax.random.PRNGKey(0)
    ks = jax.random.split(key, 10)
    params = {
        "wq": jax.random.normal(ks[0], (C, C), jnp.float32) * 0.05,       # torch Linear: (out, in)
        "bq": jax.random.normal(ks[1], (C,), jnp.float32) * 0.05,
        "wk": jax.random.normal(ks[2], (kv_size, C), jnp.float32) * 0.05,
        "bk": jax.random.normal(ks[3], (kv_size,), jnp.float32) * 0.05,
        "wv": jax.random.normal(ks[4], (kv_size, C), jnp.float32) * 0.05,
        "bv": jax.random.normal(ks[5], (kv_size,), jnp.float32) * 0.05,
        "rel_pos_table": jax.random.normal(
            ks[6], ((2 * window_size[0] - 1) * (2 * window_size[1] - 1), num_heads),
            jnp.float32) * 0.1,
    }
    hidden_states = jax.random.normal(ks[7], (B, S, C), jnp.float32)
    attn_mask = jax.random.normal(ks[8], (2, S, S), jnp.float32) * 0.5     # mask_b=2, tiled over B

    prepared = prepare_attention_params(params, window_size, num_heads)

    # Case 1: relative-position bias only (no additional attention mask).
    out0 = donut_swin_self_attention(
        hidden_states, prepared, num_heads=num_heads, num_kv_heads=num_kv_heads,
        attention_mask=None)
    ref0 = reference(hidden_states, params, num_heads=num_heads,
                     num_kv_heads=num_kv_heads, window_size=window_size,
                     attention_mask=None)

    # Case 2: shifted-window style additive mask.
    out1 = donut_swin_self_attention(
        hidden_states, prepared, num_heads=num_heads, num_kv_heads=num_kv_heads,
        attention_mask=attn_mask)
    ref1 = reference(hidden_states, params, num_heads=num_heads,
                     num_kv_heads=num_kv_heads, window_size=window_size,
                     attention_mask=attn_mask)

    out0, out1 = jax.block_until_ready((out0, out1))

    assert out0.shape == (B, S, C) and out1.shape == (B, S, C)
    # Precision contract: bf16 MXU operands (f32 accumulation / f32 softmax) -> ~1e-2.
    assert jnp.allclose(out0, ref0, atol=2e-2, rtol=2e-2), "mismatch vs reference (no mask)"
    assert jnp.allclose(out1, ref1, atol=2e-2, rtol=2e-2), "mismatch vs reference (with mask)"
    print("KERNEL_OK")
</pallas_src>

<mosaic_0001>
module attributes {stable_mosaic.version = 11 : i64} {
  func.func @kernel(%arg0: i32, %arg1: memref<64x32xbf16, #tpu.memory_space<vmem>>, %arg2: memref<32x64xbf16, #tpu.memory_space<vmem>>, %arg3: memref<1x64xf32, #tpu.memory_space<vmem>>, %arg4: memref<4x16x16xf32, #tpu.memory_space<vmem>>, %arg5: memref<64x32xf32, #tpu.memory_space<vmem>>) attributes {dimension_semantics = [#tpu.dimension_semantics<parallel>], iteration_bounds = array<i64: 2>, scalar_prefetch = 0 : i64, scratch_operands = 0 : i64, tpu.core_type = #tpu.core_type<tc>, window_params = [{transform_indices = @transform_0, window_bounds = array<i64: 64, 32>}, {pipeline_mode = #tpu.pipeline_mode<synchronous>, transform_indices = @transform_1, window_bounds = array<i64: 32, 64>}, {pipeline_mode = #tpu.pipeline_mode<synchronous>, transform_indices = @transform_2, window_bounds = array<i64: 1, 64>}, {pipeline_mode = #tpu.pipeline_mode<synchronous>, transform_indices = @transform_3, window_bounds = array<i64: 4, 16, 16>}, {transform_indices = @transform_4, window_bounds = array<i64: 64, 32>}]} {
    %c0 = arith.constant 0 : index
    %c0_0 = arith.constant 0 : index
    %0 = vector.load %arg1[%c0, %c0_0] : memref<64x32xbf16, #tpu.memory_space<vmem>>, vector<64x32xbf16>
    %c0_1 = arith.constant 0 : index
    %c0_2 = arith.constant 0 : index
    %1 = vector.load %arg2[%c0_1, %c0_2] : memref<32x64xbf16, #tpu.memory_space<vmem>>, vector<32x64xbf16>
    %cst = arith.constant dense<0.000000e+00> : vector<64x64xf32>
    %2 = tpu.matmul %0, %1, %cst {dimension_numbers = #tpu.dot_dimension_numbers<[1], [0], [0], [1], [0, 0, 1, 1], [], []>} : vector<64x32xbf16>, vector<32x64xbf16>, vector<64x64xf32> -> vector<64x64xf32>
    %c0_3 = arith.constant 0 : index
    %c0_4 = arith.constant 0 : index
    %3 = vector.load %arg3[%c0_3, %c0_4] : memref<1x64xf32, #tpu.memory_space<vmem>>, vector<1x64xf32>
    %4 = vector.broadcast %3 : vector<1x64xf32> to vector<64x64xf32>
    %5 = arith.addf %2, %4 : vector<64x64xf32>
    %6 = vector.extract_strided_slice %5 {offsets = [0, 0], sizes = [64, 32], strides = [1, 1]} : vector<64x64xf32> to vector<64x32xf32>
    %7 = vector.shape_cast %6 : vector<64x32xf32> to vector<4x16x4x8xf32>
    %8 = tpu.transpose %7, [0, 2, 1, 3] : vector<4x16x4x8xf32> -> vector<4x4x16x8xf32>
    %9 = vector.extract_strided_slice %5 {offsets = [0, 32], sizes = [64, 16], strides = [1, 1]} : vector<64x64xf32> to vector<64x16xf32>
    %10 = vector.shape_cast %9 : vector<64x16xf32> to vector<4x16x2x8xf32>
    %11 = tpu.transpose %10, [0, 2, 1, 3] : vector<4x16x2x8xf32> -> vector<4x2x16x8xf32>
    %12 = vector.extract_strided_slice %5 {offsets = [0, 48], sizes = [64, 16], strides = [1, 1]} : vector<64x64xf32> to vector<64x16xf32>
    %13 = vector.shape_cast %12 : vector<64x16xf32> to vector<4x16x2x8xf32>
    %14 = tpu.transpose %13, [0, 2, 1, 3] : vector<4x16x2x8xf32> -> vector<4x2x16x8xf32>
    %15 = tpu.concatenate %11, %11 in 1 : vector<4x2x16x8xf32>, vector<4x2x16x8xf32> -> vector<4x4x16x8xf32>
    %16 = tpu.concatenate %14, %14 in 1 : vector<4x2x16x8xf32>, vector<4x2x16x8xf32> -> vector<4x4x16x8xf32>
    %17 = vector.shape_cast %8 : vector<4x4x16x8xf32> to vector<16x16x8xf32>
    %18 = arith.truncf %17 : vector<16x16x8xf32> to vector<16x16x8xbf16>
    %19 = vector.shape_cast %15 : vector<4x4x16x8xf32> to vector<16x16x8xf32>
    %20 = arith.truncf %19 : vector<16x16x8xf32> to vector<16x16x8xbf16>
    %21 = vector.shape_cast %16 : vector<4x4x16x8xf32> to vector<16x16x8xf32>
    %22 = arith.truncf %21 : vector<16x16x8xf32> to vector<16x16x8xbf16>
    %cst_5 = arith.constant dense<0.000000e+00> : vector<16x16x16xf32>
    %23 = tpu.matmul %18, %20, %cst_5 {dimension_numbers = #tpu.dot_dimension_numbers<[2], [2], [1], [1], [0, 0, 0, 1, 1, 1], [0], [0]>} : vector<16x16x8xbf16>, vector<16x16x8xbf16>, vector<16x16x16xf32> -> vector<16x16x16xf32>
    %24 = vector.shape_cast %23 : vector<16x16x16xf32> to vector<4x4x16x16xf32>
    %c0_6 = arith.constant 0 : index
    %c0_7 = arith.constant 0 : index
    %c0_8 = arith.constant 0 : index
    %25 = vector.load %arg4[%c0_6, %c0_7, %c0_8] : memref<4x16x16xf32, #tpu.memory_space<vmem>>, vector<4x16x16xf32>
    %26 = vector.shape_cast %25 : vector<4x16x16xf32> to vector<1x4x16x16xf32>
    %27 = vector.broadcast %26 : vector<1x4x16x16xf32> to vector<4x4x16x16xf32>
    %28 = arith.addf %24, %27 : vector<4x4x16x16xf32>
    %cst_9 = arith.constant dense<0xFF800000> : vector<4x4x16xf32>
    %29 = vector.multi_reduction <maximumf>, %28, %cst_9 [3] : vector<4x4x16x16xf32> to vector<4x4x16xf32>
    %30 = vector.shape_cast %29 : vector<4x4x16xf32> to vector<4x4x16x1xf32>
    %31 = vector.broadcast %30 : vector<4x4x16x1xf32> to vector<4x4x16x16xf32>
    %32 = arith.subf %28, %31 : vector<4x4x16x16xf32>
    %33 = math.exp %32 : vector<4x4x16x16xf32>
    %cst_10 = arith.constant dense<0.000000e+00> : vector<4x4x16xf32>
    %34 = vector.multi_reduction <add>, %33, %cst_10 [3] : vector<4x4x16x16xf32> to vector<4x4x16xf32>
    %35 = vector.shape_cast %34 : vector<4x4x16xf32> to vector<4x4x16x1xf32>
    %36 = vector.shape_cast %33 : vector<4x4x16x16xf32> to vector<16x16x16xf32>
    %37 = arith.truncf %36 : vector<16x16x16xf32> to vector<16x16x16xbf16>
    %cst_11 = arith.constant dense<0.000000e+00> : vector<16x16x8xf32>
    %38 = tpu.matmul %37, %22, %cst_11 {dimension_numbers = #tpu.dot_dimension_numbers<[2], [1], [1], [2], [0, 0, 0, 1, 1, 2], [0], [0]>} : vector<16x16x16xbf16>, vector<16x16x8xbf16>, vector<16x16x8xf32> -> vector<16x16x8xf32>
    %39 = vector.shape_cast %38 : vector<16x16x8xf32> to vector<4x4x16x8xf32>
    %40 = tpu.reciprocal %35 : vector<4x4x16x1xf32> -> vector<4x4x16x1xf32>
    %41 = vector.broadcast %40 : vector<4x4x16x1xf32> to vector<4x4x16x8xf32>
    %42 = arith.mulf %39, %41 : vector<4x4x16x8xf32>
    %43 = tpu.transpose %42, [0, 2, 1, 3] : vector<4x4x16x8xf32> -> vector<4x16x4x8xf32>
    %44 = vector.shape_cast %43 : vector<4x16x4x8xf32> to vector<64x32xf32>
    %c0_12 = arith.constant 0 : index
    %c0_13 = arith.constant 0 : index
    %45 = vector.load %arg5[%c0_12, %c0_13] : memref<64x32xf32, #tpu.memory_space<vmem>>, vector<64x32xf32>
    tpu.vector_store %arg5[%c0_12, %c0_13], %44 {strides = array<i32>} : memref<64x32xf32, #tpu.memory_space<vmem>>, vector<64x32xf32>,
    return
  }
  func.func @transform_0(%arg0: i32) -> (i32, i32) {
    %c0_i32 = arith.constant 0 : i32
    %c0_i32_0 = arith.constant 0 : i32
    return %arg0, %c0_i32 : i32, i32
  }
  func.func @transform_1(%arg0: i32) -> (i32, i32) {
    %c0_i32 = arith.constant 0 : i32
    %c0_i32_0 = arith.constant 0 : i32
    %c0_i32_1 = arith.constant 0 : i32
    return %c0_i32, %c0_i32_0 : i32, i32
  }
  func.func @transform_2(%arg0: i32) -> (i32, i32) {
    %c0_i32 = arith.constant 0 : i32
    %c0_i32_0 = arith.constant 0 : i32
    %c0_i32_1 = arith.constant 0 : i32
    return %c0_i32, %c0_i32_0 : i32, i32
  }
  func.func @transform_3(%arg0: i32) -> (i32, i32, i32) {
    %c0_i32 = arith.constant 0 : i32
    %c0_i32_0 = arith.constant 0 : i32
    %c0_i32_1 = arith.constant 0 : i32
    %c0_i32_2 = arith.constant 0 : i32
    return %c0_i32, %c0_i32_0, %c0_i32_1 : i32, i32, i32
  }
  func.func @transform_4(%arg0: i32) -> (i32, i32) {
    %c0_i32 = arith.constant 0 : i32
    %c0_i32_0 = arith.constant 0 : i32
    return %arg0, %c0_i32 : i32, i32
  }
}

</mosaic_0001>

<bundles_post_ra>
// kernel: tpu_custom_call.1
= control target key start
LH: loop header
LB: loop body
LE: loop exit
PB: predicated region body
PF: predicated region fallthrough
CT: control target
= control target key end

     0   :  { %s5983_s15 = smov 0   ;;  %s9561_s0 = inlined_call_operand.vmem [shape: bf16[128,32], index: 0, kind: input, shape index: {}]   ;;  %s9562_s1 = inlined_call_operand.vmem [shape: bf16[32,64], index: 1, kind: input, shape index: {}]   ;;  %s9563_s2 = inlined_call_operand.vmem [shape: f32[1,64], index: 2, kind: input, shape index: {}]   ;;  %s9564_s3 = inlined_call_operand.vmem [shape: f32[4,16,16], index: 3, kind: input, shape index: {}]   ;;  %s9565_s4 = inlined_call_operand.vmem [shape: f32[128,32], index: 4, kind: output, shape index: {}]  }
   0x1 LB: > { %s5576_s16 = sadd.s32 4294967295, %s5946_s15   ;;  %p5580_p0 = scmp.ge.s32.totalorder %s5946_s15, 1  ;;  %s5946_s15 = sphi %s5983_s15, %s14_s15  }
   0x2   : > { %p163_p1 = scmp.lt.s32.totalorder %s5946_s15, 3 }
   0x4   : > { %p164_p2 = pnand %p5580_p0, %p163_p1 }
   0x6   : > { %167 = sbr.rel (%p164_p2) target bundleno = 1311 (0x51f), region = 36 }
   0xb   : > { %v5652_v0 = vld [vmem:[%s9562_s1 + $0x8] sm:$0xff]  ;;  %s5581_s19 = sshll.u32 %s5576_s16, 3  ;;  %v5651_v1 = vld [vmem:[%s9562_s1] sm:$0xff]  ;;  %vm250_vm0 = vcmask 261120   ;;  %s5948_s28 = smov 120   ;;  %vm373_vm1 = vcmask 1047556  }
   0xc   : > { %p190_p3 = scmp.lt.s32.totalorder %s5581_s19, 15  ;;  %269 = vmatpush.bf16.msra.mxu0 %v5652_v0  ;;  %v5811_v7 = vld [vmem:[%s9563_s2] ss:$0 sm:$0xff]  ;;  %s5949_s29 = smov 104   ;;  %v5953_v45 = vmov 1983009808  }
   0xd   : > { %s5950_s30 = smov 112   ;;  %s5951_s5 = smov 96   ;;  %v378_v46 = vunpack.c.l.s4 %v5953_v45  ;;  %vm2863_vm2 = vcmask 64512   ;;  %vm3310_vm3 = vcmask 130048  }
   0xe   : > { %s9802_s19 = smov (!%p190_p3, %s5581_s19), 15  ;;  %s5952_s6 = smov 80  }
   0xf   : > { %s5582_s22 = sshll.u32 %s9802_s19, 2  ;;  %v6074_v54 = vunpack.c.0.s8 %v378_v46  ;;  %s5956_s26 = smov 24  }
  0x10   : > { %270 = vmatpush.bf16.msra.mxu0 %v5651_v1  ;;  %s193_s25 = scalar_lea.vmem %s9561_s0, %s5582_s22  ;;  %s5957_s27 = smov 8  }
  0x11   : > { %v5647_v2 = vld [vmem:[%s193_s25] sm:$0xff]  ;;  %v5648_v3 = vld [vmem:[%s193_s25 + $0x8] sm:$0xff]  ;;  %v5649_v4 = vld [vmem:[%s193_s25 + $0x10] sm:$0xff] }
  0x12   : > { %v5650_v5 = vld [vmem:[%s193_s25 + $0x18] sm:$0xff]  ;;  %s5955_s25 = smov 16  }
  0x13   : > { %5609 = vmatmul.msk.bf16.vlgmr.msra.gmra.mxu0 %vm250_vm0, %v5647_v2 }
  0x23   : > { %5610 = vmatmul.msk.bf16.gmra.mxu0 %vm250_vm0, %v5648_v3 }
  0x33   : > { %5611 = vmatmul.msk.bf16.gmra.mxu0 %vm250_vm0, %v5649_v4 }
  0x43   : > { %5612 = vmatmul.msk.bf16.gmra.mxu0 %vm250_vm0, %v5650_v5 }
  0x90   : > { %v272_v6 = vpop.f32.mrf.mxu0 }
  0x91   : > { %v6010_v9 = vadd.f32 %v5811_v7, %v272_v6 }
  0x93   : > { %v375_v56 = vrot.slane %v6010_v9, 4 }
  0x98   : > { %v274_v8 = vpop.f32.mrf.mxu0 }
  0x99   : > { %v6012_v10 = vadd.f32 %v5811_v7, %v274_v8 }
  0x9b   : > { %v5671_v11 = vpack.i.bf16 %v6012_v10, %v6010_v9  ;;  %v431_v55 = vrot.slane %v6012_v10, 4 }
  0x9d   : > { %5672 = vrot.lane.b32.xlu0 %v5671_v11, %s5948_s28 }
  0xa0   : > { %v277_v12 = vpop.f32.mrf.mxu0 }
  0xa1   : > { %v6016_v13 = vadd.f32 %v5811_v7, %v277_v12 }
  0xa3   : > { %v487_v60 = vrot.slane %v6016_v13, 4 }
  0xa8   : > { %v279_v14 = vpop.f32.mrf.mxu0 }
  0xa9   : > { %v6018_v15 = vadd.f32 %v5811_v7, %v279_v14 }
  0xab   : > { %v5676_v16 = vpack.i.bf16 %v6018_v15, %v6016_v13  ;;  %v543_v62 = vrot.slane %v6018_v15, 4 }
  0xad   : > { %5677 = vrot.lane.b32.xlu0 %v5676_v16, %s5948_s28 }
  0xb0   : > { %v282_v17 = vpop.f32.mrf.mxu0 }
  0xb1   : > { %v6023_v18 = vadd.f32 %v5811_v7, %v282_v17 }
  0xb3   : > { %9610 = vst [vmem:[#allocation2_spill] sm:$0xff] %v6023_v18 }
  0xb5   : > { %5702 = vrot.lane.b32.xlu0 %v5671_v11, %s5949_s29 }
  0xb8   : > { %v284_v19 = vpop.f32.mrf.mxu0 }
  0xb9   : > { %v6025_v20 = vadd.f32 %v5811_v7, %v284_v19 }
  0xbb   : > { %v5681_v21 = vpack.i.bf16 %v6025_v20, %v6023_v18 }
  0xbd   : > { %5682 = vrot.lane.b32.xlu1 %v5681_v21, %s5948_s28  ;;  %5717 = vrot.lane.b32.xlu0 %v5676_v16, %s5950_s30 }
  0xc0   : > { %v287_v22 = vpop.f32.mrf.mxu0 }
  0xc1   : > { %v6031_v24 = vadd.f32 %v5811_v7, %v287_v22 }
  0xc3   : > { %v711_v8 = vrot.slane %v6031_v24, 4 }
  0xc5   : > { %5687 = vrot.lane.b32.xlu1 %v5671_v11, %s5951_s5  ;;  %5732 = vrot.lane.b32.xlu0 %v5681_v21, %s5951_s5 }
  0xc8   : > { %v289_v23 = vpop.f32.mrf.mxu0 }
  0xc9   : > { %v6035_v25 = vadd.f32 %v5811_v7, %v289_v23 }
  0xcb   : > { %v5721_v26 = vpack.i.bf16 %v6035_v25, %v6031_v24 }
  0xcd   : > { %5707 = vrot.lane.b32.xlu1 %v5676_v16, %s5951_s5  ;;  %5747 = vrot.lane.b32.xlu0 %v5681_v21, %s5949_s29 }
  0xd5   : > { %5722 = vrot.lane.b32.xlu1 %v5721_v26, %s5948_s28  ;;  %5762 = vrot.lane.b32.xlu0 %v5721_v26, %s5950_s30  ;;  %s5584_s28 = sshll.u32 %s9802_s19, 3 }
 0x10f   : > { %v5673_v27 = vpop.permute.xlu0 %5672 }
 0x110   : > { %v5675_v28 = vunpack.i.h.bf16 %v5673_v27  ;;  %v5674_v29 = vunpack.i.l.bf16 %v5673_v27  ;;  %5777 = vrot.lane.b32.xlu0 %v5673_v27, %s5952_s6  ;;  %5692 = vrot.lane.b32.xlu2 %v5673_v27, %s5951_s5 }
 0x112   : > { %v443_v49 = vrot.slane %v5675_v28, 4  ;;  %v387_v50 = vrot.slane %v5674_v29, 4 }
 0x118   : > { %5802 = vrot.lane.b32.xlu0 %v5721_v26, %s5952_s6  ;;  %5697 = vrot.lane.b32.xlu2 %v5671_v11, %s5950_s30 }
 0x11f   : > { %v6042_v30 = vpop.permute.xlu0 %5677 }
 0x120   : > { %v9567_v31 = vunpack.i.h.bf16 %v6042_v30  ;;  %v9566_v32 = vunpack.i.l.bf16 %v6042_v30  ;;  %5712 = vrot.lane.b32.xlu2 %v6042_v30, %s5951_s5 }
 0x122   : > { %v6109_v17 = vrot.slane %v9566_v32, 4 }
 0x127   : > { %v5703_v41 = vpop.permute.xlu0 %5702 }
 0x128   : > { %5727 = vrot.lane.b32.xlu2 %v5676_v16, %s5949_s29  ;;  %v5704_v43 = vunpack.i.l.bf16 %v5703_v41  ;;  %v5705_v44 = vunpack.i.h.bf16 %v5703_v41 }
 0x12a   : > { %v385_v47 = vrot.slane %v5704_v43, 4  ;;  %v441_v48 = vrot.slane %v5705_v44, 4  ;;  %v388_v58 = vsel %vm373_vm1, %v5704_v43, %v387_v50  ;;  %v444_v59 = vsel %vm373_vm1, %v5705_v44, %v443_v49 }
 0x12b   : > { %v6092_v6 = vperm.slane %v388_v58, %v6074_v54  ;;  %v6095_v7 = vperm.slane %v444_v59, %v6074_v54 }
 0x12c   : > { %v386_v57 = vsel %vm373_vm1, %v385_v47, %v5674_v29  ;;  %v442_v61 = vsel %vm373_vm1, %v441_v48, %v5675_v28 }
 0x12d   : > { %v6089_v5 = vperm.slane %v386_v57, %v6074_v54  ;;  %v6103_v12 = vperm.slane %v442_v61, %v6074_v54 }
 0x12f   : > { %v6049_v33 = vpop.permute.xlu1 %5682  ;;  %v5718_v42 = vpop.permute.xlu0 %5717 }
 0x130   : > { %v5685_v34 = vunpack.i.h.bf16 %v6049_v33  ;;  %v5684_v35 = vunpack.i.l.bf16 %v6049_v33  ;;  %5742 = vrot.lane.b32.xlu2 %v5681_v21, %s5950_s30  ;;  %5737 = vrot.lane.b32.xlu1 %v6049_v33, %s5951_s5  ;;  %v5720_v51 = vunpack.i.h.bf16 %v5718_v42  ;;  %v5719_v52 = vunpack.i.l.bf16 %v5718_v42  ;;  %s9466_s30 = scalar_lea.vmem %s9565_s4, %s5584_s28 }
 0x132   : > { %v541_v1 = vrot.slane %v5720_v51, 4  ;;  %v485_v2 = vrot.slane %v5719_v52, 4  ;;  %v544_v14 = vsel %vm373_vm1, %v5720_v51, %v543_v62  ;;  %v488_v19 = vsel %vm373_vm1, %v5719_v52, %v487_v60 }
 0x133   : > { %v6120_v42 = vperm.slane %v544_v14, %v6074_v54  ;;  %v667_v44 = vrot.slane %v5685_v34, 4 }
 0x134   : > { %v542_v23 = vsel %vm373_vm1, %v541_v1, %v6018_v15  ;;  %v611_v15 = vrot.slane %v5684_v35, 4 }
 0x135   : > { %v6131_v46 = vperm.slane %v542_v23, %v6074_v54 }
 0x137   : > { %v6055_v36 = vpop.permute.xlu1 %5687  ;;  %v5733_v53 = vpop.permute.xlu0 %5732 }
 0x138   : > { %5752 = vrot.lane.b32.xlu1 %v5721_v26, %s5951_s5  ;;  %v5690_v3 = vunpack.i.h.bf16 %v6055_v36  ;;  %v5689_v4 = vunpack.i.l.bf16 %v6055_v36  ;;  %v5734_v22 = vunpack.i.l.bf16 %v5733_v53 }
 0x13a   : > { %v1353_v27 = vrot.slane %v5690_v3, 4  ;;  %v1301_v28 = vrot.slane %v5689_v4, 4  ;;  %v1509_v49 = vrot.slane %v5734_v22, 4  ;;  %v6142_v58 = vperm.slane %v5690_v3, %v6074_v54 }
 0x13b   : > { %v6145_v59 = vperm.slane %v5689_v4, %v6074_v54 }
 0x13c   : > { %v1354_v50 = vsel %vm373_vm1, 0.0, %v1353_v27  ;;  %v1302_v51 = vsel %vm373_vm1, 0.0, %v1301_v28 }
 0x13d   : > { %v6157_v14 = vperm.slane %v1354_v50, %v6074_v54  ;;  %v6160_v3 = vperm.slane %v1302_v51, %v6074_v54  ;;  %v1323_v28 = vrot.slane %v6145_v59, 4 }
 0x13f   : > { %v6058_v37 = vpop.permute.xlu1 %5707  ;;  %v5748_v45 = vpop.permute.xlu0 %5747  ;;  %v1387_v63 = vrot.slane %v6157_v14, 4 }
 0x140   : > { %5767 = vrot.lane.b32.xlu1 %v5721_v26, %s5949_s29  ;;  %v486_v26 = vsel %vm373_vm1, %v485_v2, %v6016_v13  ;;  %v6128_v13 = vperm.slane %v488_v19, %v6074_v54  ;;  %v5710_v52 = vunpack.i.h.bf16 %v6058_v37  ;;  %v5750_v60 = vunpack.i.h.bf16 %v5748_v45 }
 0x141   : > { %v6134_v47 = vperm.slane %v486_v26, %v6074_v54  ;;  %v6154_v2 = vperm.slane %v5734_v22, %v6074_v54  ;;  %v1510_v19 = vsel %vm373_vm1, 0.0, %v1509_v49  ;;  %v1375_v22 = vrot.slane %v6142_v58, 4 }
 0x142   : > { %v6172_v51 = vperm.slane %v1510_v19, %v6074_v54  ;;  %v668_v29 = vsel %vm373_vm1, %v5750_v60, %v667_v44 }
 0x143   : > { %9613 = vst [vmem:[#allocation5_spill] sm:$0xff] %v6154_v2 }
 0x144   : > { %9615 = vst [vmem:[#allocation7_spill] sm:$0xff] %v6172_v51 }
 0x147   : > { %v6061_v38 = vpop.permute.xlu1 %5722 }
 0x148   : > { %9611 = vst [vmem:[#allocation3_spill] sm:$0xff] %v6061_v38  ;;  %v9568_v39 = vunpack.i.h.bf16 %v6061_v38  ;;  %v9569_v40 = vunpack.i.l.bf16 %v6061_v38  ;;  %5757 = vrot.lane.b32.xlu2 %v6061_v38, %s5951_s5  ;;  %5782 = vrot.lane.b32.xlu1 %v5676_v16, %s5952_s6  ;;  %v767_v16 = vrot.slane %v6035_v25, 4 }
 0x150   : > { %5772 = vrot.lane.b32.xlu2 %v5671_v11, %s5952_s6  ;;  %5787 = vrot.lane.b32.xlu1 %v6042_v30, %s5952_s6  ;;  %v6100_v11 = vrot.slane %v9567_v31, 4  ;;  %v6183_v31 = vperm.slane %v5710_v52, %v6074_v54 }
 0x158   : > { %5797 = vrot.lane.b32.xlu2 %v6049_v33, %s5952_s6  ;;  %5792 = vrot.lane.b32.xlu1 %v5681_v21, %s5952_s6  ;;  %v5735_v21 = vunpack.i.h.bf16 %v5733_v53  ;;  %v5709_v53 = vunpack.i.l.bf16 %v6058_v37  ;;  %v5749_v37 = vunpack.i.l.bf16 %v5748_v45  ;;  %v665_v45 = vrot.slane %v5750_v60, 4 }
 0x159   : > { %v6209_v33 = vperm.slane %v668_v29, %v6074_v54 }
 0x15a   : > { %v1561_v48 = vrot.slane %v5735_v21, 4  ;;  %v6151_v1 = vperm.slane %v5735_v21, %v6074_v54  ;;  %v1457_v21 = vrot.slane %v5710_v52, 4  ;;  %v1405_v27 = vrot.slane %v5709_v53, 4 }
 0x15b   : > { %v666_v36 = vsel %vm373_vm1, %v665_v45, %v5685_v34  ;;  %v612_v62 = vsel %vm373_vm1, %v5749_v37, %v611_v15  ;;  %v6200_v34 = vperm.slane %v5709_v53, %v6074_v54 }
 0x15c   : > { %9612 = vst [vmem:[#allocation4_spill] sm:$0xff] %v6151_v1  ;;  %v1562_v4 = vsel %vm373_vm1, 0.0, %v1561_v48  ;;  %v609_v48 = vrot.slane %v5749_v37, 4  ;;  %v1458_v32 = vsel %vm373_vm1, 0.0, %v1457_v21  ;;  %v1406_v57 = vsel %vm373_vm1, 0.0, %v1405_v27 }
 0x15d   : > { %v6169_v50 = vperm.slane %v1562_v4, %v6074_v54  ;;  %v5954_v4 = vmov 1934713408   ;;  %v6203_v44 = vperm.slane %v1406_v57, %v6074_v54  ;;  %v6206_v37 = vperm.slane %v666_v36, %v6074_v54 }
 0x15e   : > { %v402_v23 = vunpack.c.l.s4 %v5954_v4  ;;  %v610_v27 = vsel %vm373_vm1, %v609_v48, %v5684_v35  ;;  %v6197_v4 = vperm.slane %v1458_v32, %v6074_v54  ;;  %v6212_v35 = vperm.slane %v612_v62, %v6074_v54 }
 0x15f   : > { %9614 = vst [vmem:[#allocation6_spill] sm:$0xff] %v6169_v50  ;;  %v6216_v53 = vperm.slane %v610_v27, %v6074_v54 }
 0x160   : > { %9616 = vst [vmem:[#allocation8_spill] sm:$0xff] %v6206_v37  ;;  %v6218_v57 = vunpack.c.0.s8 %v402_v23  ;;  %v9639_v37 = vrot.slane %v6120_v42, 4 }
 0x161   : > { %9617 = vst [vmem:[#allocation9_spill] sm:$0xff] %v6212_v35 }
 0x162   : > { %9618 = vst [vmem:[#allocation10_spill] sm:$0xff] %v6216_v53  ;;  %v9638_v53 = vrot.slane %v6131_v46, 4 }
 0x16a   : > { %v6147_v61 = vpop.permute.xlu2 %5692 }
 0x16b   : > { %v5695_v49 = vunpack.i.h.bf16 %v6147_v61  ;;  %v5694_v19 = vunpack.i.l.bf16 %v6147_v61  ;;  %v5763_v61 = vpop.permute.xlu0 %5762 }
 0x16c   : > { %v5765_v48 = vunpack.i.h.bf16 %v5763_v61 }
 0x16d   : > { %v1368_v52 = vperm.slane %v5695_v49, %v6074_v54  ;;  %v1363_v15 = vrot.slane %v5695_v49, 4  ;;  %v1311_v45 = vrot.slane %v5694_v19, 4  ;;  %v5764_v49 = vunpack.i.l.bf16 %v5763_v61 }
 0x16e   : > { %v1316_v0 = vperm.slane %v5694_v19, %v6074_v54 }
 0x16f   : > { %v1373_v26 = vrot.slane %v1368_v52, 4  ;;  %v1376_v36 = vsel %vm373_vm1, %v1368_v52, %v1375_v22  ;;  %v1364_v41 = vsel %vm373_vm1, 0.0, %v1363_v15  ;;  %v1312_v61 = vsel %vm373_vm1, 0.0, %v1311_v45 }
 0x170   : > { %v765_v22 = vrot.slane %v5765_v48, 4  ;;  %v768_v52 = vsel %vm373_vm1, %v5765_v48, %v767_v16  ;;  %v1384_v43 = vperm.slane %v1376_v36, %v6218_v57  ;;  %v709_v62 = vrot.slane %v5764_v49, 4 }
 0x171   : > { %v1372_v15 = vperm.slane %v1364_v41, %v6074_v54  ;;  %v1374_v32 = vsel %vm373_vm1, %v1373_v26, %v6142_v58  ;;  %v712_v45 = vsel %vm373_vm1, %v5764_v49, %v711_v8  ;;  %v1320_v16 = vperm.slane %v1312_v61, %v6074_v54 }
 0x172   : > { %v5698_v60 = vpop.permute.xlu2 %5697  ;;  %v6247_v36 = vrot.slane %v9568_v39, 4  ;;  %v6251_v41 = vrot.slane %v9569_v40, 4  ;;  %v6254_v58 = vperm.slane %v768_v52, %v6074_v54  ;;  %v766_v8 = vsel %vm373_vm1, %v765_v22, %v6035_v25 }
 0x173   : > { %v5700_v21 = vunpack.i.h.bf16 %v5698_v60  ;;  %v5699_v48 = vunpack.i.l.bf16 %v5698_v60  ;;  %v1380_v26 = vperm.slane %v1374_v32, %v6218_v57  ;;  %v1399_v19 = vrot.slane %v1384_v43, 4 }
 0x174   : > { %9619 = vst [vmem:[#allocation11_spill] sm:$0xff] %v6247_v36  ;;  %v710_v49 = vsel %vm373_vm1, %v709_v62, %v6031_v24  ;;  %v6263_v61 = vperm.slane %v712_v45, %v6074_v54  ;;  %v1385_v39 = vrot.slane %v1372_v15, 4  ;;  %v1388_v52 = vsel %vm373_vm1, %v1372_v15, %v1387_v63 }
 0x175   : > { %v432_v23 = vsel %vm373_vm1, %v5700_v21, %v431_v55  ;;  %9620 = vst [vmem:[#allocation12_spill] sm:$0xff] %v6251_v41  ;;  %v429_v55 = vrot.slane %v5700_v21, 4  ;;  %v1321_v21 = vrot.slane %v1316_v0, 4  ;;  %v1324_v25 = vsel %vm373_vm1, %v1316_v0, %v1323_v28 }
 0x176   : > { %9621 = vst [vmem:[#allocation13_spill] sm:$0xff] %v6254_v58  ;;  %v440_v60 = vperm.slane %v432_v23, %v6074_v54  ;;  %v1333_v32 = vrot.slane %v1320_v16, 4  ;;  %v376_v43 = vsel %vm373_vm1, %v5699_v48, %v375_v56  ;;  %v6275_v24 = vperm.slane %v766_v8, %v6074_v54 }
 0x177   : > { %9622 = vst [vmem:[#allocation14_spill] sm:$0xff] %v6263_v61  ;;  %v430_v23 = vsel %vm373_vm1, %v429_v55, %v6012_v10  ;;  %v372_v22 = vrot.slane %v5699_v48, 4  ;;  %v1396_v63 = vperm.slane %v1388_v52, %v6218_v57  ;;  %v1397_v15 = vrot.slane %v1380_v26, 4 }
 0x178   : > { %9623 = vst [vmem:[#allocation15_spill] sm:$0xff] %v6275_v24  ;;  %v1400_v45 = vsel %vm373_vm1, 0.0, %v1399_v19  ;;  %v467_v0 = vrot.slane %v440_v60, 4  ;;  %v6283_v28 = vperm.slane %v710_v49, %v6074_v54  ;;  %v1386_v56 = vsel %vm373_vm1, %v1385_v39, %v6157_v14 }
 0x179   : > { %v1332_v8 = vperm.slane %v1324_v25, %v6218_v57  ;;  %v384_v62 = vperm.slane %v376_v43, %v6074_v54  ;;  %v1322_v10 = vsel %vm373_vm1, %v1321_v21, %v6145_v59  ;;  %v1334_v48 = vsel %vm373_vm1, %v1333_v32, %v6160_v3 }
 0x17a   : > { %9624 = vst [vmem:[#allocation16_spill] sm:$0xff] %v6283_v28  ;;  %v436_v55 = vperm.slane %v430_v23, %v6074_v54  ;;  %v6296_v49 = vsel %vm373_vm1, %v1399_v19, %v1380_v26  ;;  %v1760_v52 = vrot.slane %v1400_v45, 4  ;;  %v9625_v39 = vrot.slane %v6160_v3, 4  ;;  %v6311_v26 = vpop.permute.xlu2 %5712 }
 0x17b   : > { %v374_v25 = vsel %vm373_vm1, %v372_v22, %v6010_v9  ;;  %v6304_v43 = vperm.slane %v1386_v56, %v6218_v57  ;;  %v1398_v59 = vsel %vm373_vm1, 0.0, %v1397_v15  ;;  %v6307_v21 = vrot.slane %v1396_v63, 4 }
 0x17c   : > { %v1336_v14 = vsel %vm373_vm1, %v1320_v16, %v9625_v39  ;;  %v468_v32 = vsel %vm373_vm1, %v6095_v7, %v467_v0  ;;  %v1328_v19 = vperm.slane %v1322_v10, %v6218_v57  ;;  %v6315_v3 = vperm.slane %v1334_v48, %v6218_v57 }
 0x17d   : > { %v1347_v16 = vrot.slane %v1332_v8, 4  ;;  %v411_v23 = vrot.slane %v384_v62, 4  ;;  %v1344_v22 = vperm.slane %v1336_v14, %v6218_v57  ;;  %v455_v45 = vrot.slane %v436_v55, 4 }
 0x17e   : > { %v380_v63 = vperm.slane %v374_v25, %v6074_v54  ;;  %v6322_v0 = vsel %vm373_vm1, %v1760_v52, %v1398_v59  ;;  %v476_v56 = vperm.slane %v468_v32, %v6218_v57  ;;  %v5715_v10 = vunpack.i.h.bf16 %v6311_v26 }
 0x17f   : > { %v1401_v48 = vrot.slane %v6304_v43, 4  ;;  %v6329_v8 = vsel %vm373_vm1, 0.0, %v6307_v21  ;;  %v9626_v14 = vrot.slane %v6095_v7, 4  ;;  %v1345_v9 = vrot.slane %v1328_v19, 4 }
 0x180   : > { %v1348_v52 = vsel %vm373_vm1, 0.0, %v1347_v16  ;;  %v1349_v59 = vrot.slane %v6315_v3, 4  ;;  %v412_v32 = vsel %vm373_vm1, %v6092_v6, %v411_v23  ;;  %v6342_v15 = vrot.slane %v1344_v22, 4 }
 0x181   : > { %v466_v25 = vsel %vm373_vm1, %v9626_v14, %v440_v60  ;;  %v456_v27 = vsel %vm373_vm1, %v6103_v12, %v455_v45  ;;  %v399_v39 = vrot.slane %v380_v63, 4  ;;  %v9627_v7 = vrot.slane %v6103_v12, 4 }
 0x182   : > { %v472_v14 = vperm.slane %v466_v25, %v6218_v57  ;;  %v483_v29 = vrot.slane %v476_v56, 4  ;;  %v1467_v58 = vrot.slane %v5715_v10, 4  ;;  %v6351_v24 = vsel %vm373_vm1, 0.0, %v1401_v48 }
 0x183   : > { %v454_v60 = vsel %vm373_vm1, %v9627_v7, %v436_v55  ;;  %v1722_v40 = vrot.slane %v1348_v52, 4  ;;  %v420_v22 = vperm.slane %v412_v32, %v6218_v57  ;;  %v1346_v36 = vsel %vm373_vm1, 0.0, %v1345_v9 }
 0x184   : > { %v6357_v45 = vsel %vm373_vm1, 0.0, %v1349_v59  ;;  %v6360_v12 = vsel %vm373_vm1, %v1347_v16, %v1328_v19  ;;  %v464_v55 = vperm.slane %v456_v27, %v6218_v57  ;;  %v6365_v56 = vsel %vm373_vm1, 0.0, %v6342_v15 }
 0x185   : > { %v6368_v48 = vperm.slane %v454_v60, %v6218_v57  ;;  %v9628_v25 = vrot.slane %v6089_v5, 4  ;;  %v400_v9 = vsel %vm373_vm1, %v6089_v5, %v399_v39  ;;  %v481_v59 = vrot.slane %v472_v14, 4 }
 0x186   : > { %v484_v19 = vsel %vm373_vm1, 0.0, %v483_v29  ;;  %v9629_v16 = vrot.slane %v6092_v6, 4  ;;  %v1468_v32 = vsel %vm373_vm1, 0.0, %v1467_v58  ;;  %v6381_v7 = vsel %vm373_vm1, %v1722_v40, %v1346_v36 }
 0x187   : > { %v398_v52 = vsel %vm373_vm1, %v9628_v25, %v380_v63  ;;  %v427_v60 = vrot.slane %v420_v22, 4  ;;  %v1472_v23 = vperm.slane %v5715_v10, %v6074_v54  ;;  %v5714_v63 = vunpack.i.l.bf16 %v6311_v26 }
 0x188   : > { %v410_v27 = vsel %vm373_vm1, %v9629_v16, %v384_v62  ;;  %v6387_v39 = vrot.slane %v464_v55, 4  ;;  %v6390_v25 = vperm.slane %v398_v52, %v6218_v57  ;;  %v408_v6 = vperm.slane %v400_v9, %v6218_v57  ;;  %v6393_v62 = vpop.permute.xlu2 %5727 }
 0x189   : > { %v891_v36 = vrot.slane %v484_v19, 4  ;;  %v416_v58 = vperm.slane %v410_v27, %v6218_v57  ;;  %v1476_v10 = vperm.slane %v1468_v32, %v6074_v54  ;;  %v477_v22 = vrot.slane %v6368_v48, 4 }
 0x18a   : > { %v482_v55 = vsel %vm373_vm1, 0.0, %v481_v59  ;;  %v886_v52 = vsel %vm373_vm1, %v483_v29, %v472_v14  ;;  %v428_v9 = vsel %vm373_vm1, 0.0, %v427_v60  ;;  %v1477_v16 = vrot.slane %v1472_v23, 4 }
 0x18b   : > { %v1415_v5 = vrot.slane %v5714_v63, 4  ;;  %v5730_v40 = vunpack.i.h.bf16 %v6393_v62  ;;  %v6407_v19 = vsel %vm373_vm1, 0.0, %v6387_v39  ;;  %v421_v27 = vrot.slane %v6390_v25, 4 }
 0x18c   : > { %v6410_v32 = vrot.slane %v408_v6, 4  ;;  %v9630_v26 = vrot.slane %v6183_v31, 4  ;;  %v892_v29 = vsel %vm373_vm1, %v891_v36, %v482_v55  ;;  %v425_v14 = vrot.slane %v416_v58, 4 }
 0x18d   : > { %v1489_v61 = vrot.slane %v1476_v10, 4  ;;  %v1420_v28 = vperm.slane %v5714_v63, %v6074_v54  ;;  %v6418_v41 = vsel %vm373_vm1, 0.0, %v477_v22  ;;  %v6421_v38 = vperm.slane %v886_v52, %v6074_v54 }
 0x18e   : > { %v1480_v59 = vsel %vm373_vm1, %v1472_v23, %v9630_v26  ;;  %v837_v50 = vrot.slane %v428_v9, 4  ;;  %v9631_v6 = vrot.slane %v6197_v4, 4  ;;  %v1478_v23 = vsel %vm373_vm1, %v1477_v16, %v6183_v31 }
 0x18f   : > { %v1488_v36 = vperm.slane %v1480_v59, %v6218_v57  ;;  %v1416_v26 = vsel %vm373_vm1, 0.0, %v1415_v5  ;;  %v553_v55 = vrot.slane %v5730_v40, 4  ;;  %v6432_v22 = vperm.slane %v892_v29, %v6074_v54  ;;  %v6445_v59 = vpop.permute.xlu0 %5777 }
 0x190   : > { %v1492_v1 = vsel %vm373_vm1, %v1476_v10, %v9631_v6  ;;  %v6435_v52 = vsel %vm373_vm1, 0.0, %v421_v27  ;;  %v6439_v9 = vsel %vm373_vm1, 0.0, %v6410_v32  ;;  %v426_v10 = vsel %vm373_vm1, 0.0, %v425_v14 }
 0x191   : > { %v1490_v31 = vsel %vm373_vm1, %v1489_v61, %v6197_v4  ;;  %v1500_v5 = vperm.slane %v1492_v1, %v6218_v57  ;;  %v1425_v16 = vrot.slane %v1420_v28, 4  ;;  %v832_v29 = vsel %vm373_vm1, %v427_v60, %v416_v58 }
 0x192   : > { %v1484_v6 = vperm.slane %v1478_v23, %v6218_v57  ;;  %v1424_v27 = vperm.slane %v1416_v26, %v6074_v54  ;;  %v9632_v63 = vrot.slane %v6200_v34, 4  ;;  %v838_v14 = vsel %vm373_vm1, %v837_v50, %v426_v10 }
 0x193   : > { %v1503_v2 = vrot.slane %v1488_v36, 4  ;;  %v9633_v4 = vunpack.i.h.bf16 %v6042_v30  ;;  %v5729_v61 = vunpack.i.l.bf16 %v6393_v62  ;;  %v6460_v60 = vperm.slane %v1490_v31, %v6218_v57 }
 0x194   : > { %v1428_v51 = vsel %vm373_vm1, %v1420_v28, %v9632_v63  ;;  %v5780_v58 = vunpack.i.h.bf16 %v6445_v59  ;;  %v556_v23 = vsel %vm373_vm1, %v5730_v40, %v6100_v11  ;;  %v6466_v28 = vperm.slane %v832_v29, %v6074_v54 }
 0x195   : > { %v554_v1 = vsel %vm373_vm1, %v553_v55, %v9633_v4  ;;  %9634 = vst [vmem:[#allocation17_spill] sm:$0xff] %v6460_v60  ;;  %v6468_v50 = vrot.slane %v1500_v5, 4  ;;  %v1426_v36 = vsel %vm373_vm1, %v1425_v16, %v6200_v34  ;;  %v1436_v62 = vperm.slane %v1428_v51, %v6218_v57 }
 0x196   : > { %v6474_v26 = vperm.slane %v838_v14, %v6074_v54  ;;  %v1501_v55 = vrot.slane %v1484_v6, 4  ;;  %v9636_v63 = vrot.slane %v6203_v44, 4  ;;  %v560_v11 = vperm.slane %v554_v1, %v6074_v54 }
 0x197   : > { %9635 = vst [vmem:[#allocation18_spill] sm:$0xff] %v6468_v50  ;;  %v1504_v40 = vsel %vm373_vm1, 0.0, %v1503_v2  ;;  %v6482_v31 = vsel %vm373_vm1, %v1503_v2, %v1484_v6  ;;  %v564_v5 = vperm.slane %v556_v23, %v6074_v54  ;;  %v497_v34 = vrot.slane %v5729_v61, 4 }
 0x198   : > { %v1440_v10 = vsel %vm373_vm1, %v1424_v27, %v9636_v63  ;;  %9637 = vst [vmem:[#allocation19_spill] sm:$0xff] %v6482_v31  ;;  %v1505_v51 = vrot.slane %v6460_v60, 4  ;;  %v1432_v16 = vperm.slane %v1426_v36, %v6218_v57  ;;  %v1437_v29 = vrot.slane %v1424_v27, 4 }
 0x199   : > { %v2131_v14 = vrot.slane %v5780_v58, 4  ;;  %v6489_v4 = vsel %vm373_vm1, 0.0, %v6468_v50  ;;  %v1448_v1 = vperm.slane %v1440_v10, %v6218_v57  ;;  %v1451_v63 = vrot.slane %v1436_v62, 4 }
 0x19a   : > { %v5779_v35 = vunpack.i.l.bf16 %v6445_v59  ;;  %v1502_v2 = vsel %vm373_vm1, 0.0, %v1501_v55  ;;  %v1836_v23 = vrot.slane %v1504_v40, 4  ;;  %v568_v27 = vsel %vm373_vm1, %v560_v11, %v9638_v53 }
 0x19b   : > { %v565_v36 = vrot.slane %v560_v11, 4  ;;  %v577_v18 = vrot.slane %v564_v5, 4  ;;  %v580_v50 = vsel %vm373_vm1, %v564_v5, %v9639_v37  ;;  %v9640_v62 = vunpack.i.l.bf16 %v6042_v30 }
 0x19c   : > { %v1438_v10 = vsel %vm373_vm1, %v1437_v29, %v6203_v44  ;;  %v1449_v40 = vrot.slane %v1432_v16, 4  ;;  %v2132_v6 = vsel %vm373_vm1, 0.0, %v2131_v14  ;;  %v1452_v53 = vsel %vm373_vm1, 0.0, %v1451_v63 }
 0x19d   : > { %v498_v59 = vsel %vm373_vm1, %v497_v34, %v9640_v62  ;;  %v6510_v11 = vrot.slane %v1448_v1, 4  ;;  %v2079_v31 = vrot.slane %v5779_v35, 4  ;;  %v576_v60 = vperm.slane %v568_v27, %v6218_v57 }
 0x19e   : > { %v6514_v37 = vsel %vm373_vm1, 0.0, %v1505_v51  ;;  %v6517_v30 = vsel %vm373_vm1, %v1836_v23, %v1502_v2  ;;  %v588_v5 = vperm.slane %v580_v50, %v6218_v57  ;;  %v504_v44 = vperm.slane %v498_v59, %v6074_v54 }
 0x19f   : > { %v6522_v34 = vperm.slane %v1438_v10, %v6218_v57  ;;  %v6525_v29 = vperm.slane %v5780_v58, %v6074_v54  ;;  %v566_v14 = vsel %vm373_vm1, %v565_v36, %v6131_v46  ;;  %v578_v51 = vsel %vm373_vm1, %v577_v18, %v6120_v42 }
 0x1a0   : > { %v6532_v1 = vsel %vm373_vm1, %v1451_v63, %v1432_v16  ;;  %v1798_v2 = vrot.slane %v1452_v53, 4  ;;  %v6535_v50 = vperm.slane %v2132_v6, %v6074_v54  ;;  %v500_v23 = vsel %vm373_vm1, %v5729_v61, %v6109_v17  ;;  %v6547_v6 = vpop.permute.xlu2 %5742 }
 0x1a1   : > { %9641 = vst [vmem:[#allocation20_spill] sm:$0xff] %v6525_v29  ;;  %v1450_v27 = vsel %vm373_vm1, 0.0, %v1449_v40  ;;  %v6542_v58 = vsel %vm373_vm1, 0.0, %v6510_v11  ;;  %v2080_v46 = vsel %vm373_vm1, 0.0, %v2079_v31  ;;  %v591_v36 = vrot.slane %v576_v60, 4 }
 0x1a2   : > { %9642 = vst [vmem:[#allocation21_spill] sm:$0xff] %v6532_v1  ;;  %v572_v18 = vperm.slane %v566_v14, %v6218_v57  ;;  %v584_v42 = vperm.slane %v578_v51, %v6218_v57  ;;  %v595_v16 = vrot.slane %v588_v5, 4  ;;  %v509_v63 = vrot.slane %v504_v44, 4 }
 0x1a3   : > { %9643 = vst [vmem:[#allocation22_spill] sm:$0xff] %v6535_v50  ;;  %v1453_v61 = vrot.slane %v6522_v34, 4  ;;  %v6553_v62 = vperm.slane %v5779_v35, %v6074_v54  ;;  %v508_v59 = vperm.slane %v500_v23, %v6074_v54  ;;  %v6559_v31 = vsel %vm373_vm1, %v1798_v2, %v1450_v27 }
 0x1a4   : > { %v6565_v5 = vperm.slane %v2080_v46, %v6074_v54  ;;  %v592_v35 = vsel %vm373_vm1, 0.0, %v591_v36  ;;  %v5745_v14 = vunpack.i.h.bf16 %v6547_v6  ;;  %v589_v51 = vrot.slane %v572_v18, 4 }
 0x1a5   : > { %v593_v23 = vrot.slane %v584_v42, 4  ;;  %v596_v60 = vsel %vm373_vm1, 0.0, %v595_v16  ;;  %v510_v2 = vsel %vm373_vm1, %v509_v63, %v6134_v47  ;;  %v6573_v27 = vsel %vm373_vm1, 0.0, %v1453_v61 }
 0x1a6   : > { %v521_v10 = vrot.slane %v508_v59, 4  ;;  %v983_v17 = vsel %vm373_vm1, %v591_v36, %v572_v18  ;;  %v988_v55 = vrot.slane %v592_v35, 4  ;;  %v994_v53 = vsel %vm373_vm1, %v595_v16, %v584_v42 }
 0x1a7   : > { %v9644_v50 = vrot.slane %v6365_v56, 4  ;;  %v999_v63 = vrot.slane %v596_v60, 4  ;;  %v9645_v61 = vrot.slane %v6134_v47, 4  ;;  %v6588_v40 = vperm.slane %v510_v2, %v6218_v57 }
 0x1a8   : > { %v9646_v46 = vperm.slane %v6381_v7, %v6074_v54  ;;  %v2101_v18 = vrot.slane %v6565_v5, 4  ;;  %v590_v42 = vsel %vm373_vm1, 0.0, %v589_v51  ;;  %v594_v56 = vsel %vm373_vm1, 0.0, %v593_v23 }
 0x1a9   : > { %v1734_v29 = vsel %vm373_vm1, %v9644_v50, %v6357_v45  ;;  %v512_v1 = vsel %vm373_vm1, %v504_v44, %v9645_v61  ;;  %v653_v16 = vrot.slane %v5745_v14, 4  ;;  %v522_v45 = vsel %vm373_vm1, %v521_v10, %v6128_v13 }
 0x1aa   : > { %v1739_v36 = vrot.slane %v9646_v46, 4  ;;  %v9647_v47 = vrot.slane %v6128_v13, 4  ;;  %v9648_v50 = vrot.slane %v6025_v20, 4  ;;  %v1738_v7 = vperm.slane %v1734_v29, %v6074_v54 }
 0x1ab   : > { %v6606_v35 = vperm.slane %v983_v17, %v6074_v54  ;;  %v6609_v51 = vperm.slane %v994_v53, %v6074_v54  ;;  %v520_v23 = vperm.slane %v512_v1, %v6218_v57  ;;  %v1728_v13 = vsel %vm373_vm1, %v6342_v15, %v6315_v3 }
 0x1ac   : > { %v524_v44 = vsel %vm373_vm1, %v508_v59, %v9647_v47  ;;  %v656_v60 = vsel %vm373_vm1, %v5745_v14, %v9648_v50  ;;  %v989_v59 = vsel %vm373_vm1, %v988_v55, %v590_v42  ;;  %v1000_v10 = vsel %vm373_vm1, %v999_v63, %v594_v56 }
 0x1ad   : > { %v533_v14 = vrot.slane %v6588_v40, 4  ;;  %v9649_v29 = vperm.slane %v6360_v12, %v6074_v54  ;;  %v6623_v53 = vperm.slane %v522_v45, %v6218_v57  ;;  %v532_v1 = vperm.slane %v524_v44, %v6218_v57 }
 0x1ae   : > { %v654_v2 = vsel %vm373_vm1, %v653_v16, %v6025_v20  ;;  %v6629_v3 = vperm.slane %v656_v60, %v6074_v54  ;;  %v5744_v15 = vunpack.i.l.bf16 %v6547_v6  ;;  %v1732_v55 = vperm.slane %v1728_v13, %v6074_v54 }
 0x1af   : > { %v1740_v17 = vsel %vm373_vm1, %v1739_v36, %v9649_v29  ;;  %v1745_v12 = vrot.slane %v1738_v7, 4  ;;  %v6635_v63 = vperm.slane %v989_v59, %v6074_v54  ;;  %v6638_v61 = vperm.slane %v1000_v10, %v6074_v54 }
 0x1b0   : > { %v1744_v46 = vperm.slane %v1740_v17, %v6218_v57  ;;  %v6641_v42 = vrot.slane %v520_v23, 4  ;;  %v6644_v20 = vsel %vm373_vm1, 0.0, %v533_v14  ;;  %v1766_v45 = vsel %vm373_vm1, %v6307_v21, %v6304_v43 }
 0x1b1   : > { %v1746_v56 = vsel %vm373_vm1, %v1745_v12, %v1732_v55  ;;  %v537_v47 = vrot.slane %v6623_v53, 4  ;;  %v6651_v44 = vrot.slane %v532_v1, 4  ;;  %v6654_v50 = vperm.slane %v654_v2, %v6074_v54 }
 0x1b2   : > { %v1753_v16 = vrot.slane %v1744_v46, 4  ;;  %v1750_v60 = vperm.slane %v1746_v56, %v6218_v57  ;;  %v691_v7 = vrot.slane %v6629_v3, 4  ;;  %v6660_v23 = vrot.slane %v5744_v15, 4 }
 0x1b3   : > { %v9650_v13 = vrot.slane %v6329_v8, 4  ;;  %v9651_v21 = vperm.slane %v6322_v0, %v6074_v54  ;;  %v1770_v14 = vperm.slane %v1766_v45, %v6074_v54  ;;  %v9652_v1 = vperm.slane %v6296_v49, %v6074_v54 }
 0x1b4   : > { %v1754_v10 = vsel %vm373_vm1, %v1750_v60, %v1753_v16  ;;  %v1751_v17 = vrot.slane %v1750_v60, 4  ;;  %v9653_v0 = vrot.slane %v6439_v9, 4  ;;  %v9654_v9 = vrot.slane %v6407_v19, 4 }
 0x1b5   : > { %v1772_v43 = vsel %vm373_vm1, %v9650_v13, %v6351_v24  ;;  %v1777_v59 = vrot.slane %v9651_v21, 4  ;;  %v2823_v55 = vpack.c.bf16 %v1754_v10, %v1754_v10  ;;  %v821_v24 = vsel %vm373_vm1, %v6410_v32, %v6390_v25 }
 0x1b6   : > { %v1776_v29 = vperm.slane %v1772_v43, %v6074_v54  ;;  %v827_v8 = vsel %vm373_vm1, %v9653_v0, %v6435_v52  ;;  %v1752_v16 = vsel %vm373_vm1, %v1751_v17, %v1744_v46  ;;  %v825_v45 = vperm.slane %v821_v24, %v6074_v54 }
 0x1b7   : > { %v1778_v2 = vsel %vm373_vm1, %v1777_v59, %v9652_v1  ;;  %v2891_v49 = vunpack.c.l.b16 %v2823_v55  ;;  %v2821_v60 = vpack.c.bf16 %v1752_v16, %v1752_v16  ;;  %v831_v13 = vperm.slane %v827_v8, %v6074_v54 }
 0x1b8   : > { %v1782_v12 = vperm.slane %v1778_v2, %v6218_v57  ;;  %v1783_v56 = vrot.slane %v1776_v29, 4  ;;  %v855_v43 = vrot.slane %v6474_v26, 4  ;;  %v875_v52 = vsel %vm373_vm1, %v6387_v39, %v6368_v48 }
 0x1b9   : > { %v881_v46 = vsel %vm373_vm1, %v9654_v9, %v6418_v41  ;;  %v2860_v59 = vunpack.c.l.b16 %v2821_v60  ;;  %v843_v10 = vrot.slane %v831_v13, 4  ;;  %v909_v48 = vrot.slane %v6432_v22, 4 }
 0x1ba   : > { %v1784_v25 = vsel %vm373_vm1, %v1783_v56, %v1770_v14  ;;  %v1791_v32 = vrot.slane %v1782_v12, 4  ;;  %v856_v29 = vsel %vm373_vm1, %v855_v43, %v6466_v28  ;;  %v879_v14 = vperm.slane %v875_v52, %v6074_v54 }
 0x1bb   : > { %v1788_v21 = vperm.slane %v1784_v25, %v6218_v57  ;;  %v862_v17 = vperm.slane %v856_v29, %v6218_v57  ;;  %v885_v1 = vperm.slane %v881_v46, %v6074_v54  ;;  %v844_v41 = vsel %vm373_vm1, %v843_v10, %v825_v45 }
 0x1bc   : > { %v845_v2 = vrot.slane %v825_v45, 4  ;;  %v850_v24 = vperm.slane %v844_v41, %v6218_v57  ;;  %v910_v16 = vsel %vm373_vm1, %v909_v48, %v6421_v38  ;;  %v857_v43 = vrot.slane %v6466_v28, 4 }
 0x1bd   : > { %v1792_v39 = vsel %vm373_vm1, %v1788_v21, %v1791_v32  ;;  %v1789_v19 = vrot.slane %v1788_v21, 4  ;;  %v867_v0 = vrot.slane %v862_v17, 4  ;;  %v897_v8 = vrot.slane %v885_v1, 4 }
 0x1be   : > { %v2824_v55 = vpack.c.bf16 %v1792_v39, %v1792_v39  ;;  %v846_v60 = vsel %vm373_vm1, %v831_v13, %v845_v2  ;;  %v916_v46 = vperm.slane %v910_v16, %v6218_v57  ;;  %v858_v29 = vsel %vm373_vm1, %v6474_v26, %v857_v43 }
 0x1bf   : > { %v1790_v56 = vsel %vm373_vm1, %v1789_v19, %v1782_v12  ;;  %v868_v52 = vsel %vm373_vm1, %v867_v0, %v850_v24  ;;  %v898_v45 = vsel %vm373_vm1, %v897_v8, %v879_v14  ;;  %v899_v13 = vrot.slane %v879_v14, 4 }
 0x1c0   : > { %v2892_v25 = vunpack.c.l.b16 %v2824_v55  ;;  %v2822_v32 = vpack.c.bf16 %v1790_v56, %v1790_v56  ;;  %v904_v9 = vperm.slane %v898_v45, %v6218_v57  ;;  %v2789_v21 = vpack.c.bf16 %v868_v52, %v868_v52 }
 0x1c1   : > { %v921_v48 = vrot.slane %v916_v46, 4  ;;  %v6718_v39 = vperm.slane %v846_v60, %v6218_v57  ;;  %v6721_v19 = vperm.slane %v858_v29, %v6218_v57  ;;  %v900_v55 = vsel %vm373_vm1, %v885_v1, %v899_v13 }
 0x1c2   : > { %v2893_v12 = vpack.c.b16 %v2892_v25, %v2891_v49  ;;  %v2861_v10 = vunpack.c.l.b16 %v2822_v32  ;;  %v2855_v28 = vunpack.c.l.b16 %v2789_v21  ;;  %v911_v49 = vrot.slane %v6421_v38, 4 }
 0x1c3   : > { %v922_v0 = vsel %vm373_vm1, %v921_v48, %v904_v9  ;;  %v871_v26 = vrot.slane %v6721_v19, 4  ;;  %v6729_v14 = vperm.slane %v900_v55, %v6218_v57  ;;  %v869_v8 = vrot.slane %v850_v24, 4 }
 0x1c4   : > { %v2898_v41 = vsel %vm2863_vm2, %v2893_v12, 0  ;;  %v2862_v2 = vpack.c.b16 %v2861_v10, %v2860_v59  ;;  %v2790_v16 = vpack.c.bf16 %v922_v0, %v922_v0  ;;  %v912_v60 = vsel %vm373_vm1, %v6432_v22, %v911_v49  ;;  %v9657_v49 = vld [vmem:[#allocation17_spill] sm:$0xff] }
 0x1c5   : > { %2907 = vmatpush.bf16.xpose.msra.mxu2 %v2898_v41  ;;  %v923_v59 = vrot.slane %v904_v9, 4  ;;  %v679_v1 = vrot.slane %v6654_v50, 4  ;;  %v872_v38 = vsel %vm373_vm1, %v871_v26, %v6718_v39  ;;  %v6738_v43 = vperm.slane %v912_v60, %v6218_v57 }
 0x1c6   : > { %v2868_v56 = vsel %vm2863_vm2, %v2862_v2, 0  ;;  %v870_v25 = vsel %vm373_vm1, %v862_v17, %v869_v8  ;;  %v2856_v24 = vunpack.c.l.b16 %v2790_v16  ;;  %v2793_v32 = vpack.c.bf16 %v872_v38, %v872_v38  ;;  %v9661_v16 = vld [vmem:[#allocation21_spill] sm:$0xff] }
 0x1c7   : > { %2877 = vmatpush.bf16.xpose.msra.mxu1 %v2868_v56  ;;  %2929 = vmatpush.bf16.xpose.msra.mxu3 %v2868_v56  ;;  %v924_v52 = vsel %vm373_vm1, %v916_v46, %v923_v59  ;;  %v2791_v45 = vpack.c.bf16 %v870_v25, %v870_v25  ;;  %v692_v22 = vsel %vm373_vm1, %v6209_v33, %v691_v7  ;;  %v925_v9 = vrot.slane %v6738_v43, 4  ;;  %v9663_v25 = vld [vmem:[#allocation19_spill] sm:$0xff] }
 0x1c8   : > { %v2792_v21 = vpack.c.bf16 %v924_v52, %v924_v52  ;;  %v9655_v12 = vrot.slane %v6542_v58, 4  ;;  %v2857_v17 = vpack.c.b16 %v2856_v24, %v2855_v28  ;;  %v2916_v29 = vunpack.c.l.b16 %v2793_v32  ;;  %v9665_v32 = vld [vmem:[#allocation8_spill] sm:$0xff] }
 0x1c9   : > { %v2886_v13 = vunpack.c.l.b16 %v2791_v45  ;;  %v1804_v46 = vsel %vm373_vm1, %v6510_v11, %v6522_v34  ;;  %v926_v48 = vsel %vm373_vm1, %v925_v9, %v6729_v14  ;;  %v9656_v2 = vperm.slane %v6559_v31, %v6074_v54 }
 0x1ca   : > { %v1810_v10 = vsel %vm373_vm1, %v9655_v12, %v6573_v27  ;;  %v2794_v58 = vpack.c.bf16 %v926_v48, %v926_v48  ;;  %v9658_v27 = vld [vmem:[#allocation18_spill] sm:$0xff]  ;;  %v9659_v0 = vrot.slane %v6489_v4, 4  ;;  %v9660_v34 = vperm.slane %v6517_v30, %v6074_v54 }
 0x1cb   : > { %v1814_v7 = vperm.slane %v1810_v10, %v6074_v54  ;;  %v1815_v55 = vrot.slane %v9656_v2, 4  ;;  %v1842_v28 = vsel %vm373_vm1, %v9658_v27, %v9657_v49  ;;  %v1808_v56 = vperm.slane %v1804_v46, %v6074_v54  ;;  %v9666_v48 = vld [vmem:[#allocation2_spill] sm:$0xff] }
 0x1cc   : > { %v1848_v11 = vsel %vm373_vm1, %v9659_v0, %v6514_v37  ;;  %v1853_v26 = vrot.slane %v9660_v34, 4  ;;  %v9662_v31 = vperm.slane %v9661_v16, %v6074_v54  ;;  %v2917_v38 = vunpack.c.l.b16 %v2794_v58 }
 0x1cd   : > { %v1821_v59 = vrot.slane %v1814_v7, 4  ;;  %v1852_v37 = vperm.slane %v1848_v11, %v6074_v54  ;;  %v9664_v30 = vperm.slane %v9663_v25, %v6074_v54  ;;  %v680_v52 = vsel %vm373_vm1, %v9665_v32, %v679_v1 }
 0x1ce   : > { %v1816_v60 = vsel %vm373_vm1, %v1815_v55, %v9662_v31  ;;  %5613 = vmatmul.msk.bf16.vlgmr.msra.gmra.mxu1 %vm2863_vm2, %v2857_v17  ;;  %v1846_v9 = vperm.slane %v1842_v28, %v6074_v54  ;;  %v2918_v12 = vpack.c.b16 %v2917_v38, %v2916_v29  ;;  %v536_v46 = vsel %vm373_vm1, 0.0, %v6641_v42 }
 0x1cf   : > { %2951 = vmatpush.bf16.xpose.msrb.mxu1 %v2898_v41  ;;  %v2887_v41 = vunpack.c.l.b16 %v2792_v21  ;;  %v1820_v4 = vperm.slane %v1816_v60, %v6218_v57  ;;  %v1854_v24 = vsel %vm373_vm1, %v1853_v26, %v9664_v30  ;;  %v1822_v45 = vsel %vm373_vm1, %v1821_v59, %v1808_v56 }
 0x1d0   : > { %v1858_v21 = vperm.slane %v1854_v24, %v6218_v57  ;;  %v1826_v10 = vperm.slane %v1822_v45, %v6218_v57  ;;  %v929_v1 = vsel %vm373_vm1, %v6641_v42, %v6588_v40  ;;  %v700_v2 = vperm.slane %v692_v22, %v6218_v57  ;;  %5615 = vmatmul.msk.bf16.vlgmr.msra.gmra.mxu3 %vm2863_vm2, %v2918_v12 }
 0x1d1   : > { %v2888_v8 = vpack.c.b16 %v2887_v41, %v2886_v13  ;;  %v1829_v17 = vrot.slane %v1820_v4, 4  ;;  %v1859_v13 = vrot.slane %v1852_v37, 4  ;;  %v598_v41 = vsel %vm373_vm1, %v6660_v23, %v9666_v48 }
 0x1d2   : > { %v1867_v7 = vrot.slane %v1858_v21, 4  ;;  %v1827_v58 = vrot.slane %v1826_v10, 4  ;;  %v538_v49 = vsel %vm373_vm1, 0.0, %v537_v47  ;;  %v688_v40 = vperm.slane %v680_v52, %v6218_v57 }
 0x1d3   : > { %5614 = vmatmul.msk.bf16.vlgmr.msra.gmra.mxu2 %vm2863_vm2, %v2888_v8  ;;  %v1830_v29 = vsel %vm373_vm1, %v1826_v10, %v1829_v17  ;;  %v1860_v55 = vsel %vm373_vm1, %v1859_v13, %v1846_v9  ;;  %v9667_v23 = vrot.slane %v9665_v32, 4  ;;  %v9668_v28 = vrot.slane %v6209_v33, 4 }
 0x1d4   : > { %v1864_v42 = vperm.slane %v1860_v55, %v6218_v57  ;;  %v2827_v27 = vpack.c.bf16 %v1830_v29, %v1830_v29  ;;  %v9669_v11 = vrot.slane %v9666_v48, 4  ;;  %v1828_v34 = vsel %vm373_vm1, %v1827_v58, %v1820_v4  ;;  %v9670_v48 = vld [vmem:[#allocation10_spill] sm:$0xff] }
 0x1d5   : > { %v678_v22 = vsel %vm373_vm1, %v9667_v23, %v6654_v50  ;;  %v690_v0 = vsel %vm373_vm1, %v9668_v28, %v6629_v3  ;;  %v604_v26 = vperm.slane %v598_v41, %v6074_v54  ;;  %v2825_v16 = vpack.c.bf16 %v1828_v34, %v1828_v34 }
 0x1d6   : > { %v600_v47 = vsel %vm373_vm1, %v5744_v15, %v9669_v11  ;;  %v1868_v8 = vsel %vm373_vm1, %v1864_v42, %v1867_v7  ;;  %v1865_v56 = vrot.slane %v1864_v42, 4  ;;  %v540_v50 = vsel %vm373_vm1, 0.0, %v6651_v44  ;;  %v9672_v7 = vld [vmem:[#allocation9_spill] sm:$0xff] }
 0x1d7   : > { %v707_v33 = vrot.slane %v700_v2, 4  ;;  %v2828_v31 = vpack.c.bf16 %v1868_v8, %v1868_v8  ;;  %v2995_v3 = vunpack.c.l.b16 %v2827_v27  ;;  %v684_v60 = vperm.slane %v678_v22, %v6218_v57 }
 0x1d8   : > { %v696_v6 = vperm.slane %v690_v0, %v6218_v57  ;;  %v703_v59 = vrot.slane %v688_v40, 4  ;;  %v1866_v15 = vsel %vm373_vm1, %v1865_v56, %v1858_v21  ;;  %v608_v38 = vperm.slane %v600_v47, %v6074_v54  ;;  %v6853_v0 = vpop.permute.xlu1 %5737 }
 0x1d9   : > { %v2996_v4 = vunpack.c.l.b16 %v2828_v31  ;;  %v2826_v37 = vpack.c.bf16 %v1866_v15, %v1866_v15  ;;  %v2965_v25 = vunpack.c.l.b16 %v2825_v16  ;;  %v6829_v30 = vperm.slane %v929_v1, %v6074_v54 }
 0x1da   : > { %v934_v24 = vrot.slane %v536_v46, 4  ;;  %v940_v32 = vsel %vm373_vm1, %v6651_v44, %v6623_v53  ;;  %v623_v52 = vrot.slane %v604_v26, 4  ;;  %v945_v45 = vrot.slane %v540_v50, 4 }
 0x1db   : > { %v708_v9 = vsel %vm373_vm1, 0.0, %v707_v33  ;;  %v2997_v12 = vpack.c.b16 %v2996_v4, %v2995_v3  ;;  %v2966_v10 = vunpack.c.l.b16 %v2826_v37  ;;  %v701_v21 = vrot.slane %v684_v60, 4 }
 0x1dc   : > { %v704_v17 = vsel %vm373_vm1, 0.0, %v703_v59  ;;  %v705_v13 = vrot.slane %v696_v6, 4  ;;  %v9671_v41 = vrot.slane %v9670_v48, 4  ;;  %v9673_v46 = vrot.slane %v9672_v7, 4 }
 0x1dd   : > { %v635_v29 = vrot.slane %v608_v38, 4  ;;  %v3002_v53 = vsel %vm2863_vm2, %v2997_v12, 0  ;;  %v2967_v44 = vpack.c.b16 %v2966_v10, %v2965_v25  ;;  %v935_v55 = vsel %vm373_vm1, %v934_v24, %v6644_v20 }
 0x1de   : > { %v622_v1 = vsel %vm373_vm1, %v9671_v41, %v604_v26  ;;  %v634_v2 = vsel %vm373_vm1, %v9673_v46, %v608_v38  ;;  %v6846_v58 = vperm.slane %v940_v32, %v6074_v54  ;;  %v1107_v40 = vrot.slane %v708_v9, 4  ;;  %3011 = vmatpush.bf16.xpose.msrb.mxu3 %v3002_v53 }
 0x1df   : > { %v624_v42 = vsel %vm373_vm1, %v9670_v48, %v623_v52  ;;  %v946_v27 = vsel %vm373_vm1, %v945_v45, %v538_v49  ;;  %v1096_v23 = vrot.slane %v704_v17, 4  ;;  %v628_v22 = vperm.slane %v622_v1, %v6218_v57 }
 0x1e0   : > { %v2972_v28 = vsel %vm2863_vm2, %v2967_v44, 0  ;;  %v1091_v20 = vsel %vm373_vm1, %v703_v59, %v684_v60  ;;  %v1102_v47 = vsel %vm373_vm1, %v707_v33, %v696_v6  ;;  %v6859_v34 = vperm.slane %v634_v2, %v6218_v57 }
 0x1e1   : > { %2981 = vmatpush.bf16.xpose.msrb.mxu2 %v2972_v28  ;;  %3033 = vmatpush.bf16.xpose.msra.mxu1 %v2972_v28  ;;  %v702_v49 = vsel %vm373_vm1, 0.0, %v701_v21  ;;  %v706_v26 = vsel %vm373_vm1, 0.0, %v705_v13  ;;  %v632_v8 = vperm.slane %v624_v42, %v6218_v57  ;;  %v636_v56 = vsel %vm373_vm1, %v9672_v7, %v635_v29 }
 0x1e2   : > { %v1108_v16 = vsel %vm373_vm1, %v1107_v40, %v706_v26  ;;  %v873_v50 = vrot.slane %v6718_v39, 4  ;;  %v927_v33 = vrot.slane %v6729_v14, 4  ;;  %v5739_v31 = vunpack.i.l.bf16 %v6853_v0 }
 0x1e3   : > { %v6871_v3 = vperm.slane %v1091_v20, %v6074_v54  ;;  %v1097_v60 = vsel %vm373_vm1, %v1096_v23, %v702_v49  ;;  %v6875_v6 = vperm.slane %v1102_v47, %v6074_v54  ;;  %v645_v59 = vrot.slane %v628_v22, 4 }
 0x1e4   : > { %v6878_v15 = vperm.slane %v935_v55, %v6074_v54  ;;  %v953_v38 = vrot.slane %v6829_v30, 4  ;;  %v644_v39 = vperm.slane %v636_v56, %v6218_v57  ;;  %v649_v14 = vrot.slane %v6859_v34, 4 }
 0x1e5   : > { %v6884_v4 = vperm.slane %v946_v27, %v6074_v54  ;;  %v965_v37 = vrot.slane %v6846_v58, 4  ;;  %v6888_v25 = vperm.slane %v1108_v16, %v6074_v54  ;;  %v647_v24 = vrot.slane %v632_v8, 4 }
 0x1e6   : > { %v6891_v32 = vperm.slane %v1097_v60, %v6074_v54  ;;  %v1519_v52 = vrot.slane %v5739_v31, 4  ;;  %v874_v45 = vsel %vm373_vm1, %v6721_v19, %v873_v50  ;;  %v928_v9 = vsel %vm373_vm1, %v6738_v43, %v927_v33 }
 0x1e7   : > { %v646_v21 = vsel %vm373_vm1, 0.0, %v645_v59  ;;  %v5740_v17 = vunpack.i.h.bf16 %v6853_v0  ;;  %v6902_v13 = vsel %vm373_vm1, 0.0, %v649_v14  ;;  %v651_v48 = vrot.slane %v644_v39, 4 }
 0x1e8   : > { %v2795_v41 = vpack.c.bf16 %v874_v45, %v874_v45  ;;  %v2796_v1 = vpack.c.bf16 %v928_v9, %v928_v9  ;;  %v648_v19 = vsel %vm373_vm1, 0.0, %v647_v24  ;;  %v1524_v43 = vperm.slane %v5739_v31, %v6074_v54 }
 0x1e9   : > { %3055 = vmatpush.bf16.xpose.msra.mxu2 %v3002_v53  ;;  %v951_v46 = vrot.slane %v6878_v15, 4  ;;  %v1037_v29 = vsel %vm373_vm1, %v647_v24, %v628_v22  ;;  %v1520_v53 = vsel %vm373_vm1, 0.0, %v1519_v52  ;;  %v1571_v55 = vrot.slane %v5740_v17, 4 }
 0x1ea   : > { %v2938_v44 = vunpack.c.l.b16 %v2795_v41  ;;  %v2939_v40 = vunpack.c.l.b16 %v2796_v1  ;;  %v963_v27 = vrot.slane %v6884_v4, 4  ;;  %v652_v23 = vsel %vm373_vm1, 0.0, %v651_v48 }
 0x1eb   : > { %v952_v42 = vsel %vm373_vm1, %v951_v46, %v6829_v30  ;;  %v1005_v0 = vrot.slane %v6635_v63, 4  ;;  %v1017_v20 = vrot.slane %v6638_v61, 4  ;;  %v1528_v22 = vperm.slane %v1520_v53, %v6074_v54  ;;  %v9674_v53 = vld [vmem:[#allocation5_spill] sm:$0xff] }
 0x1ec   : > { %v958_v28 = vperm.slane %v952_v42, %v6218_v57  ;;  %v1529_v47 = vrot.slane %v1524_v43, 4  ;;  %v2940_v49 = vpack.c.b16 %v2939_v40, %v2938_v44  ;;  %v964_v26 = vsel %vm373_vm1, %v963_v27, %v6846_v58 }
 0x1ed   : > { %v970_v8 = vperm.slane %v964_v26, %v6218_v57  ;;  %v1006_v16 = vsel %vm373_vm1, %v1005_v0, %v6606_v35  ;;  %v1018_v50 = vsel %vm373_vm1, %v1017_v20, %v6609_v51  ;;  %v6927_v33 = vperm.slane %v1037_v29, %v6074_v54  ;;  %v9676_v0 = vld [vmem:[#allocation7_spill] sm:$0xff] }
 0x1ee   : > { %v977_v56 = vrot.slane %v958_v28, 4  ;;  %v1572_v31 = vsel %vm373_vm1, 0.0, %v1571_v55  ;;  %5616 = vmatmul.msk.bf16.vlgmr.msrb.gmra.mxu1 %vm2863_vm2, %v2940_v49  ;;  %v1012_v60 = vperm.slane %v1006_v16, %v6218_v57  ;;  %v1024_v59 = vperm.slane %v1018_v50, %v6218_v57 }
 0x1ef   : > { %v1042_v39 = vrot.slane %v648_v19, 4  ;;  %v1053_v14 = vrot.slane %v652_v23, 4  ;;  %v975_v52 = vrot.slane %v970_v8, 4  ;;  %v1541_v45 = vrot.slane %v1528_v22, 4 }
 0x1f0   : > { %v978_v24 = vsel %vm373_vm1, %v970_v8, %v977_v56  ;;  %v1031_v9 = vrot.slane %v1012_v60, 4  ;;  %v1029_v1 = vrot.slane %v1024_v59, 4  ;;  %v1576_v46 = vperm.slane %v5740_v17, %v6074_v54  ;;  %v6952_v56 = vpop.permute.xlu2 %5757 }
 0x1f1   : > { %v2799_v41 = vpack.c.bf16 %v978_v24, %v978_v24  ;;  %v1580_v29 = vperm.slane %v1572_v31, %v6074_v54  ;;  %v1530_v44 = vsel %vm373_vm1, %v1529_v47, %v9674_v53  ;;  %v976_v55 = vsel %vm373_vm1, %v975_v52, %v958_v28 }
 0x1f2   : > { %v9675_v40 = vrot.slane %v9674_v53, 4  ;;  %v1032_v42 = vsel %vm373_vm1, %v1024_v59, %v1031_v9  ;;  %v1030_v27 = vsel %vm373_vm1, %v1029_v1, %v1012_v60  ;;  %v2797_v23 = vpack.c.bf16 %v976_v55, %v976_v55  ;;  %v9678_v55 = vld [vmem:[#allocation4_spill] sm:$0xff] }
 0x1f3   : > { %v9677_v20 = vrot.slane %v9676_v0, 4  ;;  %v2800_v49 = vpack.c.bf16 %v1032_v42, %v1032_v42  ;;  %v2990_v26 = vunpack.c.l.b16 %v2799_v41  ;;  %v2798_v8 = vpack.c.bf16 %v1030_v27, %v1030_v27 }
 0x1f4   : > { %v1532_v19 = vsel %vm373_vm1, %v1524_v43, %v9675_v40  ;;  %v1043_v47 = vsel %vm373_vm1, %v1042_v39, %v646_v21  ;;  %v1048_v28 = vsel %vm373_vm1, %v651_v48, %v6859_v34  ;;  %v1542_v43 = vsel %vm373_vm1, %v1541_v45, %v9676_v0  ;;  %v9680_v0 = vld [vmem:[#allocation6_spill] sm:$0xff] }
 0x1f5   : > { %v1544_v17 = vsel %vm373_vm1, %v1528_v22, %v9677_v20  ;;  %v2960_v16 = vunpack.c.l.b16 %v2797_v23  ;;  %v1581_v50 = vrot.slane %v1576_v46, 4  ;;  %v1536_v31 = vperm.slane %v1530_v44, %v6218_v57  ;;  %v5753_v22 = vpop.permute.xlu1 %5752 }
 0x1f6   : > { %v2991_v60 = vunpack.c.l.b16 %v2800_v49  ;;  %v2961_v59 = vunpack.c.l.b16 %v2798_v8  ;;  %v1054_v24 = vsel %vm373_vm1, %v1053_v14, %v6902_v13  ;;  %v1593_v52 = vrot.slane %v1580_v29, 4 }
 0x1f7   : > { %v1540_v21 = vperm.slane %v1532_v19, %v6218_v57  ;;  %v1552_v34 = vperm.slane %v1544_v17, %v6218_v57  ;;  %v1548_v48 = vperm.slane %v1542_v43, %v6218_v57  ;;  %v5759_v39 = vunpack.i.l.bf16 %v6952_v56 }
 0x1f8   : > { %v2992_v45 = vpack.c.b16 %v2991_v60, %v2990_v26  ;;  %v2962_v9 = vpack.c.b16 %v2961_v59, %v2960_v16  ;;  %v6962_v41 = vperm.slane %v1043_v47, %v6074_v54  ;;  %v6965_v1 = vperm.slane %v1048_v28, %v6074_v54 }
 0x1f9   : > { %v5754_v13 = vunpack.i.l.bf16 %v5753_v22  ;;  %v6969_v14 = vperm.slane %v1054_v24, %v6074_v54  ;;  %v1553_v44 = vrot.slane %v1536_v31, 4  ;;  %v1582_v40 = vsel %vm373_vm1, %v1581_v50, %v9678_v55 }
 0x1fa   : > { %v9679_v19 = vrot.slane %v9678_v55, 4  ;;  %5618 = vmatmul.msk.bf16.vlgmr.msrb.gmra.mxu3 %vm2863_vm2, %v2992_v45  ;;  %5617 = vmatmul.msk.bf16.vlgmr.msrb.gmra.mxu2 %vm2863_vm2, %v2962_v9  ;;  %v1555_v27 = vrot.slane %v1540_v21, 4  ;;  %v1559_v23 = vrot.slane %v1552_v34, 4  ;;  %v1594_v20 = vsel %vm373_vm1, %v1593_v52, %v9680_v0  ;;  %v6996_v34 = vpop.permute.xlu2 %5772 }
 0x1fb   : > { %v5760_v17 = vunpack.i.h.bf16 %v6952_v56  ;;  %v1557_v49 = vrot.slane %v1548_v48, 4  ;;  %v9681_v26 = vrot.slane %v9680_v0, 4  ;;  %v1623_v47 = vrot.slane %v5759_v39, 4 }
 0x1fc   : > { %v1584_v42 = vsel %vm373_vm1, %v1576_v46, %v9679_v19  ;;  %v5755_v28 = vunpack.i.h.bf16 %v5753_v22  ;;  %v1588_v43 = vperm.slane %v1582_v40, %v6218_v57  ;;  %v1613_v50 = vrot.slane %v5754_v13, 4 }
 0x1fd   : > { %v1596_v8 = vsel %vm373_vm1, %v1580_v29, %v9681_v26  ;;  %v1592_v16 = vperm.slane %v1584_v42, %v6218_v57  ;;  %v1554_v56 = vsel %vm373_vm1, 0.0, %v1553_v44  ;;  %v6991_v24 = vperm.slane %v1594_v20, %v6218_v57 }
 0x1fe   : > { %v1556_v29 = vsel %vm373_vm1, 0.0, %v1555_v27  ;;  %v1560_v22 = vsel %vm373_vm1, 0.0, %v1559_v23  ;;  %v1604_v52 = vperm.slane %v1596_v8, %v6218_v57  ;;  %v1675_v21 = vrot.slane %v5760_v17, 4 }
 0x1ff   : > { %v1558_v45 = vsel %vm373_vm1, 0.0, %v1557_v49  ;;  %v1624_v9 = vsel %vm373_vm1, 0.0, %v1623_v47  ;;  %v1665_v55 = vrot.slane %v5755_v28, 4  ;;  %v1618_v40 = vperm.slane %v5754_v13, %v6074_v54 }
 0x200   : > { %v1605_v44 = vrot.slane %v1588_v43, 4  ;;  %v1607_v19 = vrot.slane %v1592_v16, 4  ;;  %v1628_v42 = vperm.slane %v5759_v39, %v6074_v54  ;;  %v1614_v0 = vsel %vm373_vm1, 0.0, %v1613_v50 }
 0x201   : > { %v1609_v20 = vrot.slane %v6991_v24, 4  ;;  %v7005_v26 = vsel %vm373_vm1, %v1555_v27, %v1536_v31  ;;  %v1670_v8 = vperm.slane %v5755_v28, %v6074_v54  ;;  %v5775_v49 = vunpack.i.h.bf16 %v6996_v34 }
 0x202   : > { %v1611_v10 = vrot.slane %v1604_v52, 4  ;;  %v1874_v47 = vrot.slane %v1556_v29, 4  ;;  %v1676_v12 = vsel %vm373_vm1, 0.0, %v1675_v21  ;;  %v1632_v13 = vperm.slane %v1624_v9, %v6074_v54 }
 0x203   : > { %v1680_v16 = vperm.slane %v5760_v17, %v6074_v54  ;;  %v1666_v39 = vsel %vm373_vm1, 0.0, %v1665_v55  ;;  %v1622_v50 = vperm.slane %v1614_v0, %v6074_v54  ;;  %v1635_v46 = vrot.slane %v1618_v40, 4 }
 0x204   : > { %v1606_v31 = vsel %vm373_vm1, 0.0, %v1605_v44  ;;  %v1608_v27 = vsel %vm373_vm1, 0.0, %v1607_v19  ;;  %v1633_v52 = vrot.slane %v1628_v42, 4  ;;  %v7019_v29 = vsel %vm373_vm1, %v1559_v23, %v1548_v48 }
 0x205   : > { %v1684_v21 = vperm.slane %v1676_v12, %v6074_v54  ;;  %v1687_v9 = vrot.slane %v1670_v8, 4  ;;  %v2121_v17 = vrot.slane %v5775_v49, 4  ;;  %v1610_v55 = vsel %vm373_vm1, 0.0, %v1609_v20 }
 0x206   : > { %v1885_v53 = vrot.slane %v1560_v22, 4  ;;  %v1645_v0 = vrot.slane %v1632_v13, 4  ;;  %v1674_v7 = vperm.slane %v1666_v39, %v6074_v54  ;;  %v1875_v44 = vsel %vm373_vm1, %v1874_v47, %v1554_v56 }
 0x207   : > { %v1685_v2 = vrot.slane %v1680_v16, 4  ;;  %v1636_v59 = vsel %vm373_vm1, %v1628_v42, %v1635_v46  ;;  %v1647_v60 = vrot.slane %v1622_v50, 4  ;;  %v1612_v28 = vsel %vm373_vm1, 0.0, %v1611_v10 }
 0x208   : > { %v7028_v48 = vsel %vm373_vm1, %v1607_v19, %v1588_v43  ;;  %v1912_v12 = vrot.slane %v1608_v27, 4  ;;  %v1634_v23 = vsel %vm373_vm1, %v1633_v52, %v1618_v40  ;;  %v1697_v36 = vrot.slane %v1684_v21, 4 }
 0x209   : > { %v1688_v22 = vsel %vm373_vm1, %v1680_v16, %v1687_v9  ;;  %v2122_v20 = vsel %vm373_vm1, 0.0, %v2121_v17  ;;  %v2126_v39 = vperm.slane %v5775_v49, %v6074_v54  ;;  %v1879_v56 = vperm.slane %v1875_v44, %v6074_v54 }
 0x20a   : > { %v1699_v47 = vrot.slane %v1674_v7, 4  ;;  %v1644_v46 = vperm.slane %v1636_v59, %v6218_v57  ;;  %v1646_v42 = vsel %vm373_vm1, %v1645_v0, %v1622_v50  ;;  %v1640_v43 = vperm.slane %v1634_v23, %v6218_v57 }
 0x20b   : > { %v1648_v19 = vsel %vm373_vm1, %v1632_v13, %v1647_v60  ;;  %v1686_v40 = vsel %vm373_vm1, %v1685_v2, %v1670_v8  ;;  %v5774_v27 = vunpack.i.l.bf16 %v6996_v34  ;;  %v7042_v16 = vsel %vm373_vm1, %v1885_v53, %v1558_v45 }
 0x20c   : > { %v1913_v49 = vsel %vm373_vm1, %v1912_v12, %v1606_v31  ;;  %v1696_v52 = vperm.slane %v1688_v22, %v6218_v57  ;;  %v2130_v9 = vperm.slane %v2122_v20, %v6074_v54  ;;  %v1652_v50 = vperm.slane %v1646_v42, %v6218_v57 }
 0x20d   : > { %v1698_v60 = vsel %vm373_vm1, %v1697_v36, %v1674_v7  ;;  %v2143_v13 = vrot.slane %v2126_v39, 4  ;;  %v1656_v2 = vperm.slane %v1648_v19, %v6218_v57  ;;  %v1659_v34 = vrot.slane %v1644_v46, 4  ;;  %v9682_v46 = vld [vmem:[#allocation20_spill] sm:$0xff] }
 0x20e   : > { %v1692_v53 = vperm.slane %v1686_v40, %v6218_v57  ;;  %v1700_v45 = vsel %vm373_vm1, %v1684_v21, %v1699_v47  ;;  %v1917_v8 = vperm.slane %v1913_v49, %v6074_v54  ;;  %v1923_v31 = vrot.slane %v1612_v28, 4 }
 0x20f   : > { %v1657_v17 = vrot.slane %v1640_v43, 4  ;;  %v2069_v0 = vrot.slane %v5774_v27, 4  ;;  %v7057_v44 = vsel %vm373_vm1, %v1611_v10, %v6991_v24  ;;  %v1704_v12 = vperm.slane %v1698_v60, %v6218_v57 }
 0x210   : > { %v1711_v36 = vrot.slane %v1696_v52, 4  ;;  %v2155_v7 = vrot.slane %v2130_v9, 4  ;;  %v7060_v23 = vrot.slane %v1879_v56, 4  ;;  %v1661_v22 = vrot.slane %v1652_v50, 4 }
 0x211   : > { %v1708_v20 = vperm.slane %v1700_v45, %v6218_v57  ;;  %v2144_v21 = vsel %vm373_vm1, %v9682_v46, %v2143_v13  ;;  %v1660_v28 = vsel %vm373_vm1, 0.0, %v1659_v34  ;;  %v1663_v47 = vrot.slane %v1656_v2, 4  ;;  %v9683_v13 = vld [vmem:[#allocation22_spill] sm:$0xff] }
 0x212   : > { %v1709_v42 = vrot.slane %v1692_v53, 4  ;;  %v2074_v19 = vperm.slane %v5774_v27, %v6074_v54  ;;  %v7068_v10 = vsel %vm373_vm1, %v1923_v31, %v1610_v55  ;;  %v7070_v24 = vrot.slane %v1917_v8, 4 }
 0x213   : > { %v1658_v56 = vsel %vm373_vm1, 0.0, %v1657_v17  ;;  %v2070_v40 = vsel %vm373_vm1, 0.0, %v2069_v0  ;;  %v1712_v49 = vsel %vm373_vm1, 0.0, %v1711_v36  ;;  %v1713_v52 = vrot.slane %v1704_v12, 4 }
 0x214   : > { %v2152_v60 = vperm.slane %v2144_v21, %v6218_v57  ;;  %v2156_v2 = vsel %vm373_vm1, %v9683_v13, %v2155_v7  ;;  %v1662_v45 = vsel %vm373_vm1, 0.0, %v1661_v22  ;;  %v1715_v27 = vrot.slane %v1708_v20, 4 }
 0x215   : > { %v7080_v55 = vsel %vm373_vm1, %v1659_v34, %v1640_v43  ;;  %v1950_v8 = vrot.slane %v1660_v28, 4  ;;  %v1664_v31 = vsel %vm373_vm1, 0.0, %v1663_v47  ;;  %v1710_v17 = vsel %vm373_vm1, 0.0, %v1709_v42  ;;  %v7092_v43 = vpop.permute.xlu1 %5767 }
 0x216   : > { %v2078_v0 = vperm.slane %v2070_v40, %v6074_v54  ;;  %v2091_v59 = vrot.slane %v2074_v19, 4  ;;  %v7086_v11 = vsel %vm373_vm1, %v1663_v47, %v1652_v50  ;;  %v1988_v21 = vrot.slane %v1712_v49, 4 }
 0x217   : > { %9684 = vst [vmem:[#allocation17_spill] sm:$0xff] %v7086_v11  ;;  %v9685_v7 = vrot.slane %v9682_v46, 4  ;;  %v2164_v20 = vperm.slane %v2156_v2, %v6218_v57  ;;  %v1714_v34 = vsel %vm373_vm1, 0.0, %v1713_v52  ;;  %v7098_v42 = vsel %vm373_vm1, %v1711_v36, %v1692_v53 }
 0x218   : > { %v2167_v40 = vrot.slane %v2152_v60, 4  ;;  %v1716_v50 = vsel %vm373_vm1, 0.0, %v1715_v27  ;;  %v1951_v47 = vsel %vm373_vm1, %v1950_v8, %v1658_v56  ;;  %v1961_v46 = vrot.slane %v1664_v31, 4 }
 0x219   : > { %v2142_v22 = vsel %vm373_vm1, %v9685_v7, %v2126_v39  ;;  %v9686_v39 = vrot.slane %v9683_v13, 4  ;;  %v2092_v52 = vsel %vm373_vm1, %v6553_v62, %v2091_v59  ;;  %v2103_v7 = vrot.slane %v2078_v0, 4 }
 0x21a   : > { %v2148_v2 = vperm.slane %v2142_v22, %v6218_v57  ;;  %v5769_v28 = vunpack.i.l.bf16 %v7092_v43  ;;  %v1989_v56 = vsel %vm373_vm1, %v1988_v21, %v1710_v17  ;;  %v2171_v60 = vrot.slane %v2164_v20, 4 }
 0x21b   : > { %v2154_v49 = vsel %vm373_vm1, %v9686_v39, %v2130_v9  ;;  %v1955_v13 = vperm.slane %v1951_v47, %v6074_v54  ;;  %v2168_v8 = vsel %vm373_vm1, 0.0, %v2167_v40  ;;  %v9687_v59 = vrot.slane %v6553_v62, 4 }
 0x21c   : > { %v2160_v9 = vperm.slane %v2154_v49, %v6218_v57  ;;  %v7121_v22 = vsel %vm373_vm1, %v1961_v46, %v1662_v45  ;;  %v7124_v39 = vsel %vm373_vm1, %v1715_v27, %v1704_v12  ;;  %v1999_v53 = vrot.slane %v1716_v50, 4 }
 0x21d   : > { %v2090_v31 = vsel %vm373_vm1, %v9687_v59, %v2074_v19  ;;  %9688 = vst [vmem:[#allocation18_spill] sm:$0xff] %v7124_v39  ;;  %v2100_v17 = vperm.slane %v2092_v52, %v6218_v57  ;;  %v1993_v21 = vperm.slane %v1989_v56, %v6074_v54  ;;  %v2165_v20 = vrot.slane %v2148_v2, 4  ;;  %v9699_v39 = vld [vmem:[#allocation14_spill] sm:$0xff] }
 0x21e   : > { %v2104_v47 = vsel %vm373_vm1, %v6565_v5, %v2103_v7  ;;  %v721_v49 = vrot.slane %v5769_v28, 4  ;;  %v2172_v62 = vsel %vm373_vm1, 0.0, %v2171_v60  ;;  %v2528_v36 = vrot.slane %v2168_v8, 4 }
 0x21f   : > { %v7132_v19 = vperm.slane %v2090_v31, %v6218_v57  ;;  %v2102_v12 = vsel %vm373_vm1, %v2101_v18, %v2078_v0  ;;  %v7137_v45 = vrot.slane %v1955_v13, 4  ;;  %v2169_v50 = vrot.slane %v2160_v9, 4 }
 0x220   : > { %v9604_v46 = vunpack.i.h.bf16 %v7092_v43  ;;  %v7143_v52 = vsel %vm373_vm1, %v1999_v53, %v1714_v34  ;;  %v7146_v7 = vsel %vm373_vm1, %v2167_v40, %v2148_v2  ;;  %v2112_v56 = vperm.slane %v2104_v47, %v6218_v57  ;;  %v9692_v2 = vld [vmem:[#allocation3_spill] sm:$0xff] }
 0x221   : > { %9689 = vst [vmem:[#allocation21_spill] sm:$0xff] %v7146_v7  ;;  %v2115_v8 = vrot.slane %v2100_v17, 4  ;;  %v2166_v5 = vsel %vm373_vm1, 0.0, %v2165_v20  ;;  %v7151_v18 = vsel %vm373_vm1, %v2171_v60, %v2160_v9  ;;  %v2539_v0 = vrot.slane %v2172_v62, 4  ;;  %v9694_v20 = vld [vmem:[#allocation12_spill] sm:$0xff] }
 0x222   : > { %9690 = vst [vmem:[#allocation19_spill] sm:$0xff] %v7151_v18  ;;  %v7154_v13 = vperm.slane %v2102_v12, %v6218_v57  ;;  %v7156_v59 = vrot.slane %v1993_v21, 4  ;;  %v7159_v34 = vsel %vm373_vm1, %v2528_v36, %v2166_v5  ;;  %v2113_v40 = vrot.slane %v7132_v19, 4 }
 0x223   : > { %v9693_v53 = vunpack.i.l.bf16 %v9692_v2  ;;  %v2170_v17 = vsel %vm373_vm1, 0.0, %v2169_v50  ;;  %v777_v9 = vrot.slane %v9604_v46, 4  ;;  %v724_v21 = vsel %vm373_vm1, %v5769_v28, %v9694_v20 }
 0x224   : > { %9691 = vst [vmem:[#allocation8_spill] sm:$0xff] %v7156_v59  ;;  %v2116_v47 = vsel %vm373_vm1, 0.0, %v2115_v8  ;;  %v2119_v62 = vrot.slane %v2112_v56, 4  ;;  %v2533_v12 = vperm.slane %v7159_v34, %v6074_v54  ;;  %v7182_v50 = vsel %vm373_vm1, %v2539_v0, %v2170_v17 }
 0x225   : > { %v722_v31 = vsel %vm373_vm1, %v721_v49, %v9693_v53  ;;  %v954_v49 = vsel %vm373_vm1, %v6878_v15, %v953_v38  ;;  %v2117_v5 = vrot.slane %v7154_v13, 4  ;;  %v2114_v53 = vsel %vm373_vm1, 0.0, %v2113_v40  ;;  %v7193_v15 = vpop.permute.xlu1 %5782 }
 0x226   : > { %v728_v28 = vperm.slane %v722_v31, %v6074_v54  ;;  %v732_v20 = vperm.slane %v724_v21, %v6074_v54  ;;  %v962_v56 = vperm.slane %v954_v49, %v6218_v57  ;;  %v966_v30 = vsel %vm373_vm1, %v6884_v4, %v965_v37 }
 0x227   : > { %v2490_v38 = vrot.slane %v2116_v47, 4  ;;  %v974_v0 = vperm.slane %v966_v30, %v6218_v57  ;;  %v9695_v34 = vrot.slane %v6606_v35, 4  ;;  %v9696_v40 = vrot.slane %v6609_v51, 4 }
 0x228   : > { %v2544_v58 = vperm.slane %v7182_v50, %v6074_v54  ;;  %v2120_v4 = vsel %vm373_vm1, 0.0, %v2119_v62  ;;  %v2118_v47 = vsel %vm373_vm1, 0.0, %v2117_v5  ;;  %v733_v35 = vrot.slane %v728_v28, 4 }
 0x229   : > { %v1008_v31 = vsel %vm373_vm1, %v6635_v63, %v9695_v34  ;;  %v1020_v17 = vsel %vm373_vm1, %v6638_v61, %v9696_v40  ;;  %v979_v49 = vrot.slane %v974_v0, 4  ;;  %v981_v30 = vrot.slane %v962_v56, 4  ;;  %v9697_v63 = vld [vmem:[#allocation16_spill] sm:$0xff] }
 0x22a   : > { %v1016_v37 = vperm.slane %v1008_v31, %v6218_v57  ;;  %v1028_v21 = vperm.slane %v1020_v17, %v6218_v57  ;;  %v9698_v34 = vrot.slane %v9697_v63, 4  ;;  %v745_v36 = vrot.slane %v732_v20, 4 }
 0x22b   : > { %v2491_v50 = vsel %vm373_vm1, %v2490_v38, %v2114_v53  ;;  %v2501_v60 = vrot.slane %v2120_v4, 4  ;;  %v980_v27 = vsel %vm373_vm1, %v979_v49, %v962_v56  ;;  %v982_v31 = vsel %vm373_vm1, %v974_v0, %v981_v30  ;;  %v9702_v30 = vld [vmem:[#allocation11_spill] sm:$0xff] }
 0x22c   : > { %v736_v51 = vsel %vm373_vm1, %v728_v28, %v9698_v34  ;;  %v1033_v61 = vrot.slane %v1028_v21, 4  ;;  %v1035_v40 = vrot.slane %v1016_v37, 4  ;;  %v2801_v5 = vpack.c.bf16 %v980_v27, %v980_v27 }
 0x22d   : > { %v2803_v18 = vpack.c.bf16 %v982_v31, %v982_v31  ;;  %v744_v7 = vperm.slane %v736_v51, %v6218_v57  ;;  %v9700_v28 = vrot.slane %v9699_v39, 4  ;;  %v734_v53 = vsel %vm373_vm1, %v733_v35, %v9697_v63 }
 0x22e   : > { %v1034_v17 = vsel %vm373_vm1, %v1033_v61, %v1016_v37  ;;  %v1036_v46 = vsel %vm373_vm1, %v1028_v21, %v1035_v40  ;;  %v746_v56 = vsel %vm373_vm1, %v745_v36, %v9699_v39  ;;  %v3020_v38 = vunpack.c.l.b16 %v2801_v5  ;;  %v7240_v36 = vpop.permute.xlu1 %5787 }
 0x22f   : > { %v748_v34 = vsel %vm373_vm1, %v732_v20, %v9700_v28  ;;  %v2802_v11 = vpack.c.bf16 %v1034_v17, %v1034_v17  ;;  %v2804_v59 = vpack.c.bf16 %v1036_v46, %v1036_v46  ;;  %v3042_v0 = vunpack.c.l.b16 %v2803_v18 }
 0x230   : > { %v7228_v27 = vsel %vm373_vm1, %v2115_v8, %v7132_v19  ;;  %v9701_v4 = vunpack.i.h.bf16 %v9692_v2  ;;  %v2495_v46 = vperm.slane %v2491_v50, %v6074_v54  ;;  %v2502_v49 = vsel %vm373_vm1, %v2501_v60, %v2118_v47 }
 0x231   : > { %v3021_v21 = vunpack.c.l.b16 %v2802_v11  ;;  %v3043_v20 = vunpack.c.l.b16 %v2804_v59  ;;  %v756_v35 = vperm.slane %v748_v34, %v6218_v57  ;;  %v9703_v39 = vunpack.i.h.bf16 %v7092_v43  ;;  %v9704_v34 = vld [vmem:[#allocation15_spill] sm:$0xff] }
 0x232   : > { %v778_v37 = vsel %vm373_vm1, %v777_v9, %v9701_v4  ;;  %v740_v19 = vperm.slane %v734_v53, %v6218_v57  ;;  %v752_v8 = vperm.slane %v746_v56, %v6218_v57  ;;  %v7246_v59 = vsel %vm373_vm1, %v2119_v62, %v7154_v13 }
 0x233   : > { %v780_v18 = vsel %vm373_vm1, %v9703_v39, %v9702_v30  ;;  %v3022_v9 = vpack.c.b16 %v3021_v21, %v3020_v38  ;;  %v3044_v11 = vpack.c.b16 %v3043_v20, %v3042_v0  ;;  %v759_v60 = vrot.slane %v744_v7, 4  ;;  %v9706_v38 = vld [vmem:[#allocation13_spill] sm:$0xff] }
 0x234   : > { %v784_v47 = vperm.slane %v778_v37, %v6074_v54  ;;  %v5785_v63 = vunpack.i.h.bf16 %v7193_v15  ;;  %v7250_v43 = vrot.slane %v2533_v12, 4  ;;  %v788_v51 = vperm.slane %v780_v18, %v6074_v54 }
 0x235   : > { %5619 = vmatmul.msk.bf16.vlgmr.msra.gmra.mxu1 %vm2863_vm2, %v3022_v9  ;;  %5620 = vmatmul.msk.bf16.vlgmr.msra.gmra.mxu2 %vm2863_vm2, %v3044_v11  ;;  %v5784_v61 = vunpack.i.l.bf16 %v7193_v15  ;;  %v5790_v40 = vunpack.i.h.bf16 %v7240_v36  ;;  %v7257_v50 = vrot.slane %v2544_v58, 4  ;;  %v2506_v13 = vperm.slane %v2502_v49, %v6074_v54 }
 0x236   : > { %v763_v62 = vrot.slane %v756_v35, 4  ;;  %v7264_v31 = vrot.slane %v2495_v46, 4  ;;  %v757_v17 = vrot.slane %v740_v19, 4  ;;  %v761_v5 = vrot.slane %v752_v8, 4 }
 0x237   : > { %v7267_v28 = vsel %vm373_vm1, 0.0, %v759_v60  ;;  %v789_v15 = vrot.slane %v784_v47, 4  ;;  %v9705_v58 = vrot.slane %v9704_v34, 4  ;;  %v2225_v56 = vrot.slane %v5785_v63, 4 }
 0x238   : > { %v9707_v0 = vrot.slane %v9706_v38, 4  ;;  %v2230_v37 = vperm.slane %v5785_v63, %v6074_v54  ;;  %v2173_v21 = vrot.slane %v5784_v61, 4  ;;  %v2240_v20 = vperm.slane %v5790_v40, %v6074_v54 }
 0x239   : > { %v792_v53 = vsel %vm373_vm1, %v784_v47, %v9705_v58  ;;  %v7277_v46 = vrot.slane %v2506_v13, 4  ;;  %v7280_v49 = vsel %vm373_vm1, 0.0, %v763_v62  ;;  %v801_v35 = vrot.slane %v788_v51, 4 }
 0x23a   : > { %v804_v4 = vsel %vm373_vm1, %v788_v51, %v9707_v0  ;;  %v2235_v30 = vrot.slane %v5790_v40, 4  ;;  %v7283_v39 = vsel %vm373_vm1, 0.0, %v757_v17  ;;  %v7286_v18 = vsel %vm373_vm1, 0.0, %v761_v5 }
 0x23b   : > { %v7289_v9 = vsel %vm373_vm1, %v759_v60, %v740_v19  ;;  %v790_v47 = vsel %vm373_vm1, %v789_v15, %v9704_v34  ;;  %v800_v63 = vperm.slane %v792_v53, %v6218_v57  ;;  %v812_v13 = vperm.slane %v804_v4, %v6218_v57 }
 0x23c   : > { %9708 = vst [vmem:[#allocation2_spill] sm:$0xff] %v7289_v9  ;;  %v2226_v51 = vsel %vm373_vm1, 0.0, %v2225_v56  ;;  %v1156_v40 = vsel %vm373_vm1, %v763_v62, %v752_v8  ;;  %v2247_v17 = vrot.slane %v2230_v37, 4  ;;  %v2174_v5 = vsel %vm373_vm1, 0.0, %v2173_v21 }
 0x23d   : > { %v2245_v58 = vrot.slane %v2240_v20, 4  ;;  %v802_v19 = vsel %vm373_vm1, %v801_v35, %v9706_v38  ;;  %v2236_v0 = vsel %vm373_vm1, 0.0, %v2235_v30  ;;  %v1890_v15 = vperm.slane %v7042_v16, %v6074_v54 }
 0x23e   : > { %v7306_v34 = vperm.slane %v790_v47, %v6218_v57  ;;  %v7309_v53 = vperm.slane %v2226_v51, %v6074_v54  ;;  %v2248_v8 = vsel %vm373_vm1, %v2240_v20, %v2247_v17  ;;  %v5789_v62 = vunpack.i.l.bf16 %v7240_v36 }
 0x23f   : > { %v7313_v56 = vrot.slane %v800_v63, 4  ;;  %v7316_v38 = vperm.slane %v1156_v40, %v6074_v54  ;;  %v2178_v4 = vperm.slane %v5784_v61, %v6074_v54  ;;  %v7320_v21 = vperm.slane %v2174_v5, %v6074_v54 }
 0x240   : > { %v7323_v16 = vperm.slane %v802_v19, %v6218_v57  ;;  %v7325_v35 = vrot.slane %v812_v13, 4  ;;  %v7328_v30 = vperm.slane %v2236_v0, %v6074_v54  ;;  %v2246_v36 = vsel %vm373_vm1, %v2245_v58, %v2230_v37 }
 0x241   : > { %v2256_v20 = vperm.slane %v2248_v8, %v6218_v57  ;;  %v1884_v47 = vperm.slane %v7019_v29, %v6074_v54  ;;  %v9709_v61 = vperm.slane %v7005_v26, %v6074_v54  ;;  %v1897_v51 = vrot.slane %v1890_v15, 4 }
 0x242   : > { %v2259_v13 = vrot.slane %v7309_v53, 4  ;;  %v2183_v40 = vrot.slane %v5789_v62, 4  ;;  %v2188_v17 = vperm.slane %v5789_v62, %v6074_v54  ;;  %v2195_v37 = vrot.slane %v2178_v4, 4 }
 0x243   : > { %v1892_v63 = vsel %vm373_vm1, %v7060_v23, %v9709_v61  ;;  %v2207_v58 = vrot.slane %v7320_v21, 4  ;;  %v7344_v19 = vperm.slane %v2246_v36, %v6218_v57  ;;  %v1898_v29 = vsel %vm373_vm1, %v1897_v51, %v1884_v47 }
 0x244   : > { %v1896_v5 = vperm.slane %v1892_v63, %v6218_v57  ;;  %v2257_v26 = vrot.slane %v7328_v30, 4  ;;  %v2260_v23 = vsel %vm373_vm1, %v7328_v30, %v2259_v13  ;;  %v1902_v0 = vperm.slane %v1898_v29, %v6218_v57 }
 0x245   : > { %v7351_v8 = vrot.slane %v2256_v20, 4  ;;  %v1928_v62 = vperm.slane %v7068_v10, %v6074_v54  ;;  %v9710_v61 = vperm.slane %v7028_v48, %v6074_v54  ;;  %v9711_v47 = vrot.slane %v6962_v41, 4 }
 0x246   : > { %v1905_v15 = vrot.slane %v1896_v5, 4  ;;  %v2184_v30 = vsel %vm373_vm1, 0.0, %v2183_v40  ;;  %v2193_v51 = vrot.slane %v2188_v17, 4  ;;  %v1922_v10 = vperm.slane %v7057_v44, %v6074_v54 }
 0x247   : > { %v1930_v36 = vsel %vm373_vm1, %v7070_v24, %v9710_v61  ;;  %v1060_v63 = vsel %vm373_vm1, %v9711_v47, %v6927_v33  ;;  %v1935_v29 = vrot.slane %v1928_v62, 4  ;;  %v1903_v48 = vrot.slane %v1902_v0, 4 }
 0x248   : > { %v1906_v20 = vsel %vm373_vm1, %v1902_v0, %v1905_v15  ;;  %v1934_v13 = vperm.slane %v1930_v36, %v6218_v57  ;;  %v7370_v12 = vperm.slane %v1060_v63, %v6218_v57  ;;  %v9712_v47 = vrot.slane %v6969_v14, 4 }
 0x249   : > { %v2831_v61 = vpack.c.bf16 %v1906_v20, %v1906_v20  ;;  %v9713_v15 = vrot.slane %v6891_v32, 4  ;;  %v2192_v7 = vperm.slane %v2184_v30, %v6074_v54  ;;  %v1936_v44 = vsel %vm373_vm1, %v1935_v29, %v1922_v10 }
 0x24a   : > { %v1943_v24 = vrot.slane %v1934_v13, 4  ;;  %v1072_v40 = vsel %vm373_vm1, %v9712_v47, %v6965_v1  ;;  %v1904_v0 = vsel %vm373_vm1, %v1903_v48, %v1896_v5  ;;  %v9714_v62 = vrot.slane %v6888_v25, 4 }
 0x24b   : > { %v1114_v36 = vsel %vm373_vm1, %v9713_v15, %v6871_v3  ;;  %v1940_v20 = vperm.slane %v1936_v44, %v6218_v57  ;;  %v7389_v47 = vperm.slane %v1072_v40, %v6218_v57  ;;  %v1085_v11 = vrot.slane %v7370_v12, 4 }
 0x24c   : > { %v1126_v63 = vsel %vm373_vm1, %v9714_v62, %v6875_v6  ;;  %v7393_v15 = vperm.slane %v1114_v36, %v6218_v57  ;;  %v2268_v30 = vperm.slane %v2260_v23, %v6218_v57  ;;  %v2194_v10 = vsel %vm373_vm1, %v2193_v51, %v2178_v4 }
 0x24d   : > { %v2196_v5 = vsel %vm373_vm1, %v2188_v17, %v2195_v37  ;;  %v2829_v29 = vpack.c.bf16 %v1904_v0, %v1904_v0  ;;  %v1944_v48 = vsel %vm373_vm1, %v1940_v20, %v1943_v24  ;;  %v3099_v62 = vunpack.c.l.b16 %v2831_v61 }
 0x24e   : > { %v1941_v60 = vrot.slane %v1940_v20, 4  ;;  %v1086_v40 = vsel %vm373_vm1, %v7389_v47, %v1085_v11  ;;  %v2832_v44 = vpack.c.bf16 %v1944_v48, %v1944_v48  ;;  %v7402_v2 = vperm.slane %v1126_v63, %v6218_v57 }
 0x24f   : > { %v1139_v36 = vrot.slane %v7393_v15, 4  ;;  %v2807_v9 = vpack.c.bf16 %v1086_v40, %v1086_v40  ;;  %v2204_v23 = vperm.slane %v2196_v5, %v6218_v57  ;;  %v2205_v4 = vrot.slane %v2192_v7, 4 }
 0x250   : > { %v2208_v17 = vsel %vm373_vm1, %v2192_v7, %v2207_v58  ;;  %v1942_v37 = vsel %vm373_vm1, %v1941_v60, %v1934_v13  ;;  %v3100_v51 = vunpack.c.l.b16 %v2832_v44  ;;  %v3069_v61 = vunpack.c.l.b16 %v2829_v29 }
 0x251   : > { %v2830_v24 = vpack.c.bf16 %v1942_v37, %v1942_v37  ;;  %v1140_v11 = vsel %vm373_vm1, %v7402_v2, %v1139_v36  ;;  %v2258_v0 = vsel %vm373_vm1, %v2257_v26, %v7309_v53  ;;  %v2269_v63 = vrot.slane %v7344_v19, 4 }
 0x252   : > { %v2808_v20 = vpack.c.bf16 %v1140_v11, %v1140_v11  ;;  %v3094_v48 = vunpack.c.l.b16 %v2807_v9  ;;  %v2272_v5 = vsel %vm373_vm1, 0.0, %v7351_v8  ;;  %v2216_v7 = vperm.slane %v2208_v17, %v6218_v57 }
 0x253   : > { %v3101_v58 = vpack.c.b16 %v3100_v51, %v3099_v62  ;;  %v3070_v60 = vunpack.c.l.b16 %v2830_v24  ;;  %v2200_v13 = vperm.slane %v2194_v10, %v6218_v57  ;;  %v2206_v29 = vsel %vm373_vm1, %v2205_v4, %v7320_v21 }
 0x254   : > { %v2219_v40 = vrot.slane %v2204_v23, 4  ;;  %v3095_v44 = vunpack.c.l.b16 %v2808_v20  ;;  %v2264_v53 = vperm.slane %v2258_v0, %v6218_v57  ;;  %v2275_v26 = vrot.slane %v2268_v30, 4 }
 0x255   : > { %v3106_v36 = vsel %vm2863_vm2, %v3101_v58, 0  ;;  %v3071_v9 = vpack.c.b16 %v3070_v60, %v3069_v61  ;;  %v817_v37 = vrot.slane %v7323_v16, 4  ;;  %v820_v17 = vsel %vm373_vm1, 0.0, %v7325_v35 }
 0x256   : > { %v9715_v62 = vrot.slane %v7280_v49, 4  ;;  %3115 = vmatpush.bf16.xpose.msrb.mxu1 %v3106_v36  ;;  %v3096_v21 = vpack.c.b16 %v3095_v44, %v3094_v48  ;;  %v813_v23 = vrot.slane %v7306_v34, 4  ;;  %v2212_v4 = vperm.slane %v2206_v29, %v6218_v57 }
 0x257   : > { %v2223_v30 = vrot.slane %v2216_v7, 4  ;;  %v3076_v51 = vsel %vm2863_vm2, %v3071_v9, 0  ;;  %v816_v24 = vsel %vm373_vm1, 0.0, %v7313_v56  ;;  %v2604_v61 = vrot.slane %v2272_v5, 4 }
 0x258   : > { %v1162_v10 = vsel %vm373_vm1, %v9715_v62, %v7286_v18  ;;  %v2217_v11 = vrot.slane %v2200_v13, 4  ;;  %v2220_v0 = vsel %vm373_vm1, 0.0, %v2219_v40  ;;  %3085 = vmatpush.bf16.xpose.msra.mxu3 %v3076_v51  ;;  %3137 = vmatpush.bf16.xpose.msrb.mxu2 %v3076_v51  ;;  %v1215_v49 = vrot.slane %v820_v17, 4 }
 0x259   : > { %v2270_v18 = vsel %vm373_vm1, 0.0, %v2269_v63  ;;  %v2273_v20 = vrot.slane %v2264_v53, 4  ;;  %v2276_v48 = vsel %vm373_vm1, 0.0, %v2275_v26  ;;  %v818_v7 = vsel %vm373_vm1, 0.0, %v817_v37 }
 0x25a   : > { %v9716_v58 = vrot.slane %v7267_v28, 4  ;;  %v7444_v5 = vperm.slane %v1162_v10, %v6074_v54  ;;  %v1210_v29 = vsel %vm373_vm1, %v7325_v35, %v7323_v16  ;;  %v1181_v63 = vrot.slane %v7316_v38, 4 }
 0x25b   : > { %v2221_v44 = vrot.slane %v2212_v4, 4  ;;  %v2566_v9 = vrot.slane %v2220_v0, 4  ;;  %v1204_v37 = vrot.slane %v816_v24, 4  ;;  %v2605_v17 = vsel %vm373_vm1, %v2604_v61, %v2270_v18 }
 0x25c   : > { %v7441_v60 = vsel %vm373_vm1, %v9716_v58, %v7283_v39  ;;  %v2615_v28 = vrot.slane %v2276_v48, 4  ;;  %v2218_v39 = vsel %vm373_vm1, 0.0, %v2217_v11  ;;  %v814_v62 = vsel %vm373_vm1, 0.0, %v813_v23 }
 0x25d   : > { %v7455_v10 = vperm.slane %v1210_v29, %v6074_v54  ;;  %v1216_v51 = vsel %vm373_vm1, %v1215_v49, %v818_v7  ;;  %v2274_v16 = vsel %vm373_vm1, 0.0, %v2273_v20  ;;  %5622 = vmatmul.msk.bf16.vlgmr.msrb.gmra.mxu1 %vm2863_vm2, %v3096_v21  ;;  %v7463_v35 = vsel %vm373_vm1, %v7351_v8, %v7344_v19 }
 0x25e   : > { %v1083_v61 = vrot.slane %v7389_v47, 4  ;;  %v1137_v11 = vrot.slane %v7402_v2, 4  ;;  %v7470_v23 = vsel %vm373_vm1, %v7313_v56, %v7306_v34  ;;  %v2609_v0 = vperm.slane %v2605_v17, %v6074_v54 }
 0x25f   : > { %v2222_v49 = vsel %vm373_vm1, 0.0, %v2221_v44  ;;  %v2567_v21 = vsel %vm373_vm1, %v2566_v9, %v2218_v39  ;;  %v7476_v18 = vsel %vm373_vm1, %v1204_v37, %v814_v62  ;;  %v7479_v19 = vperm.slane %v1216_v51, %v6074_v54 }
 0x260   : > { %3159 = vmatpush.bf16.xpose.msrb.mxu3 %v3106_v36  ;;  %v2224_v36 = vsel %vm373_vm1, 0.0, %v2223_v30  ;;  %v7482_v8 = vsel %vm373_vm1, %v2275_v26, %v2264_v53  ;;  %v7485_v2 = vsel %vm373_vm1, %v2615_v28, %v2274_v16  ;;  %v1235_v34 = vrot.slane %v7455_v10, 4 }
 0x261   : > { %v2577_v24 = vrot.slane %v2224_v36, 4  ;;  %v2603_v56 = vperm.slane %v7463_v35, %v6074_v54  ;;  %v7491_v47 = vsel %vm373_vm1, %v2219_v40, %v2200_v13  ;;  %v7494_v20 = vsel %vm373_vm1, %v2223_v30, %v2212_v4 }
 0x262   : > { %v2571_v48 = vperm.slane %v2567_v21, %v6074_v54  ;;  %v1084_v53 = vsel %vm373_vm1, %v1083_v61, %v7370_v12  ;;  %v1138_v26 = vsel %vm373_vm1, %v1137_v11, %v7393_v15  ;;  %v2614_v58 = vperm.slane %v7482_v8, %v6074_v54  ;;  %v9723_v21 = vld [vmem:[#allocation8_spill] sm:$0xff]  ;;  %v2931_v8 = vpop.f32.mrf.mxu3 }
 0x263   : > { %v7498_v7 = vsel %vm373_vm1, %v2577_v24, %v2222_v49  ;;  %v2620_v13 = vperm.slane %v7485_v2, %v6074_v54  ;;  %v7508_v40 = vrot.slane %v2609_v0, 4  ;;  %v2805_v4 = vpack.c.bf16 %v1084_v53, %v1084_v53 }
 0x264   : > { %v2565_v30 = vperm.slane %v7491_v47, %v6074_v54  ;;  %v2576_v29 = vperm.slane %v7494_v20, %v6074_v54  ;;  %v2806_v44 = vpack.c.bf16 %v1138_v26, %v1138_v26  ;;  %v9717_v12 = vrot.slane %v6927_v33, 4 }
 0x265   : > { %v2582_v36 = vperm.slane %v7498_v7, %v6074_v54  ;;  %v3064_v9 = vunpack.c.l.b16 %v2805_v4  ;;  %v9718_v37 = vrot.slane %v6965_v1, 4  ;;  %v9719_v28 = vrot.slane %v6871_v3, 4 }
 0x266   : > { %v1062_v15 = vsel %vm373_vm1, %v6962_v41, %v9717_v12  ;;  %v7528_v62 = vrot.slane %v2571_v48, 4  ;;  %v3065_v33 = vunpack.c.l.b16 %v2806_v44  ;;  %v9720_v1 = vrot.slane %v6875_v6, 4  ;;  %v9725_v44 = vld [vmem:[#allocation17_spill] sm:$0xff] }
 0x267   : > { %v1074_v17 = vsel %vm373_vm1, %v6969_v14, %v9718_v37  ;;  %v1116_v39 = vsel %vm373_vm1, %v6891_v32, %v9719_v28  ;;  %v7531_v51 = vperm.slane %v1062_v15, %v6218_v57  ;;  %v1966_v32 = vperm.slane %v7121_v22, %v6074_v54 }
 0x268   : > { %v7534_v41 = vperm.slane %v1074_v17, %v6218_v57  ;;  %v7537_v16 = vperm.slane %v1116_v39, %v6218_v57  ;;  %v1128_v3 = vsel %vm373_vm1, %v6888_v25, %v9720_v1  ;;  %v9721_v14 = vperm.slane %v7080_v55, %v6074_v54 }
 0x269   : > { %v3066_v61 = vpack.c.b16 %v3065_v33, %v3064_v9  ;;  %v7552_v0 = vperm.slane %v1128_v3, %v6218_v57  ;;  %v1973_v49 = vrot.slane %v1966_v32, 4  ;;  %v2004_v25 = vperm.slane %v7143_v52, %v6074_v54  ;;  %v9728_v3 = vld [vmem:[#allocation18_spill] sm:$0xff] }
 0x26a   : > { %v1968_v24 = vsel %vm373_vm1, %v7137_v45, %v9721_v14  ;;  %v1087_v11 = vrot.slane %v7534_v41, 4  ;;  %v9722_v22 = vperm.slane %v7098_v42, %v6074_v54  ;;  %v9724_v45 = vperm.slane %v7228_v27, %v6074_v54 }
 0x26b   : > { %v1972_v6 = vperm.slane %v1968_v24, %v6218_v57  ;;  %5621 = vmatmul.msk.bf16.vlgmr.msra.gmra.mxu3 %vm2863_vm2, %v3066_v61  ;;  %v1141_v26 = vrot.slane %v7552_v0, 4  ;;  %v9726_v12 = vperm.slane %v9725_v44, %v6074_v54  ;;  %v2011_v27 = vrot.slane %v2004_v25, 4  ;;  %v9730_v25 = vld [vmem:[#allocation21_spill] sm:$0xff] }
 0x26c   : > { %v2006_v55 = vsel %vm373_vm1, %v9723_v21, %v9722_v22  ;;  %v2508_v48 = vsel %vm373_vm1, %v7264_v31, %v9724_v45  ;;  %v1088_v53 = vsel %vm373_vm1, %v1087_v11, %v7531_v51  ;;  %v9727_v28 = vperm.slane %v7246_v59, %v6074_v54  ;;  %v9732_v45 = vld [vmem:[#allocation19_spill] sm:$0xff] }
 0x26d   : > { %v1981_v52 = vrot.slane %v1972_v6, 4  ;;  %v2010_v4 = vperm.slane %v2006_v55, %v6218_v57  ;;  %v2809_v42 = vpack.c.bf16 %v1088_v53, %v1088_v53  ;;  %v1974_v15 = vsel %vm373_vm1, %v1973_v49, %v9726_v12 }
 0x26e   : > { %v2512_v9 = vperm.slane %v2508_v48, %v6218_v57  ;;  %v1142_v31 = vsel %vm373_vm1, %v1141_v26, %v7537_v16  ;;  %v1978_v37 = vperm.slane %v1974_v15, %v6218_v57  ;;  %v2514_v39 = vsel %vm373_vm1, %v7277_v46, %v9727_v28 }
 0x26f   : > { %v2019_v17 = vrot.slane %v2010_v4, 4  ;;  %v2810_v33 = vpack.c.bf16 %v1142_v31, %v1142_v31  ;;  %v3124_v1 = vunpack.c.l.b16 %v2809_v42  ;;  %v9729_v32 = vperm.slane %v9728_v3, %v6074_v54 }
 0x270   : > { %v2518_v24 = vperm.slane %v2514_v39, %v6218_v57  ;;  %v1982_v61 = vsel %vm373_vm1, %v1978_v37, %v1981_v52  ;;  %v2521_v49 = vrot.slane %v2512_v9, 4  ;;  %v9731_v59 = vperm.slane %v9730_v25, %v6074_v54 }
 0x271   : > { %v2012_v14 = vsel %vm373_vm1, %v2011_v27, %v9729_v32  ;;  %v3125_v22 = vunpack.c.l.b16 %v2810_v33  ;;  %v2835_v21 = vpack.c.bf16 %v1982_v61, %v1982_v61  ;;  %v9733_v48 = vperm.slane %v9732_v45, %v6074_v54 }
 0x272   : > { %v2016_v11 = vperm.slane %v2012_v14, %v6218_v57  ;;  %v2546_v46 = vsel %vm373_vm1, %v7250_v43, %v9731_v59  ;;  %v2522_v52 = vsel %vm373_vm1, %v2518_v24, %v2521_v49  ;;  %v1979_v44 = vrot.slane %v1978_v37, 4 }
 0x273   : > { %v2550_v55 = vperm.slane %v2546_v46, %v6218_v57  ;;  %v2552_v53 = vsel %vm373_vm1, %v7257_v50, %v9733_v48  ;;  %v3126_v12 = vpack.c.b16 %v3125_v22, %v3124_v1  ;;  %v3203_v43 = vunpack.c.l.b16 %v2835_v21  ;;  %v9734_v22 = vld [vmem:[#allocation2_spill] sm:$0xff] }
 0x274   : > { %v2020_v26 = vsel %vm373_vm1, %v2016_v11, %v2019_v17  ;;  %v2556_v42 = vperm.slane %v2552_v53, %v6218_v57  ;;  %v2839_v31 = vpack.c.bf16 %v2522_v52, %v2522_v52  ;;  %v1980_v28 = vsel %vm373_vm1, %v1979_v44, %v1972_v6 }
 0x275   : > { %v2836_v15 = vpack.c.bf16 %v2020_v26, %v2020_v26  ;;  %v2559_v27 = vrot.slane %v2550_v55, 4  ;;  %v2017_v39 = vrot.slane %v2016_v11, 4  ;;  %v2519_v33 = vrot.slane %v2518_v24, 4  ;;  %5623 = vmatmul.msk.bf16.vlgmr.msrb.gmra.mxu2 %vm2863_vm2, %v3126_v12 }
 0x276   : > { %v2833_v17 = vpack.c.bf16 %v1980_v28, %v1980_v28  ;;  %v2557_v32 = vrot.slane %v2556_v42, 4  ;;  %v3666_v61 = vunpack.c.l.b16 %v2839_v31  ;;  %v1149_v21 = vperm.slane %v9734_v22, %v6074_v54 }
 0x277   : > { %v3204_v3 = vunpack.c.l.b16 %v2836_v15  ;;  %v2560_v50 = vsel %vm373_vm1, %v2556_v42, %v2559_v27  ;;  %v2018_v37 = vsel %vm373_vm1, %v2017_v39, %v2010_v4  ;;  %v2520_v1 = vsel %vm373_vm1, %v2519_v33, %v2512_v9 }
 0x278   : > { %v2840_v14 = vpack.c.bf16 %v2560_v50, %v2560_v50  ;;  %v2834_v25 = vpack.c.bf16 %v2018_v37, %v2018_v37  ;;  %v3173_v59 = vunpack.c.l.b16 %v2833_v17  ;;  %v2558_v6 = vsel %vm373_vm1, %v2557_v32, %v2550_v55  ;;  %v7632_v50 = vpop.f32.mrf.mxu1 }
 0x279   : > { %v3205_v49 = vpack.c.b16 %v3204_v3, %v3203_v43  ;;  %v2837_v24 = vpack.c.bf16 %v2520_v1, %v2520_v1  ;;  %v2838_v46 = vpack.c.bf16 %v2558_v6, %v2558_v6  ;;  %v1155_v53 = vperm.slane %v7441_v60, %v6074_v54 }
 0x27a   : > { %v3667_v11 = vunpack.c.l.b16 %v2840_v14  ;;  %v3174_v48 = vunpack.c.l.b16 %v2834_v25  ;;  %v1179_v4 = vrot.slane %v7444_v5, 4  ;;  %v1169_v52 = vrot.slane %v1149_v21, 4 }
 0x27b   : > { %v3210_v45 = vsel %vm2863_vm2, %v3205_v49, 0  ;;  %v3638_v26 = vunpack.c.l.b16 %v2837_v24  ;;  %v3639_v55 = vunpack.c.l.b16 %v2838_v46  ;;  %v1167_v44 = vrot.slane %v1155_v53, 4 }
 0x27c   : > { %3219 = vmatpush.bf16.xpose.msra.mxu1 %v3210_v45  ;;  %3263 = vmatpush.bf16.xpose.msra.mxu3 %v3210_v45  ;;  %v7618_v9 = vpack.c.b16 %v3667_v11, %v3666_v61  ;;  %v3175_v42 = vpack.c.b16 %v3174_v48, %v3173_v59  ;;  %v1180_v12 = vsel %vm373_vm1, %v1179_v4, %v7316_v38  ;;  %v1233_v31 = vrot.slane %v7479_v19, 4 }
 0x27d   : > { %v1203_v15 = vperm.slane %v7470_v23, %v6074_v54  ;;  %v3640_v60 = vpack.c.b16 %v3639_v55, %v3638_v26  ;;  %v1186_v43 = vperm.slane %v1180_v12, %v6218_v57  ;;  %v1209_v27 = vperm.slane %v7476_v18, %v6074_v54 }
 0x27e   : > { %v3180_v28 = vsel %vm2863_vm2, %v3175_v42, 0  ;;  %v1168_v39 = vsel %vm373_vm1, %v1167_v44, %v1149_v21  ;;  %v1089_v3 = vrot.slane %v7531_v51, 4  ;;  %v1234_v18 = vsel %vm373_vm1, %v1233_v31, %v7455_v10 }
 0x27f   : > { %v1223_v33 = vrot.slane %v1203_v15, 4  ;;  %3189 = vmatpush.bf16.xpose.msrb.mxu0 %v3180_v28  ;;  %3241 = vmatpush.bf16.xpose.msra.mxu2 %v3180_v28  ;;  %v1174_v23 = vperm.slane %v1168_v39, %v6218_v57  ;;  %v1191_v17 = vrot.slane %v1186_v43, 4  ;;  %v1221_v32 = vrot.slane %v1209_v27, 4  ;;  %v7662_v28 = vpop.f32.mrf.mxu2 }
 0x280   : > { %v1240_v14 = vperm.slane %v1234_v18, %v6218_v57  ;;  %v1090_v61 = vsel %vm373_vm1, %v7534_v41, %v1089_v3  ;;  %v1143_v51 = vrot.slane %v7537_v16, 4  ;;  %v1170_v37 = vsel %vm373_vm1, %v1155_v53, %v1169_v52 }
 0x281   : > { %v1192_v1 = vsel %vm373_vm1, %v1191_v17, %v1174_v23  ;;  %v1193_v49 = vrot.slane %v1174_v23, 4  ;;  %v1222_v25 = vsel %vm373_vm1, %v1221_v32, %v1203_v15  ;;  %v2811_v59 = vpack.c.bf16 %v1090_v61, %v1090_v61  ;;  %v7698_v61 = vld [vmem:[%s9564_s3] sm:$0xff] }
 0x282   : > { %v1228_v6 = vperm.slane %v1222_v25, %v6218_v57  ;;  %v1245_v11 = vrot.slane %v1240_v14, 4  ;;  %v2813_v24 = vpack.c.bf16 %v1192_v1, %v1192_v1  ;;  %v1144_v46 = vsel %vm373_vm1, %v7552_v0, %v1143_v51 }
 0x283   : > { %v1194_v22 = vsel %vm373_vm1, %v1186_v43, %v1193_v49  ;;  %v2812_v41 = vpack.c.bf16 %v1144_v46, %v1144_v46  ;;  %v3146_v21 = vunpack.c.l.b16 %v2811_v59  ;;  %v1178_v16 = vperm.slane %v1170_v37, %v6218_v57 }
 0x284   : > { %3680 = vmatpush.bf16.msrb.mxu1 %v7618_v9  ;;  %v1246_v45 = vsel %vm373_vm1, %v1245_v11, %v1228_v6  ;;  %v1247_v48 = vrot.slane %v1228_v6, 4  ;;  %v3168_v53 = vunpack.c.l.b16 %v2813_v24  ;;  %v2815_v4 = vpack.c.bf16 %v1194_v22, %v1194_v22 }
 0x285   : > { %v2814_v26 = vpack.c.bf16 %v1246_v45, %v1246_v45  ;;  %v3147_v55 = vunpack.c.l.b16 %v2812_v41  ;;  %v1182_v52 = vsel %vm373_vm1, %v7444_v5, %v1181_v63  ;;  %v1224_v0 = vsel %vm373_vm1, %v1209_v27, %v1223_v33  ;;  %v2881_v33 = vpop.f32.mrf.mxu1 }
 0x286   : > { %v1248_v42 = vsel %vm373_vm1, %v1240_v14, %v1247_v48  ;;  %v3198_v44 = vunpack.c.l.b16 %v2815_v4  ;;  %v1190_v12 = vperm.slane %v1182_v52, %v6218_v57  ;;  %v1232_v15 = vperm.slane %v1224_v0, %v6218_v57  ;;  %v7726_v4 = vld [vmem:[%s9564_s3 + $0x30] sm:$0xff] }
 0x287   : > { %3652 = vmatpush.bf16.msra.mxu0 %v3640_v60  ;;  %3702 = vmatpush.bf16.msrb.mxu2 %v3640_v60  ;;  %v3169_v60 = vunpack.c.l.b16 %v2814_v26  ;;  %v2816_v43 = vpack.c.bf16 %v1248_v42, %v1248_v42  ;;  %v3148_v31 = vpack.c.b16 %v3147_v55, %v3146_v21  ;;  %v1236_v38 = vsel %vm373_vm1, %v7479_v19, %v1235_v34  ;;  %v7716_v21 = vld [vmem:[%s9564_s3 + $0x8] sm:$0xff] }
 0x288   : > { %v1195_v5 = vrot.slane %v1190_v12, 4  ;;  %v1244_v63 = vperm.slane %v1236_v38, %v6218_v57  ;;  %v2584_v27 = vsel %vm373_vm1, %v7528_v62, %v2565_v30  ;;  %v2589_v39 = vrot.slane %v2582_v36, 4 }
 0x289   : > { %v3170_v10 = vpack.c.b16 %v3169_v60, %v3168_v53  ;;  %v3199_v3 = vunpack.c.l.b16 %v2816_v43  ;;  %5624 = vmatmul.msk.bf16.vlgmr.msrb.gmra.mxu3 %vm2863_vm2, %v3148_v31  ;;  %v2588_v19 = vperm.slane %v2584_v27, %v6218_v57  ;;  %v2622_v34 = vsel %vm373_vm1, %v7508_v40, %v2603_v56  ;;  %v7742_v43 = vld [vmem:[%s9564_s3 + $0x18] sm:$0xff] }
 0x28a   : > { %v1196_v47 = vsel %vm373_vm1, %v1195_v5, %v1178_v16  ;;  %v1249_v30 = vrot.slane %v1244_v63, 4  ;;  %3724 = vmatpush.bf16.msrb.mxu3 %v7618_v9  ;;  %v2590_v7 = vsel %vm373_vm1, %v2589_v39, %v2576_v29  ;;  %v2626_v36 = vperm.slane %v2622_v34, %v6218_v57  ;;  %v7762_v34 = vld [vmem:[%s9564_s3 + $0x20] sm:$0xff] }
 0x28b   : > { %5625 = vmatmul.msk.bf16.vlgmr.msrb.gmra.mxu0 %vm2863_vm2, %v3170_v10  ;;  %v3200_v62 = vpack.c.b16 %v3199_v3, %v3198_v44  ;;  %v2817_v23 = vpack.c.bf16 %v1196_v47, %v1196_v47  ;;  %v2594_v35 = vperm.slane %v2590_v7, %v6218_v57  ;;  %v2597_v17 = vrot.slane %v2588_v19, 4  ;;  %v2933_v3 = vpop.f32.mrf.mxu3  ;;  %v7772_v7 = vld [vmem:[%s9564_s3 + $0x28] sm:$0xff] }
 0x28c   : > { %v1250_v56 = vsel %vm373_vm1, %v1249_v30, %v1232_v15  ;;  %v2627_v40 = vrot.slane %v2620_v13, 4  ;;  %v2635_v9 = vrot.slane %v2626_v36, 4  ;;  %v1197_v32 = vrot.slane %v1178_v16, 4  ;;  %v2911_v16 = vpop.f32.mrf.mxu2 }
 0x28d   : > { %5626 = vmatmul.msk.bf16.vlgmr.msra.gmra.mxu1 %vm2863_vm2, %v3200_v62  ;;  %v2818_v20 = vpack.c.bf16 %v1250_v56, %v1250_v56  ;;  %v3228_v29 = vunpack.c.l.b16 %v2817_v23  ;;  %v2598_v18 = vsel %vm373_vm1, %v2594_v35, %v2597_v17  ;;  %v2595_v14 = vrot.slane %v2594_v35, 4  ;;  %v2953_v53 = vpop.f32.mrf.mxu1 }
 0x28e   : > { %v2628_v2 = vsel %vm373_vm1, %v2627_v40, %v2614_v58  ;;  %v2843_v13 = vpack.c.bf16 %v2598_v18, %v2598_v18  ;;  %v1198_v51 = vsel %vm373_vm1, %v1190_v12, %v1197_v32  ;;  %v1251_v37 = vrot.slane %v1232_v15, 4 }
 0x28f   : > { %v3229_v1 = vunpack.c.l.b16 %v2818_v20  ;;  %v2632_v49 = vperm.slane %v2628_v2, %v6218_v57  ;;  %v2596_v25 = vsel %vm373_vm1, %v2595_v14, %v2588_v19  ;;  %v2819_v59 = vpack.c.bf16 %v1198_v51, %v1198_v51  ;;  %v7792_v20 = vld [vmem:[%s9564_s3 + $0x38] sm:$0xff]  ;;  %v9735_v2 = vld [vmem:[#allocation3_spill] sm:$0xff] }
 0x290   : > { %v2841_v6 = vpack.c.bf16 %v2596_v25, %v2596_v25  ;;  %v1252_v11 = vsel %vm373_vm1, %v1244_v63, %v1251_v37  ;;  %v7710_v24 = vadd.f32 %v7698_v61, %v7632_v50  ;;  %v3766_v48 = vunpack.c.l.b16 %v2843_v13  ;;  %v7721_v50 = vld [vmem:[%s9564_s3 + $0x10] sm:$0xff] }
 0x291   : > { %v3230_v46 = vpack.c.b16 %v3229_v1, %v3228_v29  ;;  %v2636_v58 = vsel %vm373_vm1, %v2632_v49, %v2635_v9  ;;  %v2633_v22 = vrot.slane %v2632_v49, 4  ;;  %v2820_v41 = vpack.c.bf16 %v1252_v11, %v1252_v11 }
 0x292   : > { %v2844_v45 = vpack.c.bf16 %v2636_v58, %v2636_v58  ;;  %v3250_v55 = vunpack.c.l.b16 %v2819_v59  ;;  %v3311_v0 = vsel %vm3310_vm3, %v7710_v24, -inf  ;;  %v3738_v12 = vunpack.c.l.b16 %v2841_v6 }
 0x293   : > { %5627 = vmatmul.msk.bf16.vlgmr.msra.gmra.mxu2 %vm2863_vm2, %v3230_v46  ;;  %v2634_v26 = vsel %vm373_vm1, %v2633_v22, %v2626_v36  ;;  %v3251_v52 = vunpack.c.l.b16 %v2820_v41  ;;  %3312 = vmax.xlane.f32.xlu2 %v3311_v0  ;;  %v7733_v15 = vadd.f32 %v7716_v21, %v2881_v33  ;;  %v7737_v60 = vadd.f32 %v7721_v50, %v7662_v28  ;;  %v3013_v23 = vpop.f32.mrf.mxu3  ;;  %v5793_v22 = vpop.permute.xlu1 %5792 }
 0x294   : > { %v3767_v42 = vunpack.c.l.b16 %v2844_v45  ;;  %v2842_v44 = vpack.c.bf16 %v2634_v26, %v2634_v26  ;;  %v7745_v31 = vadd.f32 %v7726_v4, %v2953_v53  ;;  %v7752_v33 = vadd.f32 %v7742_v43, %v2911_v16  ;;  %v7757_v19 = vpop.f32.mrf.mxu2 }
 0x295   : > { %v3314_v63 = vsel %vm3310_vm3, %v7733_v15, -inf  ;;  %v3252_v27 = vpack.c.b16 %v3251_v52, %v3250_v55  ;;  %v3317_v10 = vsel %vm3310_vm3, %v7737_v60, -inf  ;;  %v7767_v30 = vadd.f32 %v7762_v34, %v2931_v8  ;;  %v2955_v32 = vpop.f32.mrf.mxu1 }
 0x296   : > { %v3768_v38 = vpack.c.b16 %v3767_v42, %v3766_v48  ;;  %v3739_v5 = vunpack.c.l.b16 %v2842_v44  ;;  %3315 = vmax.xlane.f32.xlu0 %v3314_v63  ;;  %v3329_v39 = vsel %vm3310_vm3, %v7745_v31, -inf  ;;  %v3320_v47 = vsel %vm3310_vm3, %v7752_v33, -inf  ;;  %v5798_v48 = vpop.permute.xlu2 %5797 }
 0x297   : > { %3330 = vmax.xlane.f32.xlu1 %v3329_v39  ;;  %v7775_v36 = vadd.f32 %v7772_v7, %v2933_v3  ;;  %v3323_v62 = vsel %vm3310_vm3, %v7767_v30, -inf  ;;  %v7782_v56 = vadd.f32 %v7721_v50, %v3013_v23  ;;  %v7797_v18 = vadd.f32 %v7792_v20, %v2955_v32 }
 0x298   : > { %3780 = vmatpush.bf16.msra.mxu1 %v3768_v38  ;;  %v3740_v28 = vpack.c.b16 %v3739_v5, %v3738_v12  ;;  %v5795_v41 = vunpack.i.h.bf16 %v5793_v22  ;;  %v5794_v16 = vunpack.i.l.bf16 %v5793_v22  ;;  %v5800_v52 = vunpack.i.h.bf16 %v5798_v48 }
 0x299   : > { %5628 = vmatmul.msk.bf16.vlgmr.msra.gmra.mxu3 %vm2863_vm2, %v3252_v27  ;;  %v3326_v17 = vsel %vm3310_vm3, %v7775_v36, -inf  ;;  %v3341_v9 = vsel %vm3310_vm3, %v7782_v56, -inf  ;;  %v3332_v51 = vsel %vm3310_vm3, %v7797_v18, -inf  ;;  %v5799_v0 = vunpack.i.l.bf16 %v5798_v48 }
 0x29a   : > { %3752 = vmatpush.bf16.msrb.mxu0 %v3740_v28  ;;  %3802 = vmatpush.bf16.msra.mxu2 %v3740_v28  ;;  %v2329_v26 = vrot.slane %v5795_v41, 4  ;;  %v2277_v55 = vrot.slane %v5794_v16, 4  ;;  %v2334_v32 = vperm.slane %v5795_v41, %v6074_v54  ;;  %v2344_v41 = vperm.slane %v5800_v52, %v6074_v54 }
 0x29b   : > { %3824 = vmatpush.bf16.msra.mxu3 %v3768_v38  ;;  %3318 = vmax.xlane.f32.xlu2 %v3317_v10  ;;  %v3015_v14 = vpop.f32.mrf.mxu3  ;;  %v2339_v38 = vrot.slane %v5800_v52, 4  ;;  %v2287_v5 = vrot.slane %v5799_v0, 4 }
 0x29c   : > { %v2985_v35 = vpop.f32.mrf.mxu2  ;;  %v7802_v13 = vadd.f32 %v7742_v43, %v3015_v14  ;;  %v2330_v44 = vsel %vm373_vm1, 0.0, %v2329_v26  ;;  %v2278_v12 = vsel %vm373_vm1, 0.0, %v2277_v55 }
 0x29d   : > { %v7785_v40 = vadd.f32 %v7716_v21, %v2985_v35  ;;  %v2338_v27 = vperm.slane %v2330_v44, %v6074_v54  ;;  %v2286_v39 = vperm.slane %v2278_v12, %v6074_v54  ;;  %v2340_v10 = vsel %vm373_vm1, 0.0, %v2339_v38 }
 0x29e   : > { %3321 = vmax.xlane.f32.xlu0 %v3320_v47  ;;  %v3344_v1 = vsel %vm3310_vm3, %v7802_v13, -inf  ;;  %v2288_v3 = vsel %vm373_vm1, 0.0, %v2287_v5  ;;  %v2282_v35 = vperm.slane %v5794_v16, %v6074_v54 }
 0x29f   : > { %v3338_v29 = vsel %vm3310_vm3, %v7785_v40, -inf  ;;  %v2311_v23 = vrot.slane %v2286_v39, 4 }
 0x2a3   : > { %3324 = vmax.xlane.f32.xlu2 %v3323_v62  ;;  %v2363_v62 = vrot.slane %v2338_v27, 4 }
 0x2a6   : > { %3327 = vmax.xlane.f32.xlu0 %v3326_v17  ;;  %v2348_v17 = vperm.slane %v2340_v10, %v6074_v54  ;;  %v2349_v10 = vrot.slane %v2344_v41, 4 }
 0x2a8   : > { %v2361_v16 = vrot.slane %v2348_v17, 4 }
 0x2aa   : > { %v2362_v44 = vsel %vm373_vm1, %v2361_v16, %v2338_v27 }
 0x2ab   : > { %3342 = vmax.xlane.f32.xlu2 %v3341_v9  ;;  %v2296_v9 = vperm.slane %v2288_v3, %v6074_v54 }
 0x2ae   : > { %3339 = vmax.xlane.f32.xlu0 %v3338_v29 }
 0x2b0   : > { %5807 = vrot.lane.b32.xlu1 %v9735_v2, %s5952_s6 }
 0x2b2   : > { %v3035_v37 = vpop.f32.mrf.mxu1 }
 0x2b3   : > { %3333 = vmax.xlane.f32.xlu2 %v3332_v51  ;;  %v7809_v49 = vadd.f32 %v7762_v34, %v3035_v37  ;;  %v2312_v51 = vsel %vm373_vm1, %v2296_v9, %v2311_v23  ;;  %v2364_v37 = vsel %vm373_vm1, %v2348_v17, %v2363_v62 }
 0x2b4   : > { %v2372_v22 = vperm.slane %v2364_v37, %v6218_v57 }
 0x2b5   : > { %v3347_v25 = vsel %vm3310_vm3, %v7809_v49, -inf }
 0x2b6   : > { %3345 = vmax.xlane.f32.xlu0 %v3344_v1  ;;  %v2299_v1 = vrot.slane %v2282_v35, 4  ;;  %v2379_v12 = vrot.slane %v2372_v22, 4 }
 0x2b8   : > { %v3057_v59 = vpop.f32.mrf.mxu2  ;;  %v2380_v62 = vsel %vm373_vm1, 0.0, %v2379_v12 }
 0x2b9   : > { %v7814_v6 = vadd.f32 %v7726_v4, %v3057_v59  ;;  %v2351_v59 = vrot.slane %v2334_v32, 4 }
 0x2ba   : > { %v3037_v8 = vpop.f32.mrf.mxu1 }
 0x2bb   : > { %3348 = vmax.xlane.f32.xlu2 %v3347_v25  ;;  %v3353_v11 = vsel %vm3310_vm3, %v7814_v6, -inf  ;;  %v7819_v46 = vadd.f32 %v7772_v7, %v3037_v8  ;;  %v2309_v8 = vrot.slane %v2296_v9, 4  ;;  %v2352_v55 = vsel %vm373_vm1, %v2344_v41, %v2351_v59 }
 0x2bc   : > { %v2360_v52 = vperm.slane %v2352_v55, %v6218_v57  ;;  %v2350_v9 = vsel %vm373_vm1, %v2349_v10, %v2334_v32 }
 0x2bd   : > { %v3350_v58 = vsel %vm3310_vm3, %v7819_v46, -inf  ;;  %v2356_v59 = vperm.slane %v2350_v9, %v6218_v57 }
 0x2be   : > { %3354 = vmax.xlane.f32.xlu0 %v3353_v11  ;;  %v2292_v11 = vperm.slane %v5799_v0, %v6074_v54 }
 0x2c0   : > { %v3059_v53 = vpop.f32.mrf.mxu2  ;;  %v2300_v48 = vsel %vm373_vm1, %v2292_v11, %v2299_v1  ;;  %v2297_v27 = vrot.slane %v2292_v11, 4  ;;  %v2691_v1 = vrot.slane %v2380_v62, 4 }
 0x2c1   : > { %v7824_v42 = vadd.f32 %v7792_v20, %v3059_v53  ;;  %v2310_v53 = vsel %vm373_vm1, %v2309_v8, %v2286_v39  ;;  %v2308_v5 = vperm.slane %v2300_v48, %v6218_v57  ;;  %v7867_v39 = vadd.f32 %v7698_v61, %v7757_v19 }
 0x2c2   : > { %v2298_v23 = vsel %vm373_vm1, %v2297_v27, %v2282_v35 }
 0x2c3   : > { %v3356_v63 = vsel %vm3310_vm3, %v7824_v42, -inf  ;;  %v2323_v17 = vrot.slane %v2308_v5, 4  ;;  %v3335_v19 = vsel %vm3310_vm3, %v7867_v39, -inf  ;;  %v2373_v5 = vrot.slane %v2356_v59, 4 }
 0x2c5   : > { %v2324_v8 = vsel %vm373_vm1, 0.0, %v2323_v17 }
 0x2c6   : > { %3351 = vmax.xlane.f32.xlu0 %v3350_v58  ;;  %v2320_v58 = vperm.slane %v2312_v51, %v6218_v57 }
 0x2c8   : > { %v2327_v0 = vrot.slane %v2320_v58, 4 }
 0x2ca   : > { %v2328_v3 = vsel %vm373_vm1, 0.0, %v2327_v0 }
 0x2cb   : > { %v2653_v37 = vrot.slane %v2328_v3, 4 }
 0x2ce   : > { %3357 = vmax.xlane.f32.xlu0 %v3356_v63  ;;  %v2316_v63 = vperm.slane %v2310_v53, %v6218_v57 }
 0x2da   : > { %v3117_v45 = vpop.f32.mrf.mxu1  ;;  %3336 = vmax.xlane.f32.xlu1 %v3335_v19 }
 0x2db   : > { %v7857_v26 = vadd.f32 %v7721_v50, %v3117_v45 }
 0x2dd   : > { %v3365_v45 = vsel %vm3310_vm3, %v7857_v26, -inf }
 0x2e2   : > { %v3119_v28 = vpop.f32.mrf.mxu1 }
 0x2e3   : > { %v7835_v47 = vadd.f32 %v7742_v43, %v3119_v28  ;;  %v2368_v28 = vperm.slane %v2362_v44, %v6218_v57 }
 0x2e5   : > { %v3368_v2 = vsel %vm3310_vm3, %v7835_v47, -inf  ;;  %v2377_v51 = vrot.slane %v2368_v28, 4 }
 0x2e6   : > { %3369 = vmax.xlane.f32.xlu0 %v3368_v2  ;;  %v2375_v2 = vrot.slane %v2360_v52, 4  ;;  %v2642_v52 = vrot.slane %v2324_v8, 4 }
 0x2e7   : > { %v2378_v41 = vsel %vm373_vm1, 0.0, %v2377_v51  ;;  %v2648_v51 = vsel %vm373_vm1, %v2327_v0, %v2316_v63 }
 0x2e8   : > { %v2376_v22 = vsel %vm373_vm1, 0.0, %v2375_v2  ;;  %v2692_v53 = vsel %vm373_vm1, %v2691_v1, %v2378_v41  ;;  %v2652_v0 = vperm.slane %v2648_v51, %v6074_v54 }
 0x2e9   : > { %v2696_v27 = vperm.slane %v2692_v53, %v6074_v54 }
 0x2ee   : > { %v3087_v29 = vpop.f32.mrf.mxu3 }
 0x2ef   : > { %v7842_v14 = vadd.f32 %v7698_v61, %v3087_v29  ;;  %v2325_v29 = vrot.slane %v2316_v63, 4 }
 0x2f1   : > { %v3359_v25 = vsel %vm3310_vm3, %v7842_v14, -inf  ;;  %v2326_v32 = vsel %vm373_vm1, 0.0, %v2325_v29 }
 0x2f2   : > { %3360 = vmax.xlane.f32.xlu2 %v3359_v25  ;;  %v2304_v25 = vperm.slane %v2298_v23, %v6218_v57  ;;  %v2654_v48 = vsel %vm373_vm1, %v2653_v37, %v2326_v32  ;;  %v2374_v23 = vsel %vm373_vm1, 0.0, %v2373_v5  ;;  %v2686_v37 = vsel %vm373_vm1, %v2379_v12, %v2368_v28 }
 0x2f3   : > { %v2658_v10 = vperm.slane %v2654_v48, %v6074_v54  ;;  %v2690_v12 = vperm.slane %v2686_v37, %v6074_v54 }
 0x2f4   : > { %v2321_v44 = vrot.slane %v2304_v25, 4  ;;  %v2637_v28 = vsel %vm373_vm1, %v2323_v17, %v2304_v25 }
 0x2f5   : > { %v2665_v1 = vrot.slane %v2658_v10, 4  ;;  %v2641_v17 = vperm.slane %v2637_v28, %v6074_v54 }
 0x2f6   : > { %v3089_v35 = vpop.f32.mrf.mxu3  ;;  %v2322_v62 = vsel %vm373_vm1, 0.0, %v2321_v44  ;;  %v2675_v44 = vsel %vm373_vm1, %v2375_v2, %v2356_v59 }
 0x2f7   : > { %v2643_v29 = vsel %vm373_vm1, %v2642_v52, %v2322_v62  ;;  %v7907_v8 = vadd.f32 %v7716_v21, %v3089_v35  ;;  %v2666_v53 = vsel %vm373_vm1, %v2665_v1, %v2652_v0 }
 0x2f8   : > { %v3139_v38 = vpop.f32.mrf.mxu2  ;;  %v2647_v41 = vperm.slane %v2643_v29, %v6074_v54 }
 0x2f9   : > { %v7887_v16 = vadd.f32 %v7762_v34, %v3139_v38  ;;  %v3362_v48 = vsel %vm3310_vm3, %v7907_v8, -inf }
 0x2fa   : > { %3366 = vmax.xlane.f32.xlu2 %v3365_v45  ;;  %v2680_v45 = vrot.slane %v2376_v22, 4  ;;  %v7911_v22 = vpop.permute.xlu0 %5802  ;;  %v2659_v52 = vrot.slane %v2647_v41, 4 }
 0x2fb   : > { %v3371_v38 = vsel %vm3310_vm3, %v7887_v16, -inf }
 0x2fc   : > { %3372 = vmax.xlane.f32.xlu1 %v3371_v38  ;;  %v2681_v19 = vsel %vm373_vm1, %v2680_v45, %v2374_v23 }
 0x2fd   : > { %v2685_v63 = vperm.slane %v2681_v19, %v6074_v54  ;;  %v2660_v19 = vsel %vm373_vm1, %v2659_v52, %v2641_v17 }
 0x2ff   : > { %v2697_v45 = vrot.slane %v2685_v63, 4 }
 0x300   : > { %v3141_v11 = vpop.f32.mrf.mxu2 }
 0x301   : > { %v7881_v58 = vadd.f32 %v7772_v7, %v3141_v11  ;;  %v2703_v11 = vrot.slane %v2696_v27, 4  ;;  %v2670_v27 = vperm.slane %v2666_v53, %v6218_v57 }
 0x303   : > { %v3374_v55 = vsel %vm3310_vm3, %v7881_v58, -inf }
 0x304   : > { %3375 = vmax.xlane.f32.xlu0 %v3374_v55  ;;  %v2704_v55 = vsel %vm373_vm1, %v2703_v11, %v2690_v12  ;;  %3363 = vmax.xlane.f32.xlu1 %v3362_v48  ;;  %v2671_v11 = vrot.slane %v2670_v27, 4 }
 0x305   : > { %v2708_v38 = vperm.slane %v2704_v55, %v6218_v57 }
 0x306   : > { %v3313_v25 = vpop.xlane.xlu2 %3312 }
 0x307   : > { %v3407_v59 = vsub.f32 %v7710_v24, %v3313_v25  ;;  %v2664_v24 = vperm.slane %v2660_v19, %v6218_v57 }
 0x308   : > { %v3191_v3 = vpop.f32.mrf.mxu0 }
 0x309   : > { %v7900_v9 = vadd.f32 %v7698_v61, %v3191_v3  ;;  %v2679_v3 = vperm.slane %v2675_v44, %v6074_v54  ;;  %v3439_v29 = vmul.f32 1.442695, %v3407_v59  ;;  %v2673_v44 = vrot.slane %v2664_v24, 4 }
 0x30b   : > { %v3383_v32 = vsel %vm3310_vm3, %v7900_v9, -inf  ;;  %v2698_v37 = vsel %vm373_vm1, %v2697_v45, %v2679_v3  ;;  %5812 = vpow2.f32 %v3439_v29  ;;  %v3221_v29 = vpop.f32.mrf.mxu1 }
 0x30c   : > { %v3161_v61 = vpop.f32.mrf.mxu3  ;;  %3384 = vmax.xlane.f32.xlu2 %v3383_v32  ;;  %v2709_v32 = vrot.slane %v2708_v38, 4  ;;  %v2702_v0 = vperm.slane %v2698_v37, %v6218_v57 }
 0x30d   : > { %v7919_v35 = vadd.f32 %v7726_v4, %v3161_v61 }
 0x30e   : > { %v3319_v63 = vpop.xlane.xlu2 %3318  ;;  %v2710_v12 = vsel %vm373_vm1, %v2709_v32, %v2702_v0 }
 0x30f   : > { %v3377_v62 = vsel %vm3310_vm3, %v7919_v35, -inf  ;;  %v3409_v48 = vsub.f32 %v7737_v60, %v3319_v63  ;;  %v2846_v3 = vpack.c.bf16 %v2710_v12, %v2710_v12 }
 0x310   : > { %v3193_v5 = vpop.f32.mrf.mxu0 }
 0x311   : > { %v7927_v10 = vadd.f32 %v7716_v21, %v3193_v5  ;;  %v3316_v21 = vpop.xlane.xlu0 %3315  ;;  %v2711_v5 = vrot.slane %v2702_v0, 4  ;;  %v7951_v52 = vpop.eup %5812  ;;  %v3443_v45 = vmul.f32 1.442695, %v3409_v48 }
 0x312   : > { %v3408_v51 = vsub.f32 %v7733_v15, %v3316_v21  ;;  %v2672_v15 = vsel %vm373_vm1, %v2671_v11, %v2664_v24 }
 0x313   : > { %v3386_v2 = vsel %vm3310_vm3, %v7927_v10, -inf  ;;  %v2845_v25 = vpack.c.bf16 %v2672_v15, %v2672_v15  ;;  %v2712_v19 = vsel %vm373_vm1, %v2708_v38, %v2711_v5 }
 0x314   : > { %v3163_v23 = vpop.f32.mrf.mxu3  ;;  %3378 = vmax.xlane.f32.xlu2 %v3377_v62  ;;  %3387 = vmax.xlane.f32.xlu0 %v3386_v2  ;;  %v3441_v41 = vmul.f32 1.442695, %v3408_v51  ;;  %v3599_v2 = vpack.c.bf16 %v7951_v52, %v7951_v52  ;;  %v2674_v51 = vsel %vm373_vm1, %v2670_v27, %v2673_v44  ;;  %v2848_v15 = vpack.c.bf16 %v2712_v19, %v2712_v19 }
 0x315   : > { %v7942_v61 = vadd.f32 %v7792_v20, %v3163_v23  ;;  %v3838_v11 = vunpack.c.l.b16 %v2845_v25  ;;  %v2847_v38 = vpack.c.bf16 %v2674_v51, %v2674_v51 }
 0x316   : > { %v3243_v1 = vpop.f32.mrf.mxu2  ;;  %5814 = vpow2.f32 %v3441_v41  ;;  %v3325_v32 = vpop.xlane.xlu2 %3324 }
 0x317   : > { %v3380_v28 = vsel %vm3310_vm3, %v7942_v61, -inf  ;;  %v7959_v60 = vadd.f32 %v7762_v34, %v3243_v1  ;;  %5816 = vpow2.f32 %v3443_v45  ;;  %v3839_v34 = vunpack.c.l.b16 %v2846_v3  ;;  %v3331_v45 = vpop.xlane.xlu1 %3330 }
 0x318   : > { %v3633_v1 = vunpack.c.l.b16 %v3599_v2  ;;  %v3411_v24 = vsub.f32 %v7767_v30, %v3325_v32  ;;  %v3866_v3 = vunpack.c.l.b16 %v2847_v38  ;;  %v3413_v2 = vsub.f32 %v7745_v31, %v3331_v45 }
 0x319   : > { %v3322_v55 = vpop.xlane.xlu0 %3321  ;;  %v3395_v41 = vsel %vm3310_vm3, %v7959_v60, -inf  ;;  %v7977_v44 = vpack.c.b16 %v3839_v34, %v3838_v11  ;;  %v8009_v38 = vadd.f32 %v7721_v50, %v3221_v29 }
 0x31a   : > { %v3410_v17 = vsub.f32 %v7752_v33, %v3322_v55  ;;  %v3447_v48 = vmul.f32 1.442695, %v3411_v24  ;;  %v3451_v31 = vmul.f32 1.442695, %v3413_v2 }
 0x31b   : > { %v3389_v29 = vsel %vm3310_vm3, %v8009_v38, -inf }
 0x31c   : > { %v3265_v53 = vpop.f32.mrf.mxu3  ;;  %3381 = vmax.xlane.f32.xlu2 %v3380_v28  ;;  %v7956_v59 = vpop.eup %5814  ;;  %v3445_v21 = vmul.f32 1.442695, %v3410_v17 }
 0x31d   : > { %v3600_v33 = vpack.c.bf16 %v7956_v59, %v7956_v59  ;;  %v5817_v12 = vpop.eup %5816  ;;  %v7984_v25 = vadd.f32 %v7726_v4, %v3265_v53 }
 0x31e   : > { %v3245_v62 = vpop.f32.mrf.mxu2  ;;  %5818 = vpow2.f32 %v3445_v21  ;;  %v3601_v5 = vpack.c.bf16 %v5817_v12, %v5817_v12  ;;  %v3509_v17 = vsel %vm3310_vm3, %v5817_v12, 0.0  ;;  %v3867_v21 = vunpack.c.l.b16 %v2848_v15  ;;  %v3343_v51 = vpop.xlane.xlu2 %3342 }
 0x31f   : > { %v7962_v23 = vadd.f32 %v7772_v7, %v3245_v62  ;;  %v3634_v7 = vunpack.c.l.b16 %v3600_v33  ;;  %5820 = vpow2.f32 %v3447_v48  ;;  %3510 = vadd.xlane.f32.xlu1 %v3509_v17  ;;  %v3223_v33 = vpop.f32.mrf.mxu1  ;;  %v3401_v19 = vsel %vm3310_vm3, %v7984_v25, -inf }
 0x320   : > { %v3661_v4 = vunpack.c.l.b16 %v3601_v5  ;;  %v3417_v32 = vsub.f32 %v7782_v56, %v3343_v51  ;;  %v3503_v51 = vsel %vm3310_vm3, %v7951_v52, 0.0 }
 0x321   : > { %v3398_v37 = vsel %vm3310_vm3, %v7962_v23, -inf  ;;  %v3635_v27 = vpack.c.b16 %v3634_v7, %v3633_v1  ;;  %v3328_v63 = vpop.xlane.xlu0 %3327  ;;  %v7998_v7 = vadd.f32 %v7742_v43, %v3223_v33  ;;  %v3506_v33 = vsel %vm3310_vm3, %v7956_v59, 0.0 }
 0x322   : > { %3399 = vmax.xlane.f32.xlu0 %v3398_v37  ;;  %v3412_v55 = vsub.f32 %v7775_v36, %v3328_v63  ;;  %v5805_v37 = vunpack.i.h.bf16 %v7911_v22  ;;  %v5804_v63 = vunpack.i.l.bf16 %v7911_v22  ;;  %v5808_v43 = vpop.permute.xlu1 %5807  ;;  %v3459_v48 = vmul.f32 1.442695, %v3417_v32 }
 0x323   : > { %5629 = vmatmul.msk.bf16.vlgmr.msra.gmra.mxu0 %vm3310_vm3, %v3635_v27  ;;  %v3392_v12 = vsel %vm3310_vm3, %v7998_v7, -inf  ;;  %v5810_v45 = vunpack.i.h.bf16 %v5808_v43 }
 0x324   : > { %v3267_v0 = vpop.f32.mrf.mxu3  ;;  %3396 = vmax.xlane.f32.xlu2 %v3395_v41  ;;  %v7981_v30 = vpop.eup %5818  ;;  %3852 = vmatpush.bf16.msra.mxu0 %v7977_v44  ;;  %v8001_v41 = vpack.c.b16 %v3867_v21, %v3866_v3  ;;  %v2433_v15 = vrot.slane %v5805_v37, 4  ;;  %v2381_v50 = vrot.slane %v5804_v63, 4  ;;  %v5809_v21 = vunpack.i.l.bf16 %v5808_v43 }
 0x325   : > { %v7974_v28 = vadd.f32 %v7792_v20, %v3267_v0  ;;  %v3449_v20 = vmul.f32 1.442695, %v3412_v55  ;;  %v3602_v36 = vpack.c.bf16 %v7981_v30, %v7981_v30  ;;  %v5821_v1 = vpop.eup %5820  ;;  %v2386_v59 = vperm.slane %v5804_v63, %v6074_v54 }
 0x326   : > { %v3603_v24 = vpack.c.bf16 %v5821_v1, %v5821_v1  ;;  %v3515_v0 = vsel %vm3310_vm3, %v5821_v1, 0.0  ;;  %v3334_v22 = vpop.xlane.xlu2 %3333  ;;  %v3512_v1 = vsel %vm3310_vm3, %v7981_v30, 0.0  ;;  %v2391_v32 = vrot.slane %v5809_v21, 4 }
 0x327   : > { %v3404_v62 = vsel %vm3310_vm3, %v7974_v28, -inf  ;;  %5822 = vpow2.f32 %v3449_v20  ;;  %v3662_v53 = vunpack.c.l.b16 %v3602_v36  ;;  %3516 = vadd.xlane.f32.xlu1 %v3515_v0  ;;  %v3414_v17 = vsub.f32 %v7797_v18, %v3334_v22 }
 0x328   : > { %5824 = vpow2.f32 %v3451_v31  ;;  %v3689_v55 = vunpack.c.l.b16 %v3603_v24  ;;  %v2434_v20 = vsel %vm373_vm1, 0.0, %v2433_v15  ;;  %v2382_v18 = vsel %vm373_vm1, 0.0, %v2381_v50 }
 0x329   : > { %v3663_v11 = vpack.c.b16 %v3662_v53, %v3661_v4  ;;  %v7995_v34 = vpop.xlane.xlu0 %3339  ;;  %5826 = vpow2.f32 %v3459_v48  ;;  %v2443_v4 = vrot.slane %v5810_v45, 4  ;;  %v2448_v31 = vperm.slane %v5810_v45, %v6074_v54 }
 0x32a   : > { %3405 = vmax.xlane.f32.xlu0 %v3404_v62  ;;  %v3453_v62 = vmul.f32 1.442695, %v3414_v17  ;;  %v8037_v52 = vperm.slane %v2382_v18, %v6074_v54  ;;  %v2396_v63 = vperm.slane %v5809_v21, %v6074_v54  ;;  %v2403_v30 = vrot.slane %v2386_v59, 4 }
 0x32b   : > { %5630 = vmatmul.msk.bf16.vlgmr.msrb.gmra.mxu1 %vm3310_vm3, %v3663_v11  ;;  %v2442_v11 = vperm.slane %v2434_v20, %v6074_v54 }
 0x32c   : > { %3402 = vmax.xlane.f32.xlu2 %v3401_v19  ;;  %3880 = vmatpush.bf16.msrb.mxu1 %v8001_v41  ;;  %5828 = vpow2.f32 %v3453_v62  ;;  %v2415_v45 = vrot.slane %v8037_v52, 4 }
 0x32d   : > { %v8005_v27 = vpop.eup %5822  ;;  %v2467_v15 = vrot.slane %v2442_v11, 4 }
 0x32e   : > { %v3604_v56 = vpack.c.bf16 %v8005_v27, %v8005_v27  ;;  %v8024_v53 = vpop.eup %5824  ;;  %v3349_v24 = vpop.xlane.xlu2 %3348  ;;  %v3518_v18 = vsel %vm3310_vm3, %v8005_v27, 0.0 }
 0x32f   : > { %3507 = vadd.xlane.f32.xlu1 %v3506_v33  ;;  %v5827_v0 = vpop.eup %5826  ;;  %v3419_v22 = vsub.f32 %v7809_v49, %v3349_v24 }
 0x330   : > { %v3690_v5 = vunpack.c.l.b16 %v3604_v56 }
 0x331   : > { %v3346_v3 = vpop.xlane.xlu0 %3345 }
 0x332   : > { %3393 = vmax.xlane.f32.xlu0 %v3392_v12  ;;  %v3691_v36 = vpack.c.b16 %v3690_v5, %v3689_v55  ;;  %v3418_v2 = vsub.f32 %v7802_v13, %v3346_v3  ;;  %v2438_v13 = vperm.slane %v5805_v37, %v6074_v54  ;;  %v2444_v37 = vsel %vm373_vm1, 0.0, %v2443_v4  ;;  %v5829_v12 = vpop.eup %5828 }
 0x333   : > { %v2452_v48 = vperm.slane %v2444_v37, %v6074_v54  ;;  %v2453_v55 = vrot.slane %v2448_v31, 4  ;;  %v2392_v5 = vsel %vm373_vm1, 0.0, %v2391_v32  ;;  %v3606_v17 = vpack.c.bf16 %v5829_v12, %v5829_v12 }
 0x334   : > { %3390 = vmax.xlane.f32.xlu2 %v3389_v29  ;;  %5631 = vmatmul.msk.bf16.vlgmr.msrb.gmra.mxu2 %vm3310_vm3, %v3691_v36  ;;  %v3461_v19 = vmul.f32 1.442695, %v3418_v2  ;;  %v2455_v43 = vrot.slane %v2438_v13, 4  ;;  %v3609_v29 = vpack.c.bf16 %v5827_v0, %v5827_v0  ;;  %v3416_v36 = vsub.f32 %v7785_v40, %v7995_v34 }
 0x335   : > { %3902 = vmatpush.bf16.msrb.mxu2 %v7977_v44  ;;  %v3605_v44 = vpack.c.bf16 %v8024_v53, %v8024_v53  ;;  %v3533_v3 = vsel %vm3310_vm3, %v5827_v0, 0.0  ;;  %v2401_v2 = vrot.slane %v2396_v63, 4  ;;  %v3712_v21 = vunpack.c.l.b16 %v3606_v17 }
 0x336   : > { %5830 = vpow2.f32 %v3461_v19  ;;  %v2456_v62 = vsel %vm373_vm1, %v2448_v31, %v2455_v43  ;;  %v2400_v49 = vperm.slane %v2392_v5, %v6074_v54  ;;  %v2404_v4 = vsel %vm373_vm1, %v2396_v63, %v2403_v30 }
 0x337   : > { %v3711_v50 = vunpack.c.l.b16 %v3605_v44  ;;  %v2465_v19 = vrot.slane %v2452_v48, 4  ;;  %v3463_v40 = vmul.f32 1.442695, %v3419_v22  ;;  %v3761_v34 = vunpack.c.l.b16 %v3609_v29 }
 0x338   : > { %v2464_v32 = vperm.slane %v2456_v62, %v6218_v57  ;;  %v2468_v44 = vsel %vm373_vm1, %v2452_v48, %v2467_v15  ;;  %v2402_v37 = vsel %vm373_vm1, %v2401_v2, %v2386_v59  ;;  %v2412_v24 = vperm.slane %v2404_v4, %v6218_v57 }
 0x339   : > { %v3355_v56 = vpop.xlane.xlu0 %3354  ;;  %v2416_v63 = vsel %vm373_vm1, %v2400_v49, %v2415_v45  ;;  %v3457_v30 = vmul.f32 1.442695, %v3416_v36  ;;  %5832 = vpow2.f32 %v3463_v40  ;;  %v2476_v15 = vperm.slane %v2468_v44, %v6218_v57 }
 0x33a   : > { %3504 = vadd.xlane.f32.xlu0 %v3503_v51  ;;  %v2454_v51 = vsel %vm373_vm1, %v2453_v55, %v2438_v13  ;;  %v2413_v13 = vrot.slane %v2400_v49, 4  ;;  %v2466_v55 = vsel %vm373_vm1, %v2465_v19, %v2442_v11  ;;  %v2479_v48 = vrot.slane %v2464_v32, 4 }
 0x33b   : > { %v8065_v27 = vperm.slane %v2454_v51, %v6218_v57  ;;  %v2408_v5 = vperm.slane %v2402_v37, %v6218_v57  ;;  %v3421_v22 = vsub.f32 %v7814_v6, %v3355_v56  ;;  %v2424_v45 = vperm.slane %v2416_v63, %v6218_v57 }
 0x33c   : > { %3513 = vadd.xlane.f32.xlu2 %v3512_v1  ;;  %v8047_v20 = vpop.eup %5830  ;;  %v3713_v1 = vpack.c.b16 %v3712_v21, %v3711_v50  ;;  %v2427_v50 = vrot.slane %v2412_v24, 4  ;;  %v3524_v29 = vsel %vm3310_vm3, %v5829_v12, 0.0  ;;  %v3521_v36 = vsel %vm3310_vm3, %v8024_v53, 0.0 }
 0x33d   : > { %v3610_v33 = vpack.c.bf16 %v8047_v20, %v8047_v20  ;;  %v2477_v17 = vrot.slane %v8065_v27, 4  ;;  %v2480_v6 = vsel %vm373_vm1, 0.0, %v2479_v48  ;;  %v2483_v56 = vrot.slane %v2476_v15, 4 }
 0x33e   : > { %5632 = vmatmul.msk.bf16.vlgmr.msrb.gmra.mxu3 %vm3310_vm3, %v3713_v1  ;;  %v2425_v2 = vrot.slane %v2408_v5, 4  ;;  %v2431_v21 = vrot.slane %v2424_v45, 4  ;;  %v2756_v4 = vrot.slane %v2480_v6, 4 }
 0x33f   : > { %v3762_v31 = vunpack.c.l.b16 %v3610_v33  ;;  %3924 = vmatpush.bf16.msrb.mxu3 %v8001_v41  ;;  %v2414_v41 = vsel %vm373_vm1, %v2413_v13, %v8037_v52  ;;  %v5833_v62 = vpop.eup %5832  ;;  %v2428_v52 = vsel %vm373_vm1, 0.0, %v2427_v50  ;;  %v2478_v33 = vsel %vm373_vm1, 0.0, %v2477_v17 }
 0x340   : > { %v2420_v12 = vperm.slane %v2414_v41, %v6218_v57  ;;  %v2484_v53 = vsel %vm373_vm1, 0.0, %v2483_v56  ;;  %v3611_v51 = vpack.c.bf16 %v5833_v62, %v5833_v62  ;;  %v2426_v40 = vsel %vm373_vm1, 0.0, %v2425_v2 }
 0x341   : > { %v3763_v0 = vpack.c.b16 %v3762_v31, %v3761_v34  ;;  %v3352_v43 = vpop.xlane.xlu0 %3351  ;;  %v2432_v1 = vsel %vm373_vm1, 0.0, %v2431_v21  ;;  %v3539_v31 = vsel %vm3310_vm3, %v5833_v62, 0.0  ;;  %v2757_v37 = vsel %vm373_vm1, %v2756_v4, %v2478_v33 }
 0x342   : > { %3534 = vadd.xlane.f32.xlu0 %v3533_v3  ;;  %v3420_v59 = vsub.f32 %v7819_v46, %v3352_v43  ;;  %v2472_v46 = vperm.slane %v2466_v55, %v6218_v57  ;;  %v3467_v3 = vmul.f32 1.442695, %v3421_v22  ;;  %v2429_v34 = vrot.slane %v2420_v12, 4 }
 0x343   : > { %5634 = vmatmul.msk.bf16.vlgmr.msra.gmra.mxu1 %vm3310_vm3, %v3763_v0  ;;  %v2767_v24 = vrot.slane %v2484_v53, 4  ;;  %v2729_v13 = vrot.slane %v2432_v1, 4  ;;  %v3789_v63 = vunpack.c.l.b16 %v3611_v51  ;;  %v2761_v22 = vperm.slane %v2757_v37, %v6074_v54 }
 0x344   : > { %3519 = vadd.xlane.f32.xlu2 %v3518_v18  ;;  %v3465_v11 = vmul.f32 1.442695, %v3420_v59  ;;  %v2481_v49 = vrot.slane %v2472_v46, 4  ;;  %v2718_v18 = vrot.slane %v2428_v52, 4  ;;  %v2430_v55 = vsel %vm373_vm1, 0.0, %v2429_v34 }
 0x345   : > { %v2730_v41 = vsel %vm373_vm1, %v2729_v13, %v2430_v55  ;;  %v2762_v6 = vsel %vm373_vm1, %v2483_v56, %v2472_v46  ;;  %v2713_v62 = vsel %vm373_vm1, %v2427_v50, %v2408_v5  ;;  %v2724_v52 = vsel %vm373_vm1, %v2431_v21, %v2420_v12 }
 0x346   : > { %5834 = vpow2.f32 %v3465_v11  ;;  %v2719_v0 = vsel %vm373_vm1, %v2718_v18, %v2426_v40  ;;  %v2734_v33 = vperm.slane %v2730_v41, %v6074_v54  ;;  %v2717_v53 = vperm.slane %v2713_v62, %v6074_v54 }
 0x347   : > { %5836 = vpow2.f32 %v3457_v30  ;;  %v2482_v30 = vsel %vm373_vm1, 0.0, %v2481_v49  ;;  %v2766_v18 = vperm.slane %v2762_v6, %v6074_v54 }
 0x348   : > { %5838 = vpow2.f32 %v3467_v3  ;;  %v2768_v11 = vsel %vm373_vm1, %v2767_v24, %v2482_v30  ;;  %v2773_v3 = vrot.slane %v2761_v22, 4  ;;  %v2741_v5 = vrot.slane %v2734_v33, 4 }
 0x349   : > { %v2772_v2 = vperm.slane %v2768_v11, %v6074_v54 }
 0x34a   : > { %3525 = vadd.xlane.f32.xlu0 %v3524_v29  ;;  %v2723_v29 = vperm.slane %v2719_v0, %v6074_v54 }
 0x34b   : > { %v2779_v56 = vrot.slane %v2772_v2, 4 }
 0x34c   : > { %3522 = vadd.xlane.f32.xlu2 %v3521_v36  ;;  %v8089_v19 = vpop.eup %5834  ;;  %v2751_v36 = vsel %vm373_vm1, %v2479_v48, %v8065_v27  ;;  %v2735_v49 = vrot.slane %v2723_v29, 4  ;;  %v2728_v27 = vperm.slane %v2724_v52, %v6074_v54  ;;  %v3358_v48 = vpop.xlane.xlu0 %3357 }
 0x34d   : > { %v8094_v32 = vpop.eup %5836  ;;  %v3612_v44 = vpack.c.bf16 %v8089_v19, %v8089_v19  ;;  %v2755_v4 = vperm.slane %v2751_v36, %v6074_v54  ;;  %v3422_v12 = vsub.f32 %v7824_v42, %v3358_v48  ;;  %v2780_v34 = vsel %vm373_vm1, %v2779_v56, %v2766_v18  ;;  %v3337_v56 = vpop.xlane.xlu1 %3336 }
 0x34e   : > { %v3530_v59 = vsel %vm3310_vm3, %v8094_v32, 0.0  ;;  %v8104_v15 = vpop.eup %5838  ;;  %v2736_v46 = vsel %vm373_vm1, %v2735_v49, %v2717_v53  ;;  %v2742_v40 = vsel %vm373_vm1, %v2741_v5, %v2728_v27  ;;  %v2784_v37 = vperm.slane %v2780_v34, %v6218_v57 }
 0x34f   : > { %v3790_v43 = vunpack.c.l.b16 %v3612_v44  ;;  %v3545_v17 = vsel %vm3310_vm3, %v8104_v15, 0.0  ;;  %v2774_v50 = vsel %vm373_vm1, %v2773_v3, %v2755_v4  ;;  %v2740_v21 = vperm.slane %v2736_v46, %v6218_v57 }
 0x350   : > { %v2778_v51 = vperm.slane %v2774_v50, %v6218_v57  ;;  %v3469_v1 = vmul.f32 1.442695, %v3422_v12  ;;  %v2785_v42 = vrot.slane %v2784_v37, 4  ;;  %v3613_v36 = vpack.c.bf16 %v8104_v15, %v8104_v15 }
 0x351   : > { %v3791_v45 = vpack.c.b16 %v3790_v43, %v3789_v63  ;;  %v2749_v44 = vrot.slane %v2740_v21, 4 }
 0x352   : > { %3540 = vadd.xlane.f32.xlu0 %v3539_v31  ;;  %v2746_v31 = vperm.slane %v2742_v40, %v6218_v57  ;;  %v2787_v24 = vrot.slane %v2778_v51, 4  ;;  %5840 = vpow2.f32 %v3469_v1  ;;  %v3811_v27 = vunpack.c.l.b16 %v3613_v36 }
 0x353   : > { %5635 = vmatmul.msk.bf16.vlgmr.msra.gmra.mxu2 %vm3310_vm3, %v3791_v45 }
 0x354   : > { %3531 = vadd.xlane.f32.xlu2 %v3530_v59  ;;  %v2750_v0 = vsel %vm373_vm1, %v2746_v31, %v2749_v44  ;;  %v2747_v13 = vrot.slane %v2746_v31, 4  ;;  %v2788_v63 = vsel %vm373_vm1, %v2784_v37, %v2787_v24  ;;  %v2786_v59 = vsel %vm373_vm1, %v2785_v42, %v2778_v51 }
 0x355   : > { %v2851_v43 = vpack.c.bf16 %v2750_v0, %v2750_v0  ;;  %v2852_v30 = vpack.c.bf16 %v2788_v63, %v2788_v63  ;;  %v2850_v11 = vpack.c.bf16 %v2786_v59, %v2786_v59 }
 0x356   : > { %v2748_v55 = vsel %vm373_vm1, %v2747_v13, %v2740_v21  ;;  %v3415_v21 = vsub.f32 %v7867_v39, %v3337_v56  ;;  %v3608_v39 = vpack.c.bf16 %v8094_v32, %v8094_v32 }
 0x357   : > { %v3966_v22 = vunpack.c.l.b16 %v2851_v43  ;;  %v2849_v29 = vpack.c.bf16 %v2748_v55, %v2748_v55  ;;  %v3967_v41 = vunpack.c.l.b16 %v2852_v30  ;;  %v3939_v62 = vunpack.c.l.b16 %v2850_v11 }
 0x358   : > { %v8140_v2 = vpop.eup %5840  ;;  %v3455_v51 = vmul.f32 1.442695, %v3415_v21 }
 0x359   : > { %v3370_v45 = vpop.xlane.xlu0 %3369  ;;  %v3938_v3 = vunpack.c.l.b16 %v2849_v29  ;;  %v3968_v33 = vpack.c.b16 %v3967_v41, %v3966_v22  ;;  %v3614_v49 = vpack.c.bf16 %v8140_v2, %v8140_v2  ;;  %v3734_v22 = vunpack.c.l.b16 %v3608_v39 }
 0x35a   : > { %3546 = vadd.xlane.f32.xlu0 %v3545_v17  ;;  %v3426_v17 = vsub.f32 %v7835_v47, %v3370_v45 }
 0x35b   : > { %v3940_v4 = vpack.c.b16 %v3939_v62, %v3938_v3  ;;  %3980 = vmatpush.bf16.msra.mxu1 %v3968_v33  ;;  %v3812_v47 = vunpack.c.l.b16 %v3614_v49 }
 0x35c   : > { %v3477_v18 = vmul.f32 1.442695, %v3426_v17 }
 0x35d   : > { %4002 = vmatpush.bf16.msra.mxu2 %v3940_v4  ;;  %v3813_v15 = vpack.c.b16 %v3812_v47, %v3811_v27 }
 0x35f   : > { %5636 = vmatmul.msk.bf16.vlgmr.msra.gmra.mxu3 %vm3310_vm3, %v3813_v15 }
 0x360   : > { %4024 = vmatpush.bf16.msra.mxu3 %v3968_v33  ;;  %v3536_v33 = vsel %vm3310_vm3, %v8047_v20, 0.0 }
 0x365   : > { %v3361_v6 = vpop.xlane.xlu2 %3360 }
 0x366   : > { %v3423_v52 = vsub.f32 %v7842_v14, %v3361_v6 }
 0x368   : > { %v3471_v53 = vmul.f32 1.442695, %v3423_v52 }
 0x36a   : > { %5842 = vpow2.f32 %v3471_v53 }
 0x36b   : > { %5844 = vpow2.f32 %v3477_v18 }
 0x36d   : > { %v3367_v48 = vpop.xlane.xlu2 %3366 }
 0x36e   : > { %v3425_v46 = vsub.f32 %v7857_v26, %v3367_v48 }
 0x36f   : > { %v3373_v0 = vpop.xlane.xlu1 %3372 }
 0x370   : > { %v8147_v14 = vpop.eup %5842  ;;  %v3475_v5 = vmul.f32 1.442695, %v3425_v46  ;;  %v3427_v13 = vsub.f32 %v7887_v16, %v3373_v0 }
 0x371   : > { %v3551_v50 = vsel %vm3310_vm3, %v8147_v14, 0.0  ;;  %v8151_v12 = vpop.eup %5844 }
 0x372   : > { %5846 = vpow2.f32 %v3475_v5  ;;  %3552 = vadd.xlane.f32.xlu2 %v3551_v50  ;;  %v3618_v40 = vpack.c.bf16 %v8151_v12, %v8151_v12  ;;  %v3479_v43 = vmul.f32 1.442695, %v3427_v13  ;;  %v3542_v5 = vsel %vm3310_vm3, %v8089_v19, 0.0 }
 0x373   : > { %5848 = vpow2.f32 %v3455_v51 }
 0x374   : > { %v3862_v44 = vunpack.c.l.b16 %v3618_v40 }
 0x377   : > { %v3376_v34 = vpop.xlane.xlu0 %3375  ;;  %v3364_v11 = vpop.xlane.xlu1 %3363 }
 0x378   : > { %v3428_v26 = vsub.f32 %v7881_v58, %v3376_v34  ;;  %v5847_v1 = vpop.eup %5846  ;;  %v3424_v32 = vsub.f32 %v7907_v8, %v3364_v11  ;;  %v3560_v11 = vsel %vm3310_vm3, %v8151_v12, 0.0 }
 0x379   : > { %v3617_v31 = vpack.c.bf16 %v5847_v1, %v5847_v1  ;;  %v3557_v24 = vsel %vm3310_vm3, %v5847_v1, 0.0  ;;  %v5849_v63 = vpop.eup %5848 }
 0x37a   : > { %v3481_v37 = vmul.f32 1.442695, %v3428_v26  ;;  %3558 = vadd.xlane.f32.xlu2 %v3557_v24  ;;  %v3607_v58 = vpack.c.bf16 %v5849_v63, %v5849_v63  ;;  %v3527_v59 = vsel %vm3310_vm3, %v5849_v63, 0.0  ;;  %v3473_v6 = vmul.f32 1.442695, %v3424_v32 }
 0x37b   : > { %v3861_v42 = vunpack.c.l.b16 %v3617_v31  ;;  %3528 = vadd.xlane.f32.xlu1 %v3527_v59  ;;  %v3548_v31 = vsel %vm3310_vm3, %v8140_v2, 0.0 }
 0x37c   : > { %5850 = vpow2.f32 %v3481_v37  ;;  %v3733_v45 = vunpack.c.l.b16 %v3607_v58 }
 0x37d   : > { %v3863_v30 = vpack.c.b16 %v3862_v44, %v3861_v42  ;;  %5852 = vpow2.f32 %v3479_v43 }
 0x37e   : > { %v3735_v16 = vpack.c.b16 %v3734_v22, %v3733_v45  ;;  %5854 = vpow2.f32 %v3473_v6 }
 0x37f   : > { %v3385_v55 = vpop.xlane.xlu2 %3384  ;;  %5638 = vmatmul.msk.bf16.vlgmr.msrb.gmra.mxu1 %vm3310_vm3, %v3863_v30 }
 0x380   : > { %5633 = vmatmul.msk.bf16.vlgmr.msrb.gmra.mxu0 %vm3310_vm3, %v3735_v16  ;;  %v3431_v36 = vsub.f32 %v7900_v9, %v3385_v55 }
 0x381   : > { %3952 = vmatpush.bf16.msrb.mxu0 %v3940_v4  ;;  %v3615_v4 = vpack.c.bf16 %v8147_v14, %v8147_v14 }
 0x382   : > { %v8163_v29 = vpop.eup %5850  ;;  %v3487_v18 = vmul.f32 1.442695, %v3431_v36 }
 0x383   : > { %v3620_v41 = vpack.c.bf16 %v8163_v29, %v8163_v29  ;;  %v5853_v17 = vpop.eup %5852  ;;  %3537 = vadd.xlane.f32.xlu1 %v3536_v33  ;;  %v3833_v56 = vunpack.c.l.b16 %v3615_v4 }
 0x384   : > { %v3619_v52 = vpack.c.bf16 %v5853_v17, %v5853_v17  ;;  %v3563_v9 = vsel %vm3310_vm3, %v5853_v17, 0.0  ;;  %v5855_v20 = vpop.eup %5854  ;;  %5856 = vpow2.f32 %v3487_v18 }
 0x385   : > { %v3890_v8 = vunpack.c.l.b16 %v3620_v41  ;;  %3564 = vadd.xlane.f32.xlu2 %v3563_v9  ;;  %v3616_v46 = vpack.c.bf16 %v5855_v20, %v5855_v20 }
 0x386   : > { %v3889_v53 = vunpack.c.l.b16 %v3619_v52 }
 0x387   : > { %v3379_v3 = vpop.xlane.xlu2 %3378  ;;  %v3388_v62 = vpop.xlane.xlu0 %3387  ;;  %v3834_v21 = vunpack.c.l.b16 %v3616_v46 }
 0x388   : > { %v3429_v49 = vsub.f32 %v7919_v35, %v3379_v3  ;;  %v3432_v27 = vsub.f32 %v7927_v10, %v3388_v62  ;;  %v3891_v47 = vpack.c.b16 %v3890_v8, %v3889_v53  ;;  %v3554_v10 = vsel %vm3310_vm3, %v5855_v20, 0.0 }
 0x389   : > { %3555 = vadd.xlane.f32.xlu0 %v3554_v10  ;;  %v3835_v51 = vpack.c.b16 %v3834_v21, %v3833_v56 }
 0x38a   : > { %v3483_v15 = vmul.f32 1.442695, %v3429_v49  ;;  %5639 = vmatmul.msk.bf16.vlgmr.msrb.gmra.mxu2 %vm3310_vm3, %v3891_v47  ;;  %v3489_v35 = vmul.f32 1.442695, %v3432_v27  ;;  %v5857_v40 = vpop.eup %5856 }
 0x38b   : > { %3543 = vadd.xlane.f32.xlu1 %v3542_v5  ;;  %v3623_v2 = vpack.c.bf16 %v5857_v40, %v5857_v40 }
 0x38c   : > { %5858 = vpow2.f32 %v3483_v15  ;;  %v3566_v15 = vsel %vm3310_vm3, %v8163_v29, 0.0 }
 0x38d   : > { %5860 = vpow2.f32 %v3489_v35  ;;  %v3933_v36 = vunpack.c.l.b16 %v3623_v2 }
 0x38f   : > { %v3382_v48 = vpop.xlane.xlu2 %3381 }
 0x390   : > { %v3430_v50 = vsub.f32 %v7942_v61, %v3382_v48  ;;  %5637 = vmatmul.msk.bf16.vlgmr.msra.gmra.mxu0 %vm3310_vm3, %v3835_v51  ;;  %v3575_v61 = vsel %vm3310_vm3, %v5857_v40, 0.0 }
 0x391   : > { %3576 = vadd.xlane.f32.xlu0 %v3575_v61 }
 0x392   : > { %v3485_v14 = vmul.f32 1.442695, %v3430_v50  ;;  %v5859_v26 = vpop.eup %5858  ;;  %v8188_v42 = vpop.xlane.xlu1 %3510 }
 0x393   : > { %v5861_v44 = vpop.eup %5860  ;;  %3549 = vadd.xlane.f32.xlu1 %v3548_v31  ;;  %v3621_v0 = vpack.c.bf16 %v5859_v26, %v5859_v26  ;;  %v3569_v16 = vsel %vm3310_vm3, %v5859_v26, 0.0  ;;  %vm4064_vm5 = vweird.f32 %v8188_v42 }
 0x394   : > { %5862 = vpow2.f32 %v3485_v14  ;;  %v3624_v63 = vpack.c.bf16 %v5861_v44, %v5861_v44  ;;  %v3578_v9 = vsel %vm3310_vm3, %v5861_v44, 0.0 }
 0x395   : > { %v3400_v34 = vpop.xlane.xlu0 %3399  ;;  %v3911_v30 = vunpack.c.l.b16 %v3621_v0  ;;  %v4070_v0 = vand.u32 2147483648, %v8188_v42 }
 0x396   : > { %v3436_v19 = vsub.f32 %v7962_v23, %v3400_v34  ;;  %v3934_v59 = vunpack.c.l.b16 %v3624_v63 }
 0x397   : > { %v3397_v1 = vpop.xlane.xlu2 %3396 }
 0x398   : > { %v3497_v37 = vmul.f32 1.442695, %v3436_v19  ;;  %v3435_v24 = vsub.f32 %v7959_v60, %v3397_v1  ;;  %v3935_v52 = vpack.c.b16 %v3934_v59, %v3933_v36 }
 0x399   : > { %3561 = vadd.xlane.f32.xlu0 %v3560_v11 }
 0x39a   : > { %v5863_v13 = vpop.eup %5862  ;;  %5864 = vpow2.f32 %v3497_v37  ;;  %v3495_v39 = vmul.f32 1.442695, %v3435_v24  ;;  %v8204_v62 = vpop.xlane.xlu1 %3516 }
 0x39b   : > { %v3622_v23 = vpack.c.bf16 %v5863_v13, %v5863_v13  ;;  %v3572_v43 = vsel %vm3310_vm3, %v5863_v13, 0.0  ;;  %3570 = vadd.xlane.f32.xlu1 %v3569_v16 }
 0x39c   : > { %5866 = vpow2.f32 %v3495_v39  ;;  %3573 = vadd.xlane.f32.xlu2 %v3572_v43 }
 0x39d   : > { %v3912_v55 = vunpack.c.l.b16 %v3622_v23  ;;  %v3406_v58 = vpop.xlane.xlu0 %3405  ;;  %5868 = vrcp.f32 %v8188_v42 }
 0x39e   : > { %v3438_v60 = vsub.f32 %v7974_v28, %v3406_v58 }
 0x39f   : > { %v3913_v22 = vpack.c.b16 %v3912_v55, %v3911_v30  ;;  %v3403_v45 = vpop.xlane.xlu2 %3402 }
 0x3a0   : > { %v8196_v32 = vpop.eup %5864  ;;  %v3501_v41 = vmul.f32 1.442695, %v3438_v60  ;;  %v3437_v17 = vsub.f32 %v7984_v25, %v3403_v45  ;;  %5641 = vmatmul.msk.bf16.vlgmr.msrb.gmra.mxu0 %vm3310_vm3, %v3935_v52 }
 0x3a1   : > { %v3628_v6 = vpack.c.bf16 %v8196_v32, %v8196_v32  ;;  %5640 = vmatmul.msk.bf16.vlgmr.msrb.gmra.mxu3 %vm3310_vm3, %v3913_v22  ;;  %3567 = vadd.xlane.f32.xlu0 %v3566_v15  ;;  %v4068_v22 = vand.u32 2147483647, %v8188_v42  ;;  %v3590_v16 = vsel %vm3310_vm3, %v8196_v32, 0.0 }
 0x3a2   : > { %v8202_v28 = vpop.eup %5866  ;;  %5870 = vpow2.f32 %v3501_v41  ;;  %v3499_v3 = vmul.f32 1.442695, %v3437_v17  ;;  %v8220_v10 = vpop.xlane.xlu1 %3507  ;;  %v4071_v17 = vor.u32 1.1754944e-38, %v4070_v0 }
 0x3a3   : > { %v8206_v12 = vpop.eup %5868  ;;  %v3627_v25 = vpack.c.bf16 %v8202_v28, %v8202_v28  ;;  %v3990_v33 = vunpack.c.l.b16 %v3628_v6  ;;  %3579 = vadd.xlane.f32.xlu1 %v3578_v9  ;;  %v4054_v11 = vand.u32 2147483647, %v8220_v10  ;;  %vm4069_vm7 = vcmp.eq.f32.partialorder %v4068_v22, 8.507059e+37 }
 0x3a4   : > { %5872 = vpow2.f32 %v3499_v3  ;;  %v4060_v18 = vmul.f32 %v8206_v12, %v8188_v42  ;;  %vm4065_vm4 = vweird.f32 %v8206_v12  ;;  %v4056_v42 = vand.u32 2147483648, %v8220_v10 }
 0x3a5   : > { %v3989_v49 = vunpack.c.l.b16 %v3627_v25  ;;  %v3394_v8 = vpop.xlane.xlu0 %3393  ;;  %5874 = vrcp.f32 %v8204_v62  ;;  %vm8255_vm6 = vmor %vm4064_vm5, %vm4065_vm4  ;;  %vm4050_vm9 = vweird.f32 %v8220_v10  ;;  %vm8285_vm11 = vcmp.eq.f32.partialorder %v4054_v11, 8.507059e+37 }
 0x3a6   : > { %v3434_v53 = vsub.f32 %v7998_v7, %v3394_v8  ;;  %v4061_v5 = vsub.f32 1.0, %v4060_v18  ;;  %v4057_v15 = vor.u32 1.1754944e-38, %v4056_v42  ;;  %vm4092_vm4 = vweird.f32 %v8204_v62 }
 0x3a7   : > { %v3991_v27 = vpack.c.b16 %v3990_v33, %v3989_v49  ;;  %v3391_v47 = vpop.xlane.xlu2 %3390 }
 0x3a8   : > { %v5871_v4 = vpop.eup %5870  ;;  %v3493_v20 = vmul.f32 1.442695, %v3434_v53  ;;  %v3433_v35 = vsub.f32 %v8009_v38, %v3391_v47  ;;  %v4062_v51 = vmul.f32 %v8206_v12, %v4061_v5  ;;  %v3682_v33 = vpop.f32.mrf.mxu1  ;;  %v3587_v53 = vsel %vm3310_vm3, %v8202_v28, 0.0 }
 0x3a9   : > { %v3630_v48 = vpack.c.bf16 %v5871_v4, %v5871_v4  ;;  %5643 = vmatmul.msk.bf16.vlgmr.msra.gmra.mxu2 %vm3310_vm3, %v3991_v27  ;;  %v3596_v26 = vsel %vm3310_vm3, %v5871_v4, 0.0  ;;  %v3654_v47 = vpop.f32.mrf.mxu0 }
 0x3aa   : > { %v5873_v7 = vpop.eup %5872  ;;  %5876 = vpow2.f32 %v3493_v20  ;;  %v3491_v46 = vmul.f32 1.442695, %v3433_v35  ;;  %3597 = vadd.xlane.f32.xlu0 %v3596_v26  ;;  %v4063_v24 = vadd.f32 %v8206_v12, %v4062_v51  ;;  %v4096_v51 = vand.u32 2147483647, %v8204_v62 }
 0x3ab   : > { %v3629_v50 = vpack.c.bf16 %v5873_v7, %v5873_v7  ;;  %v3593_v29 = vsel %vm3310_vm3, %v5873_v7, 0.0  ;;  %5878 = vrcp.f32 %v8220_v10  ;;  %v8224_v56 = vpop.eup %5874  ;;  %v4012_v38 = vunpack.c.l.b16 %v3630_v48 }
 0x3ac   : > { %5880 = vpow2.f32 %v3491_v46  ;;  %3594 = vadd.xlane.f32.xlu2 %v3593_v29  ;;  %v4088_v1 = vmul.f32 %v8224_v56, %v8204_v62  ;;  %v4067_v41 = vsel %vm8255_vm6, %v8206_v12, %v4063_v24  ;;  %vm4093_vm13 = vweird.f32 %v8224_v56 }
 0x3ad   : > { %v4011_v21 = vunpack.c.l.b16 %v3629_v50  ;;  %v8226_v14 = vpop.xlane.xlu0 %3504  ;;  %v4072_v27 = vsel %vm4069_vm7, %v4071_v17, %v4067_v41  ;;  %v4098_v50 = vand.u32 2147483648, %v8204_v62  ;;  %vm8323_vm6 = vmor %vm4092_vm4, %vm4093_vm13 }
 0x3ae   : > { %5882 = vrcp.f32 %v8226_v14  ;;  %v4089_v43 = vsub.f32 1.0, %v4088_v1  ;;  %v4040_v25 = vand.u32 2147483647, %v8226_v14  ;;  %vm4036_vm8 = vweird.f32 %v8226_v14 }
 0x3af   : > { %v4013_v40 = vpack.c.b16 %v4012_v38, %v4011_v21  ;;  %v8230_v34 = vpop.xlane.xlu2 %3513  ;;  %v4042_v18 = vand.u32 2147483648, %v8226_v14  ;;  %v8289_v4 = vmul.f32 %v4072_v27, %v3682_v33  ;;  %v4099_v24 = vor.u32 1.1754944e-38, %v4098_v50 }
 0x3b0   : > { %v5877_v19 = vpop.eup %5876  ;;  %5884 = vrcp.f32 %v8230_v34  ;;  %v4090_v49 = vmul.f32 %v8224_v56, %v4089_v43  ;;  %vm8291_vm12 = vcmp.eq.f32.partialorder %v4040_v25, 8.507059e+37  ;;  %vm4078_vm5 = vweird.f32 %v8230_v34  ;;  %v3684_v27 = vpop.f32.mrf.mxu1 }
 0x3b1   : > { %v8236_v31 = vpop.eup %5878  ;;  %v3626_v61 = vpack.c.bf16 %v5877_v19, %v5877_v19  ;;  %5644 = vmatmul.msk.bf16.vlgmr.msra.gmra.mxu3 %vm3310_vm3, %v4013_v40  ;;  %v3584_v39 = vsel %vm3310_vm3, %v5877_v19, 0.0  ;;  %v4043_v38 = vor.u32 1.1754944e-38, %v4042_v18  ;;  %v4084_v0 = vand.u32 2147483648, %v8230_v34  ;;  %v3656_v22 = vpop.f32.mrf.mxu0 }
 0x3b2   : > { %v5881_v44 = vpop.eup %5880  ;;  %v4046_v37 = vmul.f32 %v8236_v31, %v8220_v10  ;;  %vm4051_vm10 = vweird.f32 %v8236_v31  ;;  %v4091_v48 = vadd.f32 %v8224_v56, %v4090_v49  ;;  %v4082_v10 = vand.u32 2147483647, %v8230_v34 }
 0x3b3   : > { %v3625_v13 = vpack.c.bf16 %v5881_v44, %v5881_v44  ;;  %v3581_v63 = vsel %vm3310_vm3, %v5881_v44, 0.0  ;;  %v3962_v30 = vunpack.c.l.b16 %v3626_v61  ;;  %vm8308_vm15 = vmor %vm4050_vm9, %vm4051_vm10 }
 0x3b4   : > { %v8246_v23 = vpop.eup %5882  ;;  %3585 = vadd.xlane.f32.xlu2 %v3584_v39  ;;  %3582 = vadd.xlane.f32.xlu1 %v3581_v63  ;;  %v4047_v2 = vsub.f32 1.0, %v4046_v37  ;;  %v4095_v61 = vsel %vm8323_vm6, %v8224_v56, %v4091_v48 }
 0x3b5   : > { %v3961_v55 = vunpack.c.l.b16 %v3625_v13  ;;  %v4032_v58 = vmul.f32 %v8246_v23, %v8226_v14  ;;  %v8251_v60 = vpop.xlane.xlu0 %3534  ;;  %vm4037_vm14 = vweird.f32 %v8246_v23 }
 0x3b6   : > { %v8260_v45 = vpop.eup %5884  ;;  %v4048_v32 = vmul.f32 %v8236_v31, %v4047_v2  ;;  %vm8331_vm7 = vmor %vm4036_vm8, %vm4037_vm14  ;;  %vm4097_vm8 = vcmp.eq.f32.partialorder %v4096_v51, 8.507059e+37  ;;  %v4525_v2 = vrot.slane %v8289_v4, 4 }
 0x3b7   : > { %v3963_v36 = vpack.c.b16 %v3962_v30, %v3961_v55  ;;  %v4033_v6 = vsub.f32 1.0, %v4032_v58  ;;  %v4074_v3 = vmul.f32 %v8260_v45, %v8230_v34  ;;  %v8270_v52 = vpop.xlane.xlu2 %3519  ;;  %v3704_v35 = vpop.f32.mrf.mxu2  ;;  %vm4079_vm9 = vweird.f32 %v8260_v45 }
 0x3b8   : > { %5886 = vrcp.f32 %v8270_v52  ;;  %v4049_v20 = vadd.f32 %v8236_v31, %v4048_v32  ;;  %v4112_v13 = vand.u32 2147483648, %v8270_v52  ;;  %v4100_v63 = vsel %vm4097_vm8, %v4099_v24, %v4095_v61  ;;  %vm8361_vm13 = vmor %vm4078_vm5, %vm4079_vm9 }
 0x3b9   : > { %5642 = vmatmul.msk.bf16.vlgmr.msra.gmra.mxu1 %vm3310_vm3, %v3963_v36  ;;  %v4075_v12 = vsub.f32 1.0, %v4074_v3  ;;  %v4034_v8 = vmul.f32 %v8246_v23, %v4033_v6  ;;  %v4483_v55 = vmul.f32 %v4100_v63, %v3704_v35  ;;  %v4085_v36 = vor.u32 1.1754944e-38, %v4084_v0 }
 0x3ba   : > { %v4053_v1 = vsel %vm8308_vm15, %v8236_v31, %v4049_v20  ;;  %v4110_v31 = vand.u32 2147483647, %v8270_v52  ;;  %v4113_v3 = vor.u32 1.1754944e-38, %v4112_v13 }
 0x3bb   : > { %v4035_v7 = vadd.f32 %v8246_v23, %v4034_v8  ;;  %v4076_v5 = vmul.f32 %v8260_v45, %v4075_v12  ;;  %v4058_v39 = vsel %vm8285_vm11, %v4057_v15, %v4053_v1  ;;  %vm4106_vm11 = vweird.f32 %v8270_v52 }
 0x3bc   : > { %3591 = vadd.xlane.f32.xlu2 %v3590_v16  ;;  %3588 = vadd.xlane.f32.xlu1 %v3587_v53  ;;  %v4480_v17 = vmul.f32 %v4058_v39, %v3656_v22  ;;  %vm4111_vm15 = vcmp.eq.f32.partialorder %v4110_v31, 8.507059e+37  ;;  %v4511_v12 = vrot.slane %v4483_v55, 4 }
 0x3bd   : > { %v8300_v46 = vpop.xlane.xlu0 %3525  ;;  %v4039_v14 = vsel %vm8331_vm7, %v8246_v23, %v4035_v7  ;;  %v4077_v37 = vadd.f32 %v8260_v45, %v4076_v5 }
 0x3be   : > { %v5887_v29 = vpop.eup %5886  ;;  %5888 = vrcp.f32 %v8300_v46  ;;  %v4044_v23 = vsel %vm8291_vm12, %v4043_v38, %v4039_v14  ;;  %vm4083_vm12 = vcmp.eq.f32.partialorder %v4082_v10, 8.507059e+37  ;;  %v4140_v20 = vand.u32 2147483648, %v8300_v46 }
 0x3bf   : > { %v4102_v40 = vmul.f32 %v5887_v29, %v8270_v52  ;;  %5890 = vrcp.f32 %v8251_v60  ;;  %v8317_v26 = vpop.xlane.xlu2 %3522  ;;  %vm4107_vm10 = vweird.f32 %v5887_v29  ;;  %v4479_v59 = vmul.f32 %v4044_v23, %v3654_v47  ;;  %v3706_v6 = vpop.f32.mrf.mxu2 }
 0x3c0   : > { %5892 = vrcp.f32 %v8317_v26  ;;  %v4081_v11 = vsel %vm8361_vm13, %v8260_v45, %v4077_v37  ;;  %vm4108_vm14 = vmor %vm4106_vm11, %vm4107_vm10  ;;  %v4124_v15 = vand.u32 2147483647, %v8317_v26  ;;  %v4126_v28 = vand.u32 2147483648, %v8317_v26 }
 0x3c1   : > { %v4103_v44 = vsub.f32 1.0, %v4102_v40  ;;  %v3726_v32 = vpop.f32.mrf.mxu3  ;;  %v4086_v45 = vsel %vm4083_vm12, %v4085_v36, %v4081_v11  ;;  %v4513_v53 = vrot.slane %v4479_v59, 4  ;;  %v4138_v7 = vand.u32 2147483647, %v8300_v46 }
 0x3c2   : > { %v4569_v5 = vrot.slane %v4480_v17, 4  ;;  %v4482_v50 = vmul.f32 %v4086_v45, %v3684_v27  ;;  %vm4120_vm6 = vweird.f32 %v8317_v26  ;;  %v4512_v38 = vsel %vm373_vm1, %v4511_v12, %v4479_v59 }
 0x3c3   : > { %v4104_v56 = vmul.f32 %v5887_v29, %v4103_v44  ;;  %v4514_v21 = vsel %vm373_vm1, %v4483_v55, %v4513_v53  ;;  %vm4134_vm9 = vweird.f32 %v8300_v46  ;;  %vm4125_vm8 = vcmp.eq.f32.partialorder %v4124_v15, 8.507059e+37 }
 0x3c4   : > { %v8352_v43 = vpop.eup %5888  ;;  %v4127_v10 = vor.u32 1.1754944e-38, %v4126_v28  ;;  %v4141_v19 = vor.u32 1.1754944e-38, %v4140_v20  ;;  %vm4139_vm13 = vcmp.eq.f32.partialorder %v4138_v7, 8.507059e+37  ;;  %v4518_v14 = vperm.slane %v4512_v38, %v6074_v54 }
 0x3c5   : > { %v8366_v58 = vpop.eup %5890  ;;  %v4130_v16 = vmul.f32 %v8352_v43, %v8300_v46  ;;  %v4105_v41 = vadd.f32 %v5887_v29, %v4104_v56  ;;  %v8379_v49 = vpop.xlane.xlu0 %3540  ;;  %vm4135_vm5 = vweird.f32 %v8352_v43  ;;  %v4522_v44 = vperm.slane %v4514_v21, %v6074_v54 }
 0x3c6   : > { %v5893_v34 = vpop.eup %5892  ;;  %v8377_v33 = vmul.f32 %v8366_v58, %v8251_v60  ;;  %vm4136_vm10 = vmor %vm4134_vm9, %vm4135_vm5  ;;  %v4581_v46 = vrot.slane %v4482_v50, 4  ;;  %5894 = vrcp.f32 %v8379_v49  ;;  %v4537_v59 = vrot.slane %v4518_v14, 4 }
 0x3c7   : > { %v4116_v52 = vmul.f32 %v5893_v34, %v8317_v26  ;;  %v4131_v42 = vsub.f32 1.0, %v4130_v16  ;;  %v4109_v25 = vsel %vm4108_vm14, %v5887_v29, %v4105_v41  ;;  %vm4121_vm4 = vweird.f32 %v5893_v34 }
 0x3c8   : > { %v4114_v8 = vsel %vm4111_vm15, %v4113_v3, %v4109_v25  ;;  %vm4122_vm7 = vmor %vm4120_vm6, %vm4121_vm4  ;;  %v4173_v13 = vsub.f32 1.0, %v8377_v33  ;;  %v4549_v22 = vrot.slane %v4522_v44, 4  ;;  %vm4176_vm11 = vweird.f32 %v8251_v60 }
 0x3c9   : > { %v4117_v18 = vsub.f32 1.0, %v4116_v52  ;;  %v4484_v47 = vmul.f32 %v4114_v8, %v3706_v6  ;;  %v4132_v9 = vmul.f32 %v8352_v43, %v4131_v42  ;;  %v3728_v1 = vpop.f32.mrf.mxu3  ;;  %vm4177_vm12 = vweird.f32 %v8366_v58 }
 0x3ca   : > { %vm8461_vm14 = vmor %vm4176_vm11, %vm4177_vm12  ;;  %vm4204_vm6 = vweird.f32 %v8379_v49 }
 0x3cb   : > { %v4567_v35 = vrot.slane %v4484_v47, 4  ;;  %v4118_v48 = vmul.f32 %v5893_v34, %v4117_v18  ;;  %v4133_v29 = vadd.f32 %v8352_v43, %v4132_v9  ;;  %v4570_v40 = vsel %vm373_vm1, %v4484_v47, %v4569_v5 }
 0x3cc   : > { %v4578_v56 = vperm.slane %v4570_v40, %v6074_v54  ;;  %v8417_v3 = vpop.eup %5894 }
 0x3cd   : > { %v4119_v51 = vadd.f32 %v5893_v34, %v4118_v48  ;;  %v4568_v62 = vsel %vm373_vm1, %v4567_v35, %v4480_v17  ;;  %v4137_v61 = vsel %vm4136_vm10, %v8352_v43, %v4133_v29  ;;  %v8400_v39 = vpop.xlane.xlu0 %3546  ;;  %v4200_v47 = vmul.f32 %v8417_v3, %v8379_v49 }
 0x3ce   : > { %v4142_v24 = vsel %vm4139_vm13, %v4141_v19, %v4137_v61  ;;  %v4574_v63 = vperm.slane %v4568_v62, %v6074_v54  ;;  %5896 = vrcp.f32 %v8400_v39  ;;  %v4605_v42 = vrot.slane %v4578_v56, 4  ;;  %v8444_v61 = vpop.xlane.xlu2 %3531 }
 0x3cf   : > { %v4123_v26 = vsel %vm4122_vm7, %v5893_v34, %v4119_v51  ;;  %v4486_v31 = vmul.f32 %v4142_v24, %v3728_v1  ;;  %5898 = vrcp.f32 %v8444_v61  ;;  %vm4232_vm5 = vweird.f32 %v8400_v39 }
 0x3d0   : > { %v4128_v37 = vsel %vm4125_vm8, %v4127_v10, %v4123_v26  ;;  %v4593_v52 = vrot.slane %v4574_v63, 4  ;;  %vm4205_vm9 = vweird.f32 %v8417_v3 }
 0x3d1   : > { %v4485_v0 = vmul.f32 %v4128_v37, %v3726_v32  ;;  %v4579_v30 = vrot.slane %v4486_v31, 4  ;;  %v4582_v55 = vsel %vm373_vm1, %v4486_v31, %v4581_v46  ;;  %v4174_v32 = vmul.f32 %v8366_v58, %v4173_v13  ;;  %vm8541_vm10 = vmor %vm4204_vm6, %vm4205_vm9 }
 0x3d2   : > { %v4590_v34 = vperm.slane %v4582_v55, %v6074_v54  ;;  %vm4162_vm6 = vweird.f32 %v8444_v61 }
 0x3d3   : > { %v4523_v43 = vrot.slane %v4485_v0, 4  ;;  %v4526_v23 = vsel %vm373_vm1, %v4485_v0, %v4525_v2  ;;  %v4580_v41 = vsel %vm373_vm1, %v4579_v30, %v4482_v50  ;;  %v4175_v50 = vadd.f32 %v8366_v58, %v4174_v32 }
 0x3d4   : > { %v4534_v16 = vperm.slane %v4526_v23, %v6074_v54  ;;  %v4586_v6 = vperm.slane %v4580_v41, %v6074_v54  ;;  %v4603_v15 = vrot.slane %v4590_v34, 4  ;;  %v4606_v28 = vsel %vm373_vm1, %v4590_v34, %v4605_v42  ;;  %v8431_v20 = vpop.eup %5896 }
 0x3d5   : > { %v4524_v11 = vsel %vm373_vm1, %v4523_v43, %v8289_v4  ;;  %v4614_v26 = vperm.slane %v4606_v28, %v6218_v57  ;;  %v4179_v41 = vsel %vm8461_vm14, %v8366_v58, %v4175_v50  ;;  %v4180_v34 = vand.u32 2147483647, %v8251_v60 }
 0x3d6   : > { %v4530_v17 = vperm.slane %v4524_v11, %v6074_v54  ;;  %v4547_v36 = vrot.slane %v4534_v16, 4  ;;  %v4550_v2 = vsel %vm373_vm1, %v4534_v16, %v4549_v22  ;;  %v4591_v12 = vrot.slane %v4586_v6, 4 }
 0x3d7   : > { %v4558_v25 = vperm.slane %v4550_v2, %v6218_v57  ;;  %v4594_v27 = vsel %vm373_vm1, %v4586_v6, %v4593_v52  ;;  %v4604_v62 = vsel %vm373_vm1, %v4603_v15, %v4578_v56  ;;  %v4621_v55 = vrot.slane %v4614_v26, 4 }
 0x3d8   : > { %v4535_v4 = vrot.slane %v4530_v17, 4  ;;  %v4538_v33 = vsel %vm373_vm1, %v4530_v17, %v4537_v59  ;;  %v4548_v45 = vsel %vm373_vm1, %v4547_v36, %v4522_v44  ;;  %v4592_v29 = vsel %vm373_vm1, %v4591_v12, %v4574_v63 }
 0x3d9   : > { %v4546_v8 = vperm.slane %v4538_v33, %v6218_v57  ;;  %v4554_v53 = vperm.slane %v4548_v45, %v6218_v57  ;;  %v4565_v18 = vrot.slane %v4558_v25, 4  ;;  %v4602_v38 = vperm.slane %v4594_v27, %v6218_v57 }
 0x3da   : > { %v4536_v9 = vsel %vm373_vm1, %v4535_v4, %v4518_v14  ;;  %v4201_v14 = vsub.f32 1.0, %v4200_v47  ;;  %v4228_v44 = vmul.f32 %v8431_v20, %v8400_v39  ;;  %v4598_v46 = vperm.slane %v4592_v29, %v6218_v57 }
 0x3db   : > { %v4542_v35 = vperm.slane %v4536_v9, %v6218_v57  ;;  %v4561_v48 = vrot.slane %v4546_v8, 4  ;;  %v4563_v7 = vrot.slane %v4554_v53, 4  ;;  %v4566_v5 = vsel %vm373_vm1, 0.0, %v4565_v18 }
 0x3dc   : > { %v4970_v51 = vsel %vm373_vm1, %v4565_v18, %v4554_v53  ;;  %v4975_v40 = vrot.slane %v4566_v5, 4  ;;  %v4610_v63 = vperm.slane %v4604_v62, %v6218_v57  ;;  %v4617_v56 = vrot.slane %v4602_v38, 4 }
 0x3dd   : > { %v4562_v21 = vsel %vm373_vm1, 0.0, %v4561_v48  ;;  %v4559_v10 = vrot.slane %v4542_v35, 4  ;;  %v4564_v1 = vsel %vm373_vm1, 0.0, %v4563_v7  ;;  %v4959_v24 = vsel %vm373_vm1, %v4561_v48, %v4542_v35 }
 0x3de   : > { %v4964_v19 = vrot.slane %v4562_v21, 4  ;;  %v4963_v0 = vperm.slane %v4959_v24, %v6074_v54  ;;  %v4974_v13 = vperm.slane %v4970_v51, %v6074_v54  ;;  %v4976_v23 = vsel %vm373_vm1, %v4975_v40, %v4564_v1 }
 0x3df   : > { %v4560_v37 = vsel %vm373_vm1, 0.0, %v4559_v10  ;;  %v4980_v59 = vperm.slane %v4976_v23, %v6074_v54  ;;  %v4229_v11 = vsub.f32 1.0, %v4228_v44  ;;  %v4182_v17 = vand.u32 2147483648, %v8251_v60  ;;  %v8512_v44 = vpop.eup %5898 }
 0x3e0   : > { %v4965_v31 = vsel %vm373_vm1, %v4964_v19, %v4560_v37  ;;  %v4983_v22 = vrot.slane %v4963_v0, 4  ;;  %v4995_v16 = vrot.slane %v4974_v13, 4  ;;  %v4615_v36 = vrot.slane %v4598_v46, 4 }
 0x3e1   : > { %v4969_v43 = vperm.slane %v4965_v31, %v6074_v54  ;;  %v4618_v42 = vsel %vm373_vm1, 0.0, %v4617_v56  ;;  %v4619_v25 = vrot.slane %v4610_v63, 4  ;;  %v4622_v33 = vsel %vm373_vm1, 0.0, %v4621_v55 }
 0x3e2   : > { %v4996_v6 = vsel %vm373_vm1, %v4980_v59, %v4995_v16  ;;  %v4202_v58 = vmul.f32 %v8417_v3, %v4201_v14  ;;  %v4993_v60 = vrot.slane %v4980_v59, 4  ;;  %v4230_v27 = vmul.f32 %v8431_v20, %v4229_v11 }
 0x3e3   : > { %v4984_v2 = vsel %vm373_vm1, %v4969_v43, %v4983_v22  ;;  %v4981_v52 = vrot.slane %v4969_v43, 4  ;;  %v5004_v4 = vperm.slane %v4996_v6, %v6218_v57  ;;  %vm4181_vm15 = vcmp.eq.f32.partialorder %v4180_v34, 8.507059e+37  ;;  %v3826_v22 = vpop.f32.mrf.mxu3 }
 0x3e4   : > { %v4992_v32 = vperm.slane %v4984_v2, %v6218_v57  ;;  %v4183_v47 = vor.u32 1.1754944e-38, %v4182_v17  ;;  %v4994_v9 = vsel %vm373_vm1, %v4993_v60, %v4974_v13  ;;  %v5018_v15 = vrot.slane %v4618_v42, 4 }
 0x3e5   : > { %v4982_v45 = vsel %vm373_vm1, %v4981_v52, %v4963_v0  ;;  %v8479_v12 = vpop.xlane.xlu2 %3552  ;;  %v5009_v8 = vrot.slane %v5004_v4, 4  ;;  %v5029_v28 = vrot.slane %v4622_v33, 4  ;;  %v8491_v5 = vadd.f32 %v8417_v3, %v4202_v58 }
 0x3e6   : > { %v5011_v53 = vrot.slane %v4992_v32, 4  ;;  %v8482_v18 = vperm.slane %v4982_v45, %v6218_v57  ;;  %v4184_v7 = vsel %vm4181_vm15, %v4183_v47, %v4179_v41  ;;  %v8495_v50 = vperm.slane %v4994_v9, %v6218_v57 }
 0x3e7   : > { %v5010_v35 = vsel %vm373_vm1, %v5009_v8, %v4992_v32  ;;  %v4231_v38 = vadd.f32 %v8431_v20, %v4230_v27  ;;  %vm4233_vm4 = vweird.f32 %v8431_v20  ;;  %v4616_v21 = vsel %vm373_vm1, 0.0, %v4615_v36 }
 0x3e8   : > { %v5012_v48 = vsel %vm373_vm1, %v5004_v4, %v5011_v53  ;;  %5431 = vrot.lane.b32.xlu2 %v5010_v35, %s5955_s25  ;;  %v5007_v29 = vrot.slane %v8482_v18, 4  ;;  %v4620_v51 = vsel %vm373_vm1, 0.0, %v4619_v25  ;;  %v4236_v10 = vand.u32 2147483647, %v8400_v39  ;;  %vm8517_vm7 = vmor %vm4232_vm5, %vm4233_vm4  ;;  %v3804_v25 = vpop.f32.mrf.mxu2 }
 0x3e9   : > { %5463 = vrot.lane.b32.xlu1 %v5012_v48, %s5956_s26  ;;  %v4238_v19 = vand.u32 2147483648, %v8400_v39  ;;  %v5013_v62 = vsel %vm373_vm1, %v4617_v56, %v4598_v46  ;;  %v5019_v26 = vsel %vm373_vm1, %v5018_v15, %v4616_v21  ;;  %v5024_v1 = vsel %vm373_vm1, %v4621_v55, %v4610_v63  ;;  %v3782_v56 = vpop.f32.mrf.mxu1 }
 0x3ea   : > { %v5008_v40 = vsel %vm373_vm1, %v8495_v50, %v5007_v29  ;;  %v5030_v14 = vsel %vm373_vm1, %v5029_v28, %v4620_v51  ;;  %v5017_v39 = vperm.slane %v5013_v62, %v6074_v54  ;;  %v5023_v24 = vperm.slane %v5019_v26, %v6074_v54 }
 0x3eb   : > { %5399 = vrot.lane.b32.xlu0 %v5008_v40, %s5957_s27  ;;  %v5028_v46 = vperm.slane %v5024_v1, %v6074_v54  ;;  %v4208_v31 = vand.u32 2147483647, %v8379_v49  ;;  %v4235_v13 = vsel %vm8517_vm7, %v8431_v20, %v4231_v38  ;;  %v5034_v63 = vperm.slane %v5030_v14, %v6074_v54 }
 0x3ec   : > { %v4239_v43 = vor.u32 1.1754944e-38, %v4238_v19  ;;  %v5037_v23 = vrot.slane %v5017_v39, 4  ;;  %v4210_v55 = vand.u32 2147483648, %v8379_v49  ;;  %vm4237_vm8 = vcmp.eq.f32.partialorder %v4236_v10, 8.507059e+37 }
 0x3ed   : > { %v8524_v0 = vpop.xlane.xlu2 %3558  ;;  %v5049_v30 = vrot.slane %v5028_v46, 4  ;;  %v5035_v59 = vrot.slane %v5023_v24, 4  ;;  %v5047_v41 = vrot.slane %v5034_v63, 4  ;;  %v4489_v34 = vmul.f32 %v4184_v7, %v3782_v56 }
 0x3ee   : > { %5900 = vrcp.f32 %v8524_v0  ;;  %v4240_v16 = vsel %vm4237_vm8, %v4239_v43, %v4235_v13  ;;  %v5038_v11 = vsel %vm373_vm1, %v5023_v24, %v5037_v23  ;;  %v8545_v36 = vpop.xlane.xlu1 %3528  ;;  %v4207_v42 = vsel %vm8541_vm10, %v8417_v3, %v8491_v5 }
 0x3ef   : > { %5902 = vrcp.f32 %v8479_v12  ;;  %v5050_v20 = vsel %vm373_vm1, %v5034_v63, %v5049_v30  ;;  %v4493_v2 = vmul.f32 %v4240_v16, %v3826_v22  ;;  %v5046_v6 = vperm.slane %v5038_v11, %v6218_v57 }
 0x3f0   : > { %v5058_v52 = vperm.slane %v5050_v20, %v6218_v57  ;;  %5904 = vrcp.f32 %v8545_v36  ;;  %v5036_v49 = vsel %vm373_vm1, %v5035_v59, %v5017_v39  ;;  %v4211_v32 = vor.u32 1.1754944e-38, %v4210_v55 }
 0x3f1   : > { %v5065_v4 = vrot.slane %v5046_v6, 4  ;;  %vm4209_vm13 = vcmp.eq.f32.partialorder %v4208_v31, 8.507059e+37  ;;  %v4635_v45 = vrot.slane %v4493_v2, 4  ;;  %v8558_v60 = vperm.slane %v5036_v49, %v6218_v57  ;;  %v8596_v39 = vpop.f32.mrf.mxu1 }
 0x3f2   : > { %v5063_v33 = vrot.slane %v5058_v52, 4  ;;  %v5048_v8 = vsel %vm373_vm1, %v5047_v41, %v5028_v46  ;;  %v4637_v3 = vrot.slane %v4489_v34, 4  ;;  %v4212_v47 = vsel %vm4209_vm13, %v4211_v32, %v4207_v42 }
 0x3f3   : > { %v5066_v9 = vsel %vm373_vm1, %v5058_v52, %v5065_v4  ;;  %v4158_v15 = vmul.f32 %v8512_v44, %v8444_v61  ;;  %v8568_v28 = vmul.f32 %v4212_v47, %v3804_v25  ;;  %v8575_v5 = vperm.slane %v5048_v8, %v6218_v57 }
 0x3f4   : > { %v8555_v58 = vpop.eup %5900  ;;  %5465 = vrot.lane.b32.xlu2 %v5066_v9, %s5956_s26  ;;  %v5064_v35 = vsel %vm373_vm1, %v5063_v33, %v5046_v6  ;;  %v4638_v7 = vsel %vm373_vm1, %v4493_v2, %v4637_v3  ;;  %v5061_v29 = vrot.slane %v8558_v60, 4  ;;  %v4636_v51 = vsel %vm373_vm1, %v4635_v45, %v4489_v34 }
 0x3f5   : > { %v8561_v53 = vpop.eup %5902  ;;  %v4284_v27 = vmul.f32 %v8555_v58, %v8524_v0  ;;  %5433 = vrot.lane.b32.xlu0 %v5064_v35, %s5955_s25  ;;  %v4292_v19 = vand.u32 2147483647, %v8524_v0  ;;  %v4159_v1 = vsub.f32 1.0, %v4158_v15  ;;  %v8591_v14 = vperm.slane %v4638_v7, %v6074_v54 }
 0x3f6   : > { %v5905_v38 = vpop.eup %5904  ;;  %v8580_v21 = vmul.f32 %v8561_v53, %v8479_v12  ;;  %v5062_v62 = vsel %vm373_vm1, %v8575_v5, %v5061_v29  ;;  %v8588_v26 = vpop.xlane.xlu1 %3537  ;;  %v4294_v37 = vand.u32 2147483648, %v8524_v0  ;;  %v4623_v24 = vrot.slane %v8568_v28, 4 }
 0x3f7   : > { %v4285_v48 = vsub.f32 1.0, %v4284_v27  ;;  %v4144_v40 = vmul.f32 %v5905_v38, %v8545_v36  ;;  %5401 = vrot.lane.b32.xlu1 %v5062_v62, %s5957_s27  ;;  %5906 = vrcp.f32 %v8588_v26  ;;  %v8600_v31 = vperm.slane %v4636_v51, %v6074_v54 }
 0x3f8   : > { %vm4288_vm11 = vweird.f32 %v8524_v0  ;;  %v4257_v13 = vsub.f32 1.0, %v8580_v21  ;;  %vm4289_vm12 = vweird.f32 %v8555_v58  ;;  %v4154_v56 = vand.u32 2147483648, %v8545_v36  ;;  %v8611_v23 = vpop.xlane.xlu2 %3564 }
 0x3f9   : > { %v4286_v10 = vmul.f32 %v8555_v58, %v4285_v48  ;;  %v4145_v46 = vsub.f32 1.0, %v4144_v40  ;;  %vm8607_vm14 = vcmp.eq.f32.partialorder %v4292_v19, 8.507059e+37  ;;  %vm4149_vm15 = vweird.f32 %v5905_v38  ;;  %vm8620_vm5 = vmor %vm4288_vm11, %vm4289_vm12 }
 0x3fa   : > { %v4152_v55 = vand.u32 2147483647, %v8545_v36  ;;  %v4659_v59 = vrot.slane %v8591_v14, 4  ;;  %v4295_v22 = vor.u32 1.1754944e-38, %v4294_v37  ;;  %vm4148_vm4 = vweird.f32 %v8545_v36 }
 0x3fb   : > { %v4287_v63 = vadd.f32 %v8555_v58, %v4286_v10  ;;  %v4146_v30 = vmul.f32 %v5905_v38, %v4145_v46  ;;  %v4160_v16 = vmul.f32 %v8512_v44, %v4159_v1  ;;  %v4647_v11 = vrot.slane %v8600_v31, 4  ;;  %vm4150_vm7 = vmor %vm4148_vm4, %vm4149_vm15 }
 0x3fc   : > { %v4194_v41 = vand.u32 2147483647, %v8588_v26  ;;  %v4196_v2 = vand.u32 2147483648, %v8588_v26  ;;  %5908 = vrcp.f32 %v8611_v23  ;;  %v4155_v0 = vor.u32 1.1754944e-38, %v4154_v56  ;;  %v8635_v49 = vpop.xlane.xlu0 %3555 }
 0x3fd   : > { %v4147_v34 = vadd.f32 %v5905_v38, %v4146_v30  ;;  %v5907_v17 = vpop.eup %5906  ;;  %v4291_v36 = vsel %vm8620_vm5, %v8555_v58, %v4287_v63  ;;  %vm4153_vm9 = vcmp.eq.f32.partialorder %v4152_v55, 8.507059e+37  ;;  %vm4163_vm8 = vweird.f32 %v8512_v44  ;;  %v3754_v25 = vpop.f32.mrf.mxu0 }
 0x3fe   : > { %v4186_v6 = vmul.f32 %v5907_v17, %v8588_v26  ;;  %v8633_v42 = vpop.xlane.xlu1 %3543  ;;  %v4161_v4 = vadd.f32 %v8512_v44, %v4160_v16  ;;  %v4166_v33 = vand.u32 2147483647, %v8444_v61  ;;  %v3882_v58 = vpop.f32.mrf.mxu1  ;;  %v4296_v45 = vsel %vm8607_vm14, %v4295_v22, %v4291_v36  ;;  %vm8655_vm12 = vmor %vm4162_vm6, %vm4163_vm8 }
 0x3ff   : > { %v4151_v52 = vsel %vm4150_vm7, %v5905_v38, %v4147_v34  ;;  %5910 = vrcp.f32 %v8633_v42  ;;  %v4168_v27 = vand.u32 2147483648, %v8444_v61  ;;  %vm4190_vm10 = vweird.f32 %v8588_v26 }
 0x400   : > { %v4156_v32 = vsel %vm4153_vm9, %v4155_v0, %v4151_v52  ;;  %v4187_v8 = vsub.f32 1.0, %v4186_v6  ;;  %vm8645_vm13 = vcmp.eq.f32.partialorder %v4194_v41, 8.507059e+37  ;;  %v4197_v9 = vor.u32 1.1754944e-38, %v4196_v2 }
 0x401   : > { %v4487_v3 = vmul.f32 %v4156_v32, %v3754_v25  ;;  %5912 = vrcp.f32 %v8635_v49  ;;  %vm4191_vm11 = vweird.f32 %v5907_v17  ;;  %v8661_v38 = vmul.f32 %v4296_v45, %v3882_v58 }
 0x402   : > { %v4188_v15 = vmul.f32 %v5907_v17, %v4187_v8  ;;  %v8659_v29 = vpop.eup %5908  ;;  %v4165_v40 = vsel %vm8655_vm12, %v8512_v44, %v4161_v4  ;;  %vm8667_vm14 = vcmp.eq.f32.partialorder %v4166_v33, 8.507059e+37  ;;  %v4222_v62 = vand.u32 2147483647, %v8633_v42  ;;  %vm4192_vm15 = vmor %vm4190_vm10, %vm4191_vm11 }
 0x403   : > { %v4624_v35 = vsel %vm373_vm1, %v4623_v24, %v4487_v3  ;;  %v4625_v48 = vrot.slane %v4487_v3, 4  ;;  %v4169_v1 = vor.u32 1.1754944e-38, %v4168_v27  ;;  %v4224_v63 = vand.u32 2147483648, %v8633_v42 }
 0x404   : > { %v4630_v51 = vperm.slane %v4624_v35, %v6074_v54  ;;  %v4189_v19 = vadd.f32 %v5907_v17, %v4188_v15  ;;  %v4312_v43 = vmul.f32 %v8659_v29, %v8611_v23  ;;  %v4749_v20 = vrot.slane %v8661_v38, 4  ;;  %v8719_v3 = vpop.xlane.xlu0 %3576 }
 0x405   : > { %v4626_v61 = vsel %vm373_vm1, %v8568_v28, %v4625_v48  ;;  %v5911_v37 = vpop.eup %5910  ;;  %vm4218_vm4 = vweird.f32 %v8633_v42  ;;  %vm8695_vm5 = vcmp.eq.f32.partialorder %v4222_v62, 8.507059e+37  ;;  %v4170_v58 = vsel %vm8667_vm14, %v4169_v1, %v4165_v40 }
 0x406   : > { %v4634_v24 = vperm.slane %v4626_v61, %v6074_v54  ;;  %v4648_v46 = vsel %vm373_vm1, %v4647_v11, %v4630_v51  ;;  %v4649_v44 = vrot.slane %v4630_v51, 4  ;;  %v4193_v56 = vsel %vm4192_vm15, %v5907_v17, %v4189_v19  ;;  %v8713_v4 = vpop.xlane.xlu1 %3549 }
 0x407   : > { %v4654_v28 = vperm.slane %v4648_v46, %v6218_v57  ;;  %v4214_v30 = vmul.f32 %v5911_v37, %v8633_v42  ;;  %v8683_v55 = vpop.eup %5912  ;;  %v4198_v26 = vsel %vm8645_vm13, %v4197_v9, %v4193_v56  ;;  %v4313_v0 = vsub.f32 1.0, %v4312_v43 }
 0x408   : > { %v4650_v22 = vsel %vm373_vm1, %v8600_v31, %v4649_v44  ;;  %v4660_v16 = vsel %vm373_vm1, %v4659_v59, %v4634_v24  ;;  %v4661_v11 = vrot.slane %v4634_v24, 4  ;;  %v8700_v17 = vmul.f32 %v4198_v26, %v8596_v39  ;;  %v3756_v59 = vpop.f32.mrf.mxu0  ;;  %v3806_v39 = vpop.f32.mrf.mxu2 }
 0x409   : > { %v4658_v41 = vperm.slane %v4650_v22, %v6218_v57  ;;  %v4671_v36 = vrot.slane %v4654_v28, 4  ;;  %v4215_v2 = vsub.f32 1.0, %v4214_v30  ;;  %v8705_v6 = vperm.slane %v4660_v16, %v6218_v57 }
 0x40a   : > { %v4662_v31 = vsel %vm373_vm1, %v8591_v14, %v4661_v11  ;;  %v8711_v32 = vmul.f32 %v8683_v55, %v8635_v49  ;;  %vm4219_vm6 = vweird.f32 %v5911_v37  ;;  %v4225_v14 = vor.u32 1.1754944e-38, %v4224_v63 }
 0x40b   : > { %v4673_v52 = vrot.slane %v4658_v41, 4  ;;  %v4216_v33 = vmul.f32 %v5911_v37, %v4215_v2  ;;  %v4670_v45 = vperm.slane %v4662_v31, %v6218_v57  ;;  %v4488_v8 = vmul.f32 %v4170_v58, %v3756_v59  ;;  %vm4220_vm9 = vmor %vm4218_vm4, %vm4219_vm6 }
 0x40c   : > { %vm4316_vm7 = vweird.f32 %v8611_v23  ;;  %v4693_v27 = vrot.slane %v8700_v17, 4  ;;  %v8724_v47 = vsel %vm373_vm1, 0.0, %v4671_v36  ;;  %v4675_v35 = vrot.slane %v8705_v6, 4 }
 0x40d   : > { %v4217_v9 = vadd.f32 %v5911_v37, %v4216_v33  ;;  %v8728_v15 = vsel %vm373_vm1, 0.0, %v4673_v52  ;;  %v4271_v48 = vsub.f32 1.0, %v8711_v32  ;;  %v4314_v7 = vmul.f32 %v8659_v29, %v4313_v0 }
 0x40e   : > { %vm4317_vm8 = vweird.f32 %v8659_v29  ;;  %v4322_v40 = vand.u32 2147483648, %v8611_v23  ;;  %v8738_v10 = vrot.slane %v4670_v45, 4  ;;  %v4320_v42 = vand.u32 2147483647, %v8611_v23  ;;  %v8769_v11 = vpop.xlane.xlu1 %3570 }
 0x40f   : > { %v8707_v25 = vpop.xlane.xlu2 %3573  ;;  %v4221_v51 = vsel %vm4220_vm9, %v5911_v37, %v4217_v9  ;;  %v4315_v61 = vadd.f32 %v8659_v29, %v4314_v7  ;;  %v8745_v62 = vsel %vm373_vm1, %v4673_v52, %v4654_v28  ;;  %v4681_v37 = vrot.slane %v4488_v8, 4  ;;  %vm8749_vm10 = vmor %vm4316_vm7, %vm4317_vm8  ;;  %v8783_v52 = vpop.xlane.xlu0 %3561 }
 0x410   : > { %5914 = vrcp.f32 %v8707_v25  ;;  %v4226_v19 = vsel %vm8695_vm5, %v4225_v14, %v4221_v51  ;;  %v4258_v46 = vmul.f32 %v8561_v53, %v4257_v13  ;;  %v5072_v63 = vrot.slane %v8728_v15, 4  ;;  %v3904_v26 = vpop.f32.mrf.mxu2 }
 0x411   : > { %5916 = vrcp.f32 %v8713_v4  ;;  %v4492_v1 = vmul.f32 %v4226_v19, %v3806_v39  ;;  %vm4246_vm13 = vweird.f32 %v8713_v4  ;;  %v4250_v56 = vand.u32 2147483647, %v8713_v4 }
 0x412   : > { %5918 = vrcp.f32 %v8719_v3  ;;  %v4319_v23 = vsel %vm8749_vm10, %v8659_v29, %v4315_v61  ;;  %v4252_v21 = vand.u32 2147483648, %v8713_v4  ;;  %v4323_v13 = vor.u32 1.1754944e-38, %v4322_v40  ;;  %v3854_v40 = vpop.f32.mrf.mxu0 }
 0x413   : > { %v4679_v28 = vrot.slane %v4492_v1, 4  ;;  %v4682_v30 = vsel %vm373_vm1, %v4492_v1, %v4681_v37  ;;  %vm4321_vm11 = vcmp.eq.f32.partialorder %v4320_v42, 8.507059e+37  ;;  %v4259_v16 = vadd.f32 %v8561_v53, %v4258_v46 }
 0x414   : > { %vm4261_vm12 = vweird.f32 %v8561_v53  ;;  %v4324_v31 = vsel %vm4321_vm11, %v4323_v13, %v4319_v23  ;;  %vm4260_vm14 = vweird.f32 %v8479_v12  ;;  %v8780_v36 = vperm.slane %v4682_v30, %v6074_v54 }
 0x415   : > { %v4680_v34 = vsel %vm373_vm1, %v4679_v28, %v4488_v8  ;;  %v4499_v59 = vmul.f32 %v4324_v31, %v3904_v26  ;;  %v4264_v0 = vand.u32 2147483647, %v8479_v12  ;;  %vm8785_vm4 = vcmp.eq.f32.partialorder %v4250_v56, 8.507059e+37  ;;  %vm8789_vm5 = vmor %vm4260_vm14, %vm4261_vm12 }
 0x416   : > { %v8756_v44 = vpop.eup %5914  ;;  %v4266_v14 = vand.u32 2147483648, %v8479_v12  ;;  %5920 = vrcp.f32 %v8769_v11  ;;  %v8796_v58 = vperm.slane %v4680_v34, %v6074_v54  ;;  %v4263_v9 = vsel %vm8789_vm5, %v8561_v53, %v4259_v16  ;;  %v3828_v12 = vpop.f32.mrf.mxu3 }
 0x417   : > { %v5917_v43 = vpop.eup %5916  ;;  %v8775_v29 = vmul.f32 %v8756_v44, %v8707_v25  ;;  %v4253_v51 = vor.u32 1.1754944e-38, %v4252_v21  ;;  %5922 = vrcp.f32 %v8783_v52  ;;  %v4717_v61 = vrot.slane %v8780_v36, 4 }
 0x418   : > { %v4242_v22 = vmul.f32 %v5917_v43, %v8713_v4  ;;  %v8771_v41 = vpop.eup %5918  ;;  %vm4247_vm15 = vweird.f32 %v5917_v43  ;;  %v4267_v19 = vor.u32 1.1754944e-38, %v4266_v14  ;;  %v4735_v37 = vrot.slane %v4499_v59, 4 }
 0x419   : > { %v8800_v8 = vmul.f32 %v8771_v41, %v8719_v3  ;;  %v4355_v7 = vsub.f32 1.0, %v8775_v29  ;;  %vm4265_vm6 = vcmp.eq.f32.partialorder %v4264_v0, 8.507059e+37  ;;  %vm4248_vm7 = vmor %vm4246_vm13, %vm4247_vm15  ;;  %v4348_v24 = vand.u32 2147483647, %v8769_v11 }
 0x41a   : > { %v4243_v2 = vsub.f32 1.0, %v4242_v22  ;;  %v4268_v53 = vsel %vm4265_vm6, %v4267_v19, %v4263_v9  ;;  %v4350_v46 = vand.u32 2147483648, %v8769_v11  ;;  %v4705_v56 = vrot.slane %v8796_v58, 4 }
 0x41b   : > { %v4369_v28 = vsub.f32 1.0, %v8800_v8  ;;  %v4495_v30 = vmul.f32 %v4268_v53, %v3854_v40  ;;  %v4306_v4 = vand.u32 2147483647, %v8783_v52  ;;  %v4308_v13 = vand.u32 2147483648, %v8783_v52 }
 0x41c   : > { %v4244_v45 = vmul.f32 %v5917_v43, %v4243_v2  ;;  %v5921_v21 = vpop.eup %5920  ;;  %v4272_v22 = vmul.f32 %v8683_v55, %v4271_v48  ;;  %vm4344_vm9 = vweird.f32 %v8769_v11  ;;  %vm8833_vm8 = vcmp.eq.f32.partialorder %v4348_v24, 8.507059e+37 }
 0x41d   : > { %v4736_v34 = vsel %vm373_vm1, %v4735_v37, %v4495_v30  ;;  %v4737_v31 = vrot.slane %v4495_v30, 4  ;;  %v8827_v2 = vpop.eup %5922  ;;  %v4351_v32 = vor.u32 1.1754944e-38, %v4350_v46  ;;  %vm4302_vm10 = vweird.f32 %v8783_v52 }
 0x41e   : > { %v4245_v42 = vadd.f32 %v5917_v43, %v4244_v45  ;;  %v8830_v0 = vperm.slane %v4736_v34, %v6074_v54  ;;  %v4298_v40 = vmul.f32 %v8827_v2, %v8783_v52  ;;  %v4309_v19 = vor.u32 1.1754944e-38, %v4308_v13 }
 0x41f   : > { %v8808_v1 = vpop.xlane.xlu2 %3594  ;;  %v4738_v14 = vsel %vm373_vm1, %v4499_v59, %v4737_v31  ;;  %vm4275_vm13 = vweird.f32 %v8683_v55  ;;  %vm4345_vm11 = vweird.f32 %v5921_v21  ;;  %vm8852_vm12 = vcmp.eq.f32.partialorder %v4306_v4, 8.507059e+37 }
 0x420   : > { %5924 = vrcp.f32 %v8808_v1  ;;  %v4249_v23 = vsel %vm4248_vm7, %v5917_v43, %v4245_v42  ;;  %v4340_v43 = vmul.f32 %v5921_v21, %v8769_v11  ;;  %v4273_v53 = vadd.f32 %v8683_v55, %v4272_v22 }
 0x421   : > { %v4254_v26 = vsel %vm8785_vm4, %v4253_v51, %v4249_v23  ;;  %v4746_v24 = vperm.slane %v4738_v14, %v6074_v54  ;;  %v4761_v46 = vrot.slane %v8830_v0, 4  ;;  %vm4274_vm14 = vweird.f32 %v8635_v49  ;;  %vm4346_vm4 = vmor %vm4344_vm9, %vm4345_vm11 }
 0x422   : > { %v4494_v16 = vmul.f32 %v4254_v26, %v3828_v12  ;;  %v4341_v45 = vsub.f32 1.0, %v4340_v43  ;;  %v4278_v23 = vand.u32 2147483647, %v8635_v49  ;;  %v4299_v26 = vsub.f32 1.0, %v4298_v40  ;;  %vm8870_vm15 = vmor %vm4274_vm14, %vm4275_vm13 }
 0x423   : > { %vm4303_vm5 = vweird.f32 %v8827_v2  ;;  %v4277_v43 = vsel %vm8870_vm15, %v8683_v55, %v4273_v53  ;;  %vm4359_vm6 = vweird.f32 %v8756_v44  ;;  %v4364_v55 = vand.u32 2147483648, %v8707_v25  ;;  %v3884_v53 = vpop.f32.mrf.mxu1 }
 0x424   : > { %v4691_v33 = vrot.slane %v4494_v16, 4  ;;  %v4694_v48 = vsel %vm373_vm1, %v4494_v16, %v4693_v27  ;;  %v3926_v27 = vpop.f32.mrf.mxu3  ;;  %v4342_v42 = vmul.f32 %v5921_v21, %v4341_v45  ;;  %v4280_v16 = vand.u32 2147483648, %v8635_v49  ;;  %vm4304_vm7 = vmor %vm4302_vm10, %vm4303_vm5 }
 0x425   : > { %v8845_v51 = vperm.slane %v4694_v48, %v6074_v54  ;;  %v4300_v31 = vmul.f32 %v8827_v2, %v4299_v26  ;;  %v8890_v48 = vpop.xlane.xlu1 %3579  ;;  %v4362_v49 = vand.u32 2147483647, %v8707_v25  ;;  %v4773_v29 = vrot.slane %v4746_v24, 4 }
 0x426   : > { %v8842_v9 = vpop.eup %5924  ;;  %v4692_v12 = vsel %vm373_vm1, %v4691_v33, %v8700_v17  ;;  %v4343_v30 = vadd.f32 %v5921_v21, %v4342_v42  ;;  %v4356_v33 = vmul.f32 %v8756_v44, %v4355_v7  ;;  %v4281_v14 = vor.u32 1.1754944e-38, %v4280_v16  ;;  %v3856_v7 = vpop.f32.mrf.mxu0 }
 0x427   : > { %v8856_v37 = vpop.xlane.xlu2 %3585  ;;  %v8865_v17 = vmul.f32 %v8842_v9, %v8808_v1  ;;  %v8875_v13 = vperm.slane %v4692_v12, %v6074_v54  ;;  %v4715_v22 = vrot.slane %v8845_v51, 4  ;;  %v4301_v45 = vadd.f32 %v8827_v2, %v4300_v31 }
 0x428   : > { %5926 = vrcp.f32 %v8856_v37  ;;  %v4347_v34 = vsel %vm4346_vm4, %v5921_v21, %v4343_v30  ;;  %v4357_v40 = vadd.f32 %v8756_v44, %v4356_v33  ;;  %vm4279_vm9 = vcmp.eq.f32.partialorder %v4278_v23, 8.507059e+37 }
 0x429   : > { %v4352_v11 = vsel %vm8833_vm8, %v4351_v32, %v4347_v34  ;;  %vm4358_vm8 = vweird.f32 %v8707_v25  ;;  %5928 = vrcp.f32 %v8890_v48  ;;  %v4282_v42 = vsel %vm4279_vm9, %v4281_v14, %v4277_v43 }
 0x42a   : > { %v4501_v21 = vmul.f32 %v4352_v11, %v3926_v27  ;;  %v4305_v27 = vsel %vm4304_vm7, %v8827_v2, %v4301_v45  ;;  %vm8913_vm13 = vmor %vm4358_vm8, %vm4359_vm6  ;;  %vm4363_vm10 = vcmp.eq.f32.partialorder %v4362_v49, 8.507059e+37  ;;  %v8927_v26 = vmul.f32 %v4282_v42, %v3856_v7 }
 0x42b   : > { %v4310_v23 = vsel %vm8852_vm12, %v4309_v19, %v4305_v27  ;;  %v4361_v30 = vsel %vm8913_vm13, %v8756_v44, %v4357_v40  ;;  %v4365_v16 = vor.u32 1.1754944e-38, %v4364_v55  ;;  %v8945_v40 = vsel %vm373_vm1, %v8845_v51, %v4717_v61 }
 0x42c   : > { %v4747_v32 = vrot.slane %v4501_v21, 4  ;;  %v4750_v12 = vsel %vm373_vm1, %v4501_v21, %v4749_v20  ;;  %v8923_v20 = vpop.xlane.xlu0 %3567  ;;  %v3928_v4 = vpop.f32.mrf.mxu3  ;;  %v4498_v34 = vmul.f32 %v4310_v23, %v3884_v53  ;;  %v4703_v53 = vrot.slane %v8875_v13, 4 }
 0x42d   : > { %v4758_v25 = vperm.slane %v4750_v12, %v6074_v54  ;;  %v4366_v33 = vsel %vm4363_vm10, %v4365_v16, %v4361_v30  ;;  %5930 = vrcp.f32 %v8923_v20  ;;  %vm4330_vm11 = vweird.f32 %v8923_v20 }
 0x42e   : > { %v8905_v39 = vpop.eup %5926  ;;  %v4748_v2 = vsel %vm373_vm1, %v4747_v32, %v8661_v38  ;;  %v4805_v11 = vrot.slane %v4498_v34, 4  ;;  %v4502_v45 = vmul.f32 %v4366_v33, %v3928_v4  ;;  %v4453_v32 = vsub.f32 1.0, %v8865_v17 }
 0x42f   : > { %v4754_v31 = vperm.slane %v4748_v2, %v6074_v54  ;;  %v4771_v43 = vrot.slane %v4758_v25, 4  ;;  %v4774_v19 = vsel %vm373_vm1, %v4758_v25, %v4773_v29  ;;  %v8933_v59 = vmul.f32 %v8905_v39, %v8856_v37  ;;  %v8937_v38 = vpop.eup %5928 }
 0x430   : > { %v4782_v44 = vperm.slane %v4774_v19, %v6218_v57  ;;  %v8958_v12 = vmul.f32 %v8937_v38, %v8890_v48  ;;  %v4806_v52 = vsel %vm373_vm1, %v4502_v45, %v4805_v11  ;;  %v4793_v25 = vrot.slane %v8927_v26, 4 }
 0x431   : > { %v4759_v14 = vrot.slane %v4754_v31, 4  ;;  %v4762_v49 = vsel %vm373_vm1, %v4754_v31, %v4761_v46  ;;  %v4772_v21 = vsel %vm373_vm1, %v4771_v43, %v4746_v24  ;;  %v4803_v24 = vrot.slane %v4502_v45, 4 }
 0x432   : > { %v4770_v55 = vperm.slane %v4762_v49, %v6218_v57  ;;  %v8949_v29 = vperm.slane %v4772_v21, %v6218_v57  ;;  %v8951_v7 = vrot.slane %v4782_v44, 4  ;;  %v4334_v16 = vand.u32 2147483647, %v8923_v20 }
 0x433   : > { %v4760_v46 = vsel %vm373_vm1, %v4759_v14, %v8830_v0  ;;  %v4411_v0 = vsub.f32 1.0, %v8933_v59  ;;  %v5931_v23 = vpop.eup %5930  ;;  %v4804_v4 = vsel %vm373_vm1, %v4803_v24, %v4498_v34  ;;  %v8980_v43 = vperm.slane %v4806_v52, %v6074_v54  ;;  %v8991_v14 = vpop.xlane.xlu2 %3591 }
 0x434   : > { %v8961_v61 = vperm.slane %v4760_v46, %v6218_v57  ;;  %v8963_v27 = vrot.slane %v4770_v55, 4  ;;  %v8967_v42 = vsel %vm373_vm1, 0.0, %v8951_v7  ;;  %v4787_v30 = vrot.slane %v8949_v29, 4 }
 0x435   : > { %v4383_v19 = vsub.f32 1.0, %v8958_v12  ;;  %v4326_v44 = vmul.f32 %v5931_v23, %v8923_v20  ;;  %vm4331_vm12 = vweird.f32 %v5931_v23  ;;  %v4336_v11 = vand.u32 2147483648, %v8923_v20 }
 0x436   : > { %v4783_v31 = vrot.slane %v8961_v61, 4  ;;  %v8986_v33 = vsel %vm373_vm1, 0.0, %v8963_v27  ;;  %v4678_v34 = vsel %vm373_vm1, 0.0, %v8738_v10  ;;  %v5071_v21 = vperm.slane %v8745_v62, %v6074_v54  ;;  %vm4332_vm15 = vmor %vm4330_vm11, %vm4331_vm12 }
 0x437   : > { %v4327_v49 = vsub.f32 1.0, %v4326_v44  ;;  %v5073_v45 = vsel %vm373_vm1, %v5072_v63, %v8724_v47  ;;  %v5078_v55 = vsel %vm373_vm1, %v8738_v10, %v8705_v6  ;;  %v4676_v46 = vsel %vm373_vm1, 0.0, %v4675_v35  ;;  %v3906_v63 = vpop.f32.mrf.mxu2 }
 0x438   : > { %v5077_v24 = vperm.slane %v5073_v45, %v6074_v54  ;;  %v5082_v52 = vperm.slane %v5078_v55, %v6074_v54  ;;  %v5083_v44 = vrot.slane %v4678_v34, 4  ;;  %v5091_v62 = vrot.slane %v5071_v21, 4 }
 0x439   : > { %v4328_v2 = vmul.f32 %v5931_v23, %v4327_v49  ;;  %5932 = vrcp.f32 %v8991_v14  ;;  %v4370_v47 = vmul.f32 %v8771_v41, %v4369_v28  ;;  %v9012_v15 = vperm.slane %v4804_v4, %v6074_v54 }
 0x43a   : > { %v5084_v6 = vsel %vm373_vm1, %v5083_v44, %v4676_v46  ;;  %v5103_v10 = vrot.slane %v5082_v52, 4  ;;  %v5089_v35 = vrot.slane %v5077_v24, 4  ;;  %vm4335_vm14 = vcmp.eq.f32.partialorder %v4334_v16, 8.507059e+37 }
 0x43b   : > { %v4329_v45 = vadd.f32 %v5931_v23, %v4328_v2  ;;  %v5088_v34 = vperm.slane %v5084_v6, %v6074_v54  ;;  %v5092_v49 = vsel %vm373_vm1, %v5077_v24, %v5091_v62  ;;  %v4337_v8 = vor.u32 1.1754944e-38, %v4336_v11 }
 0x43c   : > { %v5100_v28 = vperm.slane %v5092_v49, %v6218_v57  ;;  %v5090_v4 = vsel %vm373_vm1, %v5089_v35, %v5071_v21  ;;  %v4371_v55 = vadd.f32 %v8771_v41, %v4370_v47  ;;  %vm4373_vm4 = vweird.f32 %v8771_v41 }
 0x43d   : > { %v4333_v46 = vsel %vm4332_vm15, %v5931_v23, %v4329_v45  ;;  %v5104_v44 = vsel %vm373_vm1, %v5088_v34, %v5103_v10  ;;  %v9025_v2 = vperm.slane %v5090_v4, %v6218_v57  ;;  %v5101_v16 = vrot.slane %v5088_v34, 4 }
 0x43e   : > { %v4338_v6 = vsel %vm4335_vm14, %v4337_v8, %v4333_v46  ;;  %v5112_v24 = vperm.slane %v5104_v44, %v6218_v57  ;;  %v5119_v62 = vrot.slane %v5100_v28, 4  ;;  %vm4372_vm5 = vweird.f32 %v8719_v3 }
 0x43f   : > { %v9029_v20 = vpop.eup %5932  ;;  %v4500_v11 = vmul.f32 %v4338_v6, %v3906_v63  ;;  %v5102_v21 = vsel %vm373_vm1, %v5101_v16, %v5082_v52  ;;  %v5115_v47 = vrot.slane %v9025_v2, 4  ;;  %vm9042_vm6 = vmor %vm4372_vm5, %vm4373_vm4  ;;  %v4378_v63 = vand.u32 2147483648, %v8719_v3  ;;  %v9056_v16 = vpop.xlane.xlu1 %3582 }
 0x440   : > { %v5120_v23 = vsel %vm373_vm1, %v5112_v24, %v5119_v62  ;;  %v4438_v10 = vmul.f32 %v9029_v20, %v8991_v14  ;;  %v5117_v35 = vrot.slane %v5112_v24, 4  ;;  %v9038_v45 = vperm.slane %v5102_v21, %v6218_v57  ;;  %v4026_v52 = vpop.f32.mrf.mxu3 }
 0x441   : > { %v4791_v34 = vrot.slane %v4500_v11, 4  ;;  %v4794_v49 = vsel %vm373_vm1, %v4500_v11, %v4793_v25  ;;  %5467 = vrot.lane.b32.xlu0 %v5120_v23, %s5956_s26  ;;  %v4454_v8 = vmul.f32 %v8842_v9, %v4453_v32  ;;  %v5180_v4 = vrot.slane %v8986_v33, 4  ;;  %v3954_v23 = vpop.f32.mrf.mxu0 }
 0x442   : > { %v5118_v46 = vsel %vm373_vm1, %v5117_v35, %v5100_v28  ;;  %v4375_v25 = vsel %vm9042_vm6, %v8771_v41, %v4371_v55  ;;  %v4376_v44 = vand.u32 2147483647, %v8719_v3  ;;  %v9061_v24 = vperm.slane %v4794_v49, %v6074_v54  ;;  %v9067_v28 = vpop.xlane.xlu0 %3597 }
 0x443   : > { %v4792_v6 = vsel %vm373_vm1, %v4791_v34, %v8927_v26  ;;  %5435 = vrot.lane.b32.xlu1 %v5118_v46, %s5955_s25  ;;  %v5116_v17 = vsel %vm373_vm1, %v9038_v45, %v5115_v47  ;;  %v4455_v32 = vadd.f32 %v8842_v9, %v4454_v8  ;;  %v4439_v3 = vsub.f32 1.0, %v4438_v10  ;;  %v9074_v26 = vpop.f32.mrf.mxu2 }
 0x444   : > { %v9070_v41 = vperm.slane %v4792_v6, %v6074_v54  ;;  %5403 = vrot.lane.b32.xlu2 %v5116_v17, %s5957_s27  ;;  %v4379_v55 = vor.u32 1.1754944e-38, %v4378_v63  ;;  %vm4457_vm7 = vweird.f32 %v8842_v9  ;;  %vm4456_vm9 = vweird.f32 %v8808_v1 }
 0x445   : > { %v4460_v62 = vand.u32 2147483647, %v8808_v1  ;;  %v4462_v11 = vand.u32 2147483648, %v8808_v1  ;;  %5934 = vrcp.f32 %v9056_v16  ;;  %vm4377_vm8 = vcmp.eq.f32.partialorder %v4376_v44, 8.507059e+37  ;;  %vm9082_vm13 = vmor %vm4456_vm9, %vm4457_vm7 }
 0x446   : > { %5936 = vrcp.f32 %v9067_v28  ;;  %v4380_v49 = vsel %vm4377_vm8, %v4379_v55, %v4375_v25  ;;  %v4459_v1 = vsel %vm9082_vm13, %v8842_v9, %v4455_v32  ;;  %v4404_v8 = vand.u32 2147483647, %v9056_v16 }
 0x447   : > { %v4463_v63 = vor.u32 1.1754944e-38, %v4462_v11  ;;  %v4406_v46 = vand.u32 2147483648, %v9056_v16  ;;  %v4440_v44 = vmul.f32 %v9029_v20, %v4439_v3  ;;  %v9095_v6 = vmul.f32 %v4380_v49, %v3954_v23 }
 0x448   : > { %vm4461_vm10 = vcmp.eq.f32.partialorder %v4460_v62, 8.507059e+37  ;;  %vm4442_vm11 = vweird.f32 %v8991_v14  ;;  %vm4443_vm12 = vweird.f32 %v9029_v20  ;;  %v4446_v9 = vand.u32 2147483647, %v8991_v14 }
 0x449   : > { %v4464_v25 = vsel %vm4461_vm10, %v4463_v63, %v4459_v1  ;;  %v4441_v17 = vadd.f32 %v9029_v20, %v4440_v44  ;;  %v4448_v32 = vand.u32 2147483648, %v8991_v14  ;;  %vm4400_vm14 = vweird.f32 %v9056_v16  ;;  %vm9105_vm15 = vmor %vm4442_vm11, %vm4443_vm12  ;;  %v3956_v21 = vpop.f32.mrf.mxu0 }
 0x44a   : > { %v9102_v11 = vmul.f32 %v4464_v25, %v4026_v52  ;;  %v4384_v62 = vmul.f32 %v8937_v38, %v4383_v19  ;;  %vm4387_vm4 = vweird.f32 %v8937_v38  ;;  %vm9114_vm5 = vcmp.eq.f32.partialorder %v4404_v8, 8.507059e+37  ;;  %v9130_v25 = vpop.xlane.xlu1 %3588 }
 0x44b   : > { %v5935_v55 = vpop.eup %5934  ;;  %v4407_v49 = vor.u32 1.1754944e-38, %v4406_v46  ;;  %v4445_v1 = vsel %vm9105_vm15, %v9029_v20, %v4441_v17  ;;  %vm4386_vm6 = vweird.f32 %v8890_v48  ;;  %v4449_v52 = vor.u32 1.1754944e-38, %v4448_v32  ;;  %v4006_v17 = vpop.f32.mrf.mxu2 }
 0x44c   : > { %v5937_v23 = vpop.eup %5936  ;;  %v4396_v10 = vmul.f32 %v5935_v55, %v9056_v16  ;;  %v4385_v19 = vadd.f32 %v8937_v38, %v4384_v62  ;;  %v4390_v63 = vand.u32 2147483647, %v8890_v48  ;;  %vm4401_vm7 = vweird.f32 %v5935_v55  ;;  %vm9125_vm8 = vmor %vm4386_vm6, %vm4387_vm4 }
 0x44d   : > { %v4466_v12 = vmul.f32 %v5937_v23, %v9067_v28  ;;  %vm4447_vm9 = vcmp.eq.f32.partialorder %v4446_v9, 8.507059e+37  ;;  %v4392_v46 = vand.u32 2147483648, %v8890_v48  ;;  %vm4471_vm13 = vweird.f32 %v5937_v23  ;;  %vm4402_vm12 = vmor %vm4400_vm14, %vm4401_vm7 }
 0x44e   : > { %v4397_v44 = vsub.f32 1.0, %v4396_v10  ;;  %v4450_v3 = vsel %vm4447_vm9, %v4449_v52, %v4445_v1  ;;  %v4389_v32 = vsel %vm9125_vm8, %v8937_v38, %v4385_v19  ;;  %v4474_v9 = vand.u32 2147483647, %v9067_v28  ;;  %v3982_v52 = vpop.f32.mrf.mxu1 }
 0x44f   : > { %v4467_v20 = vsub.f32 1.0, %v4466_v12  ;;  %v4508_v10 = vmul.f32 %v4450_v3, %v4006_v17  ;;  %v4393_v34 = vor.u32 1.1754944e-38, %v4392_v46  ;;  %vm4391_vm10 = vcmp.eq.f32.partialorder %v4390_v63, 8.507059e+37  ;;  %v4028_v17 = vpop.f32.mrf.mxu3 }
 0x450   : > { %v4398_v62 = vmul.f32 %v5935_v55, %v4397_v44  ;;  %v4476_v35 = vand.u32 2147483648, %v9067_v28  ;;  %5938 = vrcp.f32 %v9130_v25  ;;  %vm4470_vm11 = vweird.f32 %v9067_v28 }
 0x451   : > { %v4468_v47 = vmul.f32 %v5937_v23, %v4467_v20  ;;  %v4903_v12 = vrot.slane %v4508_v10, 4  ;;  %v4394_v1 = vsel %vm4391_vm10, %v4393_v34, %v4389_v32  ;;  %vm4475_vm15 = vcmp.eq.f32.partialorder %v4474_v9, 8.507059e+37  ;;  %vm4472_vm4 = vmor %vm4470_vm11, %vm4471_vm13 }
 0x452   : > { %v4399_v48 = vadd.f32 %v5935_v55, %v4398_v62  ;;  %v4504_v38 = vmul.f32 %v4394_v1, %v3956_v21  ;;  %v4477_v63 = vor.u32 1.1754944e-38, %v4476_v35  ;;  %v4432_v8 = vand.u32 2147483647, %v9130_v25 }
 0x453   : > { %v4469_v19 = vadd.f32 %v5937_v23, %v4468_v47  ;;  %v4434_v46 = vand.u32 2147483648, %v9130_v25  ;;  %v4412_v28 = vmul.f32 %v8905_v39, %v4411_v0  ;;  %v4859_v35 = vrot.slane %v9102_v11, 4 }
 0x454   : > { %v4403_v44 = vsel %vm4402_vm12, %v5935_v55, %v4399_v48  ;;  %v4904_v16 = vsel %vm373_vm1, %v4903_v12, %v4504_v38  ;;  %v4905_v21 = vrot.slane %v4504_v38, 4  ;;  %v4849_v59 = vrot.slane %v9095_v6, 4 }
 0x455   : > { %v4408_v34 = vsel %vm9114_vm5, %v4407_v49, %v4403_v44  ;;  %v4473_v47 = vsel %vm4472_vm4, %v5937_v23, %v4469_v19  ;;  %v9153_v20 = vperm.slane %v4904_v16, %v6074_v54  ;;  %vm4428_vm14 = vweird.f32 %v9130_v25 }
 0x456   : > { %v4505_v55 = vmul.f32 %v4408_v34, %v3982_v52  ;;  %v4478_v3 = vsel %vm4475_vm15, %v4477_v63, %v4473_v47  ;;  %v5939_v32 = vpop.eup %5938  ;;  %v4906_v0 = vsel %vm373_vm1, %v4508_v10, %v4905_v21  ;;  %v4413_v23 = vadd.f32 %v8905_v39, %v4412_v28  ;;  %v3984_v47 = vpop.f32.mrf.mxu1 }
 0x457   : > { %v4510_v62 = vmul.f32 %v4478_v3, %v4028_v17  ;;  %vm4414_vm5 = vweird.f32 %v8856_v37  ;;  %v9162_v9 = vperm.slane %v4906_v0, %v6074_v54  ;;  %v4424_v48 = vmul.f32 %v5939_v32, %v9130_v25 }
 0x458   : > { %v4860_v14 = vsel %vm373_vm1, %v4859_v35, %v4505_v55  ;;  %v4861_v49 = vrot.slane %v4505_v55, 4  ;;  %vm9165_vm6 = vcmp.eq.f32.partialorder %v4432_v8, 8.507059e+37  ;;  %v4435_v10 = vor.u32 1.1754944e-38, %v4434_v46 }
 0x459   : > { %v9170_v1 = vperm.slane %v4860_v14, %v6074_v54  ;;  %v4929_v52 = vrot.slane %v9153_v20, 4  ;;  %vm4415_vm7 = vweird.f32 %v8905_v39  ;;  %v4418_v38 = vand.u32 2147483647, %v8856_v37 }
 0x45a   : > { %v4915_v19 = vrot.slane %v4510_v62, 4  ;;  %v4425_v63 = vsub.f32 1.0, %v4424_v48  ;;  %vm4429_vm9 = vweird.f32 %v5939_v32  ;;  %vm9175_vm8 = vmor %vm4414_vm5, %vm4415_vm7  ;;  %v4420_v8 = vand.u32 2147483648, %v8856_v37 }
 0x45b   : > { %v4862_v46 = vsel %vm373_vm1, %v9102_v11, %v4861_v49  ;;  %v4417_v28 = vsel %vm9175_vm8, %v8905_v39, %v4413_v23  ;;  %v4704_v34 = vsel %vm373_vm1, %v4703_v53, %v8796_v58  ;;  %v4706_v16 = vsel %vm373_vm1, %v8875_v13, %v4705_v56  ;;  %vm4430_vm10 = vmor %vm4428_vm14, %vm4429_vm9 }
 0x45c   : > { %v4941_v21 = vrot.slane %v9162_v9, 4  ;;  %v4426_v37 = vmul.f32 %v5939_v32, %v4425_v63  ;;  %v4421_v35 = vor.u32 1.1754944e-38, %v4420_v8  ;;  %v4710_v11 = vperm.slane %v4704_v34, %v6218_v57 }
 0x45d   : > { %vm4419_vm13 = vcmp.eq.f32.partialorder %v4418_v38, 8.507059e+37  ;;  %v4714_v39 = vperm.slane %v4706_v16, %v6218_v57  ;;  %v4716_v53 = vsel %vm373_vm1, %v4715_v22, %v8780_v36  ;;  %v4726_v58 = vperm.slane %v8945_v40, %v6218_v57 }
 0x45e   : > { %v4427_v55 = vadd.f32 %v5939_v32, %v4426_v37  ;;  %v4422_v56 = vsel %vm4419_vm13, %v4421_v35, %v4417_v28  ;;  %v4722_v13 = vperm.slane %v4716_v53, %v6218_v57  ;;  %v4727_v17 = vrot.slane %v4710_v11, 4 }
 0x45f   : > { %v9204_v3 = vperm.slane %v4862_v46, %v6074_v54  ;;  %v4506_v0 = vmul.f32 %v4422_v56, %v3984_v47  ;;  %v4729_v14 = vrot.slane %v4714_v39, 4  ;;  %v4733_v51 = vrot.slane %v4726_v58, 4 }
 0x460   : > { %v4871_v36 = vrot.slane %v9170_v1, 4  ;;  %v4431_v22 = vsel %vm4430_vm10, %v5939_v32, %v4427_v55  ;;  %v4784_v40 = vsel %vm373_vm1, 0.0, %v4783_v31  ;;  %v4788_v49 = vsel %vm373_vm1, 0.0, %v4787_v30 }
 0x461   : > { %v4436_v23 = vsel %vm9165_vm6, %v4435_v10, %v4431_v22  ;;  %v4916_v25 = vsel %vm373_vm1, %v4915_v19, %v4506_v0  ;;  %v4917_v48 = vrot.slane %v4506_v0, 4  ;;  %v4730_v38 = vsel %vm373_vm1, 0.0, %v4729_v14 }
 0x462   : > { %v4507_v63 = vmul.f32 %v4436_v23, %v9074_v26  ;;  %v4922_v32 = vperm.slane %v4916_v25, %v6074_v54  ;;  %v4728_v44 = vsel %vm373_vm1, 0.0, %v4727_v17  ;;  %v4731_v8 = vrot.slane %v4722_v13, 4 }
 0x463   : > { %v4918_v31 = vsel %vm373_vm1, %v4510_v62, %v4917_v48  ;;  %v5121_v46 = vsel %vm373_vm1, %v4729_v14, %v4710_v11  ;;  %v5126_v30 = vrot.slane %v4730_v38, 4  ;;  %v5132_v12 = vsel %vm373_vm1, %v4733_v51, %v4722_v13 }
 0x464   : > { %v4847_v10 = vrot.slane %v4507_v63, 4  ;;  %v4850_v19 = vsel %vm373_vm1, %v4507_v63, %v4849_v59  ;;  %v4926_v28 = vperm.slane %v4918_v31, %v6074_v54  ;;  %v4927_v34 = vrot.slane %v4922_v32, 4 }
 0x465   : > { %v9229_v26 = vperm.slane %v4850_v19, %v6074_v54  ;;  %v4930_v16 = vsel %vm373_vm1, %v4922_v32, %v4929_v52  ;;  %v5125_v37 = vperm.slane %v5121_v46, %v6074_v54  ;;  %v5127_v62 = vsel %vm373_vm1, %v5126_v30, %v4728_v44 }
 0x466   : > { %v4848_v47 = vsel %vm373_vm1, %v4847_v10, %v9095_v6  ;;  %v4928_v35 = vsel %vm373_vm1, %v4927_v34, %v9153_v20  ;;  %v4938_v59 = vperm.slane %v4930_v16, %v6218_v57  ;;  %v4939_v11 = vrot.slane %v4926_v28, 4 }
 0x467   : > { %v9240_v39 = vperm.slane %v4848_v47, %v6074_v54  ;;  %v9243_v53 = vperm.slane %v4928_v35, %v6218_v57  ;;  %v4942_v52 = vsel %vm373_vm1, %v4926_v28, %v4941_v21  ;;  %v4734_v58 = vsel %vm373_vm1, 0.0, %v4733_v51 }
 0x468   : > { %v4940_v55 = vsel %vm373_vm1, %v4939_v11, %v9162_v9  ;;  %v4950_v6 = vperm.slane %v4942_v52, %v6218_v57  ;;  %v9250_v56 = vrot.slane %v4938_v59, 4  ;;  %v5131_v20 = vperm.slane %v5127_v62, %v6074_v54 }
 0x469   : > { %v9254_v13 = vperm.slane %v4940_v55, %v6218_v57  ;;  %v4951_v17 = vrot.slane %v9243_v53, 4  ;;  %v4732_v0 = vsel %vm373_vm1, 0.0, %v4731_v8  ;;  %v5136_v21 = vperm.slane %v5132_v12, %v6074_v54 }
 0x46a   : > { %v4885_v14 = vrot.slane %v9229_v26, 4  ;;  %v5137_v51 = vrot.slane %v4734_v58, 4  ;;  %v5145_v22 = vrot.slane %v5125_v37, 4  ;;  %v5175_v9 = vsel %vm373_vm1, %v8963_v27, %v8961_v61 }
 0x46b   : > { %v4873_v23 = vrot.slane %v9240_v39, 4  ;;  %v9266_v25 = vsel %vm373_vm1, 0.0, %v9250_v56  ;;  %v9268_v48 = vrot.slane %v4950_v6, 4  ;;  %v5157_v38 = vrot.slane %v5136_v21, 4 }
 0x46c   : > { %v9271_v63 = vsel %vm373_vm1, 0.0, %v4951_v17  ;;  %v5138_v32 = vsel %vm373_vm1, %v5137_v51, %v4732_v0  ;;  %v5146_v44 = vsel %vm373_vm1, %v5131_v20, %v5145_v22  ;;  %v5143_v8 = vrot.slane %v5131_v20, 4 }
 0x46d   : > { %v4955_v31 = vrot.slane %v9254_v13, 4  ;;  %v5142_v61 = vperm.slane %v5138_v32, %v6074_v54  ;;  %v5154_v27 = vperm.slane %v5146_v44, %v6218_v57  ;;  %v5179_v46 = vperm.slane %v5175_v9, %v6074_v54 }
 0x46e   : > { %v5144_v30 = vsel %vm373_vm1, %v5143_v8, %v5125_v37  ;;  %v5181_v12 = vsel %vm373_vm1, %v5180_v4, %v4784_v40  ;;  %v5186_v10 = vsel %vm373_vm1, %v8951_v7, %v8949_v29  ;;  %v9796_v19 = vrot.slane %v8967_v42, 4 }
 0x46f   : > { %v5158_v34 = vsel %vm373_vm1, %v5142_v61, %v5157_v38  ;;  %v5173_v16 = vrot.slane %v5154_v27, 4  ;;  %v9291_v62 = vperm.slane %v5144_v30, %v6218_v57  ;;  %v5155_v47 = vrot.slane %v5142_v61, 4 }
 0x470   : > { %v5192_v28 = vsel %vm373_vm1, %v9796_v19, %v4788_v49  ;;  %v5166_v37 = vperm.slane %v5158_v34, %v6218_v57  ;;  %v5185_v33 = vperm.slane %v5181_v12, %v6074_v54  ;;  %v5190_v4 = vperm.slane %v5186_v10, %v6074_v54 }
 0x471   : > { %v5196_v40 = vperm.slane %v5192_v28, %v6074_v54  ;;  %v9299_v29 = vsel %vm373_vm1, 0.0, %v9268_v48  ;;  %v5156_v7 = vsel %vm373_vm1, %v5155_v47, %v5136_v21  ;;  %v5169_v42 = vrot.slane %v9291_v62, 4 }
 0x472   : > { %v5199_v49 = vrot.slane %v5179_v46, 4  ;;  %v5171_v35 = vrot.slane %v5166_v37, 4  ;;  %v5174_v59 = vsel %vm373_vm1, %v5166_v37, %v5173_v16  ;;  %v9305_v11 = vperm.slane %v5156_v7, %v6218_v57 }
 0x473   : > { %v5211_v52 = vrot.slane %v5190_v4, 4  ;;  %5469 = vrot.lane.b32.xlu1 %v5174_v59, %s5956_s26  ;;  %v5197_v55 = vrot.slane %v5185_v33, 4  ;;  %v5209_v6 = vrot.slane %v5196_v40, 4  ;;  %v9797_v20 = vrot.slane %v9012_v15, 4 }
 0x474   : > { %v5200_v58 = vsel %vm373_vm1, %v5185_v33, %v5199_v49  ;;  %v5172_v0 = vsel %vm373_vm1, %v5171_v35, %v5154_v27  ;;  %v5170_v21 = vsel %vm373_vm1, %v9305_v11, %v5169_v42  ;;  %v9798_v22 = vrot.slane %v9070_v41, 4 }
 0x475   : > { %v4816_v17 = vsel %vm373_vm1, %v9797_v20, %v9070_v41  ;;  %v5208_v51 = vperm.slane %v5200_v58, %v6218_v57  ;;  %v5342_v38 = vrot.slane %v9266_v25, 4  ;;  %5437 = vrot.lane.b32.xlu2 %v5172_v0, %s5955_s25  ;;  %5405 = vrot.lane.b32.xlu0 %v5170_v21, %s5957_s27  ;;  %v5212_v32 = vsel %vm373_vm1, %v5196_v40, %v5211_v52 }
 0x476   : > { %v4818_v9 = vsel %vm373_vm1, %v9012_v15, %v9798_v22  ;;  %v5198_v44 = vsel %vm373_vm1, %v5197_v55, %v5179_v46  ;;  %v5210_v8 = vsel %vm373_vm1, %v5209_v6, %v5190_v4  ;;  %v5353_v61 = vrot.slane %v9299_v29, 4 }
 0x477   : > { %v5220_v27 = vperm.slane %v5212_v32, %v6218_v57  ;;  %v5227_v41 = vrot.slane %v5208_v51, 4  ;;  %v9330_v30 = vperm.slane %v5198_v44, %v6218_v57  ;;  %v4822_v15 = vperm.slane %v4816_v17, %v6218_v57 }
 0x478   : > { %v4826_v25 = vperm.slane %v4818_v9, %v6218_v57  ;;  %v9799_v12 = vrot.slane %v8980_v43, 4  ;;  %v9800_v46 = vrot.slane %v9061_v24, 4  ;;  %v9343_v34 = vperm.slane %v5210_v8, %v6218_v57 }
 0x479   : > { %v5225_v28 = vrot.slane %v5220_v27, 4  ;;  %v5223_v16 = vrot.slane %v9330_v30, 4  ;;  %v4956_v47 = vsel %vm373_vm1, 0.0, %v4955_v31  ;;  %v4839_v4 = vrot.slane %v4822_v15, 4 }
 0x47a   : > { %v4828_v10 = vsel %vm373_vm1, %v9799_v12, %v9061_v24  ;;  %v4830_v19 = vsel %vm373_vm1, %v8980_v43, %v9800_v46  ;;  %v4841_v40 = vrot.slane %v4826_v25, 4  ;;  %v5228_v29 = vsel %vm373_vm1, %v5220_v27, %v5227_v41 }
 0x47b   : > { %v4834_v37 = vperm.slane %v4828_v10, %v6218_v57  ;;  %v4838_v33 = vperm.slane %v4830_v19, %v6218_v57  ;;  %v5224_v24 = vsel %vm373_vm1, %v9343_v34, %v5223_v16  ;;  %v5337_v43 = vsel %vm373_vm1, %v9250_v56, %v9243_v53 }
 0x47c   : > { %v5343_v7 = vsel %vm373_vm1, %v5342_v38, %v9271_v63  ;;  %v5226_v31 = vsel %vm373_vm1, %v5225_v28, %v5208_v51  ;;  %5407 = vrot.lane.b32.xlu1 %v5224_v24, %s5957_s27  ;;  %v4842_v42 = vsel %vm373_vm1, 0.0, %v4841_v40  ;;  %v4840_v59 = vsel %vm373_vm1, 0.0, %v4839_v4 }
 0x47d   : > { %v4843_v49 = vrot.slane %v4834_v37, 4  ;;  %v4845_v35 = vrot.slane %v4838_v33, 4  ;;  %v5229_v52 = vsel %vm373_vm1, %v4841_v40, %v4822_v15  ;;  %v5234_v58 = vrot.slane %v4842_v42, 4  ;;  %5471 = vrot.lane.b32.xlu2 %v5228_v29, %s5956_s26  ;;  %5439 = vrot.lane.b32.xlu0 %v5226_v31, %s5955_s25 }
 0x47e   : > { %v9363_v55 = vperm.slane %v5343_v7, %v6074_v54  ;;  %v5233_v56 = vperm.slane %v5229_v52, %v6074_v54  ;;  %v9371_v6 = vperm.slane %v5337_v43, %v6074_v54  ;;  %v5348_v21 = vsel %vm373_vm1, %v9268_v48, %v9254_v13 }
 0x47f   : > { %v4846_v53 = vsel %vm373_vm1, 0.0, %v4845_v35  ;;  %v5240_v63 = vsel %vm373_vm1, %v4845_v35, %v4834_v37  ;;  %v5235_v20 = vsel %vm373_vm1, %v5234_v58, %v4840_v59  ;;  %v4844_v51 = vsel %vm373_vm1, 0.0, %v4843_v49  ;;  %v5400_v58 = vpop.permute.xlu0 %5399 }
 0x480   : > { %v5244_v17 = vperm.slane %v5240_v63, %v6074_v54  ;;  %v5245_v0 = vrot.slane %v4846_v53, 4  ;;  %v5239_v22 = vperm.slane %v5235_v20, %v6074_v54  ;;  %v5253_v9 = vrot.slane %v5233_v56, 4  ;;  %v5464_v63 = vpop.permute.xlu1 %5463 }
 0x481   : > { %v5354_v38 = vsel %vm373_vm1, %v5353_v61, %v4956_v47  ;;  %v5359_v27 = vrot.slane %v9363_v55, 4  ;;  %v9389_v48 = vperm.slane %v5348_v21, %v6074_v54  ;;  %v4872_v12 = vsel %vm373_vm1, %v4871_v36, %v9240_v39 }
 0x482   : > { %v5246_v32 = vsel %vm373_vm1, %v5245_v0, %v4844_v51  ;;  %v5265_v44 = vrot.slane %v5244_v17, 4  ;;  %v9383_v8 = vperm.slane %v5354_v38, %v6074_v54  ;;  %v5254_v15 = vsel %vm373_vm1, %v5239_v22, %v5253_v9 }
 0x483   : > { %v5250_v41 = vperm.slane %v5246_v32, %v6074_v54  ;;  %v5251_v13 = vrot.slane %v5239_v22, 4  ;;  %v5360_v25 = vsel %vm373_vm1, %v5359_v27, %v9371_v6  ;;  %v4874_v10 = vsel %vm373_vm1, %v9170_v1, %v4873_v23 }
 0x484   : > { %v5371_v61 = vrot.slane %v9383_v8, 4  ;;  %v9405_v16 = vperm.slane %v5360_v25, %v6218_v57  ;;  %v4883_v47 = vrot.slane %v9204_v3, 4  ;;  %v9409_v37 = vperm.slane %v5254_v15, %v6218_v57 }
 0x485   : > { %v5266_v46 = vsel %vm373_vm1, %v5250_v41, %v5265_v44  ;;  %v5252_v19 = vsel %vm373_vm1, %v5251_v13, %v5233_v56  ;;  %v5263_v28 = vrot.slane %v5250_v41, 4  ;;  %v4878_v33 = vperm.slane %v4872_v12, %v6218_v57  ;;  %v5432_v41 = vpop.permute.xlu2 %5431 }
 0x486   : > { %v9412_v36 = vperm.slane %v5266_v46, %v6218_v57  ;;  %v9415_v39 = vperm.slane %v5252_v19, %v6218_v57  ;;  %v5372_v23 = vsel %vm373_vm1, %v5371_v61, %v9389_v48  ;;  %v4882_v4 = vperm.slane %v4874_v10, %v6218_v57 }
 0x487   : > { %v5264_v1 = vsel %vm373_vm1, %v5263_v28, %v5244_v17  ;;  %v4884_v43 = vsel %vm373_vm1, %v4883_v47, %v9229_v26  ;;  %v5385_v7 = vrot.slane %v9405_v16, 4  ;;  %v4886_v31 = vsel %vm373_vm1, %v9204_v3, %v4885_v14 }
 0x488   : > { %v5279_v40 = vrot.slane %v9412_v36, 4  ;;  %v9424_v29 = vperm.slane %v5264_v1, %v6218_v57  ;;  %v5277_v24 = vrot.slane %v9415_v39, 4  ;;  %v4890_v42 = vperm.slane %v4884_v43, %v6218_v57 }
 0x489   : > { %v4894_v59 = vperm.slane %v4886_v31, %v6218_v57  ;;  %v5005_v52 = vrot.slane %v8495_v50, 4  ;;  %v9444_v26 = vperm.slane %v5372_v23, %v6218_v57  ;;  %v4895_v3 = vrot.slane %v4878_v33, 4 }
 0x48a   : > { %v5280_v49 = vsel %vm373_vm1, %v5279_v40, %v9409_v37  ;;  %v5278_v35 = vsel %vm373_vm1, %v9424_v29, %v5277_v24  ;;  %v4897_v14 = vrot.slane %v4882_v4, 4  ;;  %v4899_v53 = vrot.slane %v4890_v42, 4 }
 0x48b   : > { %5441 = vrot.lane.b32.xlu1 %v5280_v49, %s5955_s25  ;;  %5409 = vrot.lane.b32.xlu2 %v5278_v35, %s5957_s27  ;;  %v4901_v56 = vrot.slane %v4894_v59, 4  ;;  %v5386_v20 = vsel %vm373_vm1, %v9444_v26, %v5385_v7  ;;  %v5361_v0 = vrot.slane %v9371_v6, 4  ;;  %v4896_v38 = vsel %vm373_vm1, 0.0, %v4895_v3  ;;  %v5434_v7 = vpop.permute.xlu0 %5433 }
 0x48c   : > { %v4898_v17 = vsel %vm373_vm1, 0.0, %v4897_v14  ;;  %v5283_v50 = vsel %vm373_vm1, %v4897_v14, %v4878_v33  ;;  %v5006_v27 = vsel %vm373_vm1, %v5005_v52, %v8482_v18  ;;  %v4900_v15 = vsel %vm373_vm1, 0.0, %v4899_v53 }
 0x48d   : > { %v4902_v21 = vsel %vm373_vm1, 0.0, %v4901_v56  ;;  %v5287_v51 = vperm.slane %v5283_v50, %v6074_v54  ;;  %v5288_v22 = vrot.slane %v4898_v17, 4  ;;  %v5294_v9 = vsel %vm373_vm1, %v4901_v56, %v4890_v42  ;;  %v5466_v3 = vpop.permute.xlu2 %5465 }
 0x48e   : > { %v5298_v32 = vperm.slane %v5294_v9, %v6074_v54  ;;  %v5299_v44 = vrot.slane %v4902_v21, 4  ;;  %vm5503_vm11 = vcmask 195584   ;;  %v5487_v18 = vsel %vm2863_vm2, %v5006_v27, %v5400_v58 }
 0x48f   : > { %v5289_v6 = vsel %vm373_vm1, %v5288_v22, %v4896_v38  ;;  %v5307_v13 = vrot.slane %v5287_v51, 4  ;;  %v5059_v10 = vrot.slane %v8575_v5, 4  ;;  %v5495_v19 = vsel %vm3310_vm3, %v5487_v18, %v5432_v41  ;;  %v5402_v5 = vpop.permute.xlu1 %5401 }
 0x490   : > { %v5293_v25 = vperm.slane %v5289_v6, %v6074_v54  ;;  %v5300_v61 = vsel %vm373_vm1, %v5299_v44, %v4900_v15  ;;  %v5319_v12 = vrot.slane %v5298_v32, 4  ;;  %v5373_v1 = vrot.slane %v9389_v48, 4 }
 0x491   : > { %v5304_v46 = vperm.slane %v5300_v61, %v6074_v54  ;;  %v5504_v23 = vsel %vm5503_vm11, %v5495_v19, %v5464_v63  ;;  %v5362_v43 = vsel %vm373_vm1, %v9363_v55, %v5361_v0  ;;  %v5060_v49 = vsel %vm373_vm1, %v5059_v10, %v8558_v60 }
 0x492   : > { %v5308_v28 = vsel %vm373_vm1, %v5293_v25, %v5307_v13  ;;  %v5305_v47 = vrot.slane %v5293_v25, 4  ;;  %5512 = vst.msk [vmem:[%s9466_s30] sm:$0xff] %vm250_vm0, %v5504_v23  ;;  %v5374_v59 = vsel %vm373_vm1, %v9383_v8, %v5373_v1  ;;  %v5488_v52 = vsel %vm2863_vm2, %v5060_v49, %v5402_v5 }
 0x493   : > { %5413 = vrot.lane.b32.xlu1 %v5386_v20, %s5957_s27  ;;  %v5316_v33 = vperm.slane %v5308_v28, %v6218_v57  ;;  %v5320_v4 = vsel %vm373_vm1, %v5304_v46, %v5319_v12  ;;  %v5317_v40 = vrot.slane %v5304_v46, 4  ;;  %v5496_v53 = vsel %vm3310_vm3, %v5488_v52, %v5434_v7 }
 0x494   : > { %v5328_v54 = vperm.slane %v5320_v4, %v6218_v57  ;;  %v5306_v24 = vsel %vm373_vm1, %v5305_v47, %v5287_v51  ;;  %v5370_v63 = vperm.slane %v5362_v43, %v6218_v57  ;;  %v5505_v60 = vsel %vm5503_vm11, %v5496_v53, %v5466_v3 }
 0x495   : > { %v5335_v31 = vrot.slane %v5316_v33, 4  ;;  %v5312_v48 = vperm.slane %v5306_v24, %v6218_v57  ;;  %v5318_v42 = vsel %vm373_vm1, %v5317_v40, %v5298_v32  ;;  %v5382_v20 = vperm.slane %v5374_v59, %v6218_v57  ;;  %5513 = vst.msk [vmem:[%s9466_s30 + $0x8] sm:$0xff] %vm250_vm0, %v5505_v60 }
 0x496   : > { %v5333_v35 = vrot.slane %v5328_v54, 4  ;;  %v5324_v55 = vperm.slane %v5318_v42, %v6218_v57  ;;  %v5389_v17 = vrot.slane %v5370_v63, 4  ;;  %v5281_v51 = vrot.slane %v9409_v37, 4 }
 0x497   : > { %v5336_v14 = vsel %vm373_vm1, %v5328_v54, %v5335_v31  ;;  %v5331_v58 = vrot.slane %v5312_v48, 4  ;;  %v5387_v50 = vrot.slane %v5382_v20, 4  ;;  %v5113_v22 = vrot.slane %v9038_v45, 4 }
 0x498   : > { %v5334_v56 = vsel %vm373_vm1, %v5333_v35, %v5316_v33  ;;  %v5390_v0 = vsel %vm373_vm1, %v5382_v20, %v5389_v17  ;;  %v5282_v57 = vsel %vm373_vm1, %v9412_v36, %v5281_v51  ;;  %v5275_v36 = vrot.slane %v9424_v29, 4 }
 0x499   : > { %5443 = vrot.lane.b32.xlu2 %v5334_v56, %s5955_s25  ;;  %v5332_v8 = vsel %vm373_vm1, %v5324_v55, %v5331_v58  ;;  %v5388_v21 = vsel %vm373_vm1, %v5387_v50, %v5370_v63  ;;  %v5114_v38 = vsel %vm373_vm1, %v5113_v22, %v9025_v2  ;;  %v5329_v15 = vrot.slane %v5324_v55, 4 }
 0x49a   : > { %5411 = vrot.lane.b32.xlu0 %v5332_v8, %s5957_s27  ;;  %v5276_v45 = vsel %vm373_vm1, %v5275_v36, %v9415_v39  ;;  %v5167_v2 = vrot.slane %v9305_v11, 4  ;;  %v5221_v10 = vrot.slane %v9343_v34, 4  ;;  %v5383_v24 = vrot.slane %v9444_v26, 4 }
 0x49b   : > { %5475 = vrot.lane.b32.xlu1 %v5336_v14, %s5956_s26  ;;  %v5330_v6 = vsel %vm373_vm1, %v5329_v15, %v5312_v48 }
 0x49c   : > { %v5168_v25 = vsel %vm373_vm1, %v5167_v2, %v9291_v62  ;;  %v5222_v11 = vsel %vm373_vm1, %v5221_v10, %v9330_v30  ;;  %v5384_v7 = vsel %vm373_vm1, %v5383_v24, %v9405_v16 }
 0x49e   : > { %v5404_v9 = vpop.permute.xlu2 %5403 }
 0x49f   : > { %v5489_v32 = vsel %vm2863_vm2, %v5114_v38, %v5404_v9 }
 0x4a1   : > { %5477 = vrot.lane.b32.xlu2 %v5390_v0, %s5956_s26 }
 0x4a2   : > { %5445 = vrot.lane.b32.xlu0 %v5388_v21, %s5955_s25 }
 0x4aa   : > { %5473 = vrot.lane.b32.xlu0 %v5282_v57, %s5956_s26 }
 0x4b3   : > { %v5468_v27 = vpop.permute.xlu0 %5467 }
 0x4b5   : > { %v5436_v44 = vpop.permute.xlu1 %5435 }
 0x4b6   : > { %v5497_v41 = vsel %vm3310_vm3, %v5489_v32, %v5436_v44 }
 0x4b7   : > { %v5506_v37 = vsel %vm5503_vm11, %v5497_v41, %v5468_v27 }
 0x4b8   : > { %5514 = vst.msk [vmem:[%s9466_s30 + $0x10] sm:$0xff] %vm250_vm0, %v5506_v37 }
 0x4cf   : > { %v5438_v12 = vpop.permute.xlu2 %5437 }
 0x4d7   : > { %v5472_v28 = vpop.permute.xlu2 %5471 }
 0x4e5   : > { %v5470_v13 = vpop.permute.xlu1 %5469  ;;  %v5410_v23 = vpop.permute.xlu2 %5409 }
 0x4e6   : > { %v5492_v59 = vsel %vm2863_vm2, %v5276_v45, %v5410_v23 }
 0x4e7   : > { %v5406_v61 = vpop.permute.xlu0 %5405 }
 0x4e8   : > { %v5490_v18 = vsel %vm2863_vm2, %v5168_v25, %v5406_v61 }
 0x4e9   : > { %v5498_v29 = vsel %vm3310_vm3, %v5490_v18, %v5438_v12 }
 0x4ea   : > { %v5507_v39 = vsel %vm5503_vm11, %v5498_v29, %v5470_v13 }
 0x4eb   : > { %5515 = vst.msk [vmem:[%s9466_s30 + $0x18] sm:$0xff] %vm250_vm0, %v5507_v39 }
 0x4ee   : > { %v5408_v46 = vpop.permute.xlu1 %5407 }
 0x4ef   : > { %v5491_v19 = vsel %vm2863_vm2, %v5222_v11, %v5408_v46  ;;  %v5440_v62 = vpop.permute.xlu0 %5439 }
 0x4f0   : > { %v5499_v47 = vsel %vm3310_vm3, %v5491_v19, %v5440_v62 }
 0x4f1   : > { %v5508_v1 = vsel %vm5503_vm11, %v5499_v47, %v5472_v28 }
 0x4f2   : > { %5516 = vst.msk [vmem:[%s9466_s30 + $0x20] sm:$0xff] %vm250_vm0, %v5508_v1 }
 0x4f3   : > { %v5444_v4 = vpop.permute.xlu2 %5443 }
 0x4fb   : > { %v5478_v42 = vpop.permute.xlu2 %5477 }
 0x4fd   : > { %v5442_v34 = vpop.permute.xlu1 %5441 }
 0x4fe   : > { %v5500_v26 = vsel %vm3310_vm3, %v5492_v59, %v5442_v34 }
 0x505   : > { %v5414_v33 = vpop.permute.xlu1 %5413 }
 0x506   : > { %v5494_v31 = vsel %vm2863_vm2, %v5384_v7, %v5414_v33 }
 0x50c   : > { %v5412_v40 = vpop.permute.xlu0 %5411 }
 0x50d   : > { %v5493_v30 = vsel %vm2863_vm2, %v5330_v6, %v5412_v40  ;;  %v5476_v5 = vpop.permute.xlu1 %5475 }
 0x50e   : > { %v5501_v54 = vsel %vm3310_vm3, %v5493_v30, %v5444_v4 }
 0x50f   : > { %v5510_v43 = vsel %vm5503_vm11, %v5501_v54, %v5476_v5 }
 0x510   : > { %5518 = vst.msk [vmem:[%s9466_s30 + $0x30] sm:$0xff] %vm250_vm0, %v5510_v43 }
 0x514   : > { %v5446_v48 = vpop.permute.xlu0 %5445 }
 0x515   : > { %v5502_v49 = vsel %vm3310_vm3, %v5494_v31, %v5446_v48 }
 0x516   : > { %v5511_v35 = vsel %vm5503_vm11, %v5502_v49, %v5478_v42 }
 0x517   : > { %5519 = vst.msk [vmem:[%s9466_s30 + $0x38] sm:$0xff] %vm250_vm0, %v5511_v35 }
 0x51c   : > { %v5474_v52 = vpop.permute.xlu0 %5473 }
 0x51d   : > { %v5509_v3 = vsel %vm5503_vm11, %v5500_v26, %v5474_v52 }
 0x51e   : > { %5517 = vst.msk [vmem:[%s9466_s30 + $0x28] sm:$0xff] %vm250_vm0, %v5509_v3 }
 0x51f PF: > { %s14_s15 = sadd.s32 1, %s5946_s15  }
 0x520   : > { %p11_p4 = scmp.ge.s32.totalorder %s14_s15, 4  }
 0x522   :  { %13 = sbr.rel (!%p11_p4) target bundleno = 1 (0x1), region = 66 }

</bundles_post_ra>
